<compile_context>
chip_gen: v6e
topology: v6e:2x2x1
jax: 0.10.0
libtpu: 0.0.40
codegen_flags: <defaults>
</compile_context>

<pallas_src>
import functools

import jax
import jax.numpy as jnp
from jax.experimental import pallas as pl
from jax.experimental.pallas import tpu as pltpu


# ----------------------------- in-kernel helpers -----------------------------

def _layer_norm(x, g, b, eps=1e-5):
    """Row-wise LayerNorm over the last dim (one pass). x: (M, D); g, b: (1, D)."""
    d = x.shape[-1]
    s1 = jnp.sum(x, axis=-1, keepdims=True)
    s2 = jnp.sum(x * x, axis=-1, keepdims=True)
    mean = s1 * (1.0 / d)
    var = s2 * (1.0 / d) - mean * mean
    inv = jax.lax.rsqrt(var + eps)
    return (x - mean) * inv * g + b


def _erf(x):
    # Abramowitz & Stegun 7.1.26 polynomial, |err| < 1.5e-7 (f32-exact).
    # TODO(synk): replace with lax.erf if/when Mosaic gains a native erf lowering.
    p = 0.3275911
    a1, a2, a3, a4, a5 = (0.254829592, -0.284496736, 1.421413741,
                          -1.453152027, 1.061405429)
    ax = jnp.abs(x)
    t = 1.0 / (1.0 + p * ax)
    poly = ((((a5 * t + a4) * t + a3) * t + a2) * t + a1) * t
    y = 1.0 - poly * jnp.exp(-ax * ax)
    return jnp.where(x < 0.0, -y, y)


def _gelu_exact(x):
    # matches nn.GELU() (erf-based), up to f32 rounding
    return 0.5 * x * (1.0 + _erf(x * 0.7071067811865476))


# --------------------------------- kernel ------------------------------------

def _vit_kernel(tokens_ref, pw_ref, pb_ref, cls_ref, pos_ref,
                ln_ref, qkv_w_ref, out_w_ref, out_b_ref,
                ff_w1_ref, ff_b1_ref, ff_w2_ref, ff_b2_ref,
                hln_ref, hw_ref, hb_ref,
                logits_ref, attn_ref, x_ref,
                *, heads, dim_head, n_valid, scale, depth):
    l = pl.program_id(0)
    B, n_pad, dim = x_ref.shape
    inner = heads * dim_head
    M = B * n_pad

    # ---- step 0: fused patch embedding + cls token + positional embedding ---
    @pl.when(l == 0)
    def _embed():
        patch_dim = tokens_ref.shape[-1]
        emb = jnp.dot(tokens_ref[...].reshape(M, patch_dim), pw_ref[...],
                      preferred_element_type=jnp.float32) + pb_ref[...]
        x0 = emb.reshape(B, n_pad, dim)
        tok_id = jax.lax.broadcasted_iota(jnp.int32, (B, n_pad, dim), 1)
        cls_b = jnp.broadcast_to(cls_ref[...].reshape(1, 1, dim),
                                 (B, n_pad, dim))
        x0 = jnp.where(tok_id == 0, cls_b, x0)
        # pos rows >= n_valid are zero-padded; padded token rows only need to
        # stay finite (they are masked out of attention and dropped outside).
        x_ref[...] = x0 + pos_ref[...]

    x2 = x_ref[...].reshape(M, dim)

    # ------------------ PreNorm + multi-head self-attention ------------------
    xn = _layer_norm(x2, ln_ref[0:1, :], ln_ref[1:2, :])
    qkv = jnp.dot(xn, qkv_w_ref[...], preferred_element_type=jnp.float32)
    qkv3 = qkv.reshape(B, n_pad, 3 * inner)

    col = jax.lax.broadcasted_iota(jnp.int32, (n_pad, n_pad), 1)
    kmask = jnp.where(col < n_valid, 0.0, -1e30).astype(jnp.float32)
    kmask = kmask[None, :, :]

    proj = jnp.zeros((M, dim), jnp.float32)
    for h in range(heads):
        q = qkv3[:, :, h * dim_head:(h + 1) * dim_head]
        k = qkv3[:, :, inner + h * dim_head:inner + (h + 1) * dim_head]
        v = qkv3[:, :, 2 * inner + h * dim_head:2 * inner + (h + 1) * dim_head]
        dots = jnp.einsum('bqd,bkd->bqk', q, k,
                          preferred_element_type=jnp.float32) * scale
        dots = dots + kmask
        dots = dots - jnp.max(dots, axis=-1, keepdims=True)
        e = jnp.exp(dots)
        attn = e * pl.reciprocal(jnp.sum(e, axis=-1, keepdims=True), approx=True)
        attn_ref[h] = attn
        o = jnp.einsum('bqk,bkd->bqd', attn, v,
                       preferred_element_type=jnp.float32)
        # out-projection accumulated per head: concat(o_h) @ W == sum_h o_h @ W_h
        w_h = out_w_ref[h * dim_head:(h + 1) * dim_head, :]
        proj = proj + jnp.dot(o.reshape(M, dim_head), w_h,
                              preferred_element_type=jnp.float32)
    x2 = x2 + proj + out_b_ref[...]

    # ------------------------- PreNorm + FeedForward --------------------------
    xn2 = _layer_norm(x2, ln_ref[2:3, :], ln_ref[3:4, :])
    h1 = jnp.dot(xn2, ff_w1_ref[...], preferred_element_type=jnp.float32)
    h1 = _gelu_exact(h1 + ff_b1_ref[...])
    h2 = jnp.dot(h1, ff_w2_ref[...], preferred_element_type=jnp.float32)
    x2 = x2 + h2 + ff_b2_ref[...]
    x_ref[...] = x2.reshape(B, n_pad, dim)

    # --------------- final step: cls pooling + LayerNorm + mlp head ----------
    @pl.when(l == depth - 1)
    def _head():
        cls_feat = x2.reshape(B, n_pad, dim)[:, 0:1, :].reshape(B, dim)
        xh = _layer_norm(cls_feat, hln_ref[0:1, :], hln_ref[1:2, :])
        logits_ref[...] = (jnp.dot(xh, hw_ref[...],
                                   preferred_element_type=jnp.float32)
                           + hb_ref[...])


# --------------------------------- forward -----------------------------------

def vit_haar_forward(img, params, *, patch_size, heads, dim_head):
    # layout: img is NCHW (B, C, H, W), matching the PyTorch module.
    B, C, H, W = img.shape
    p = patch_size
    hN, wN = H // p, W // p
    num_patches = hN * wN
    n_valid = num_patches + 1
    patch_dim, dim = params["patch_w"].shape
    n_pad = params["pos"].shape[1]
    depth = params["qkv_w"].shape[0]
    inner = heads * dim_head
    mlp_dim = params["ff_w1"].shape[2]
    num_classes = params["head_w"].shape[1]
    scale = dim_head ** -0.5

    # glue: 'b c (h p1) (w p2) -> b (h w) (p1 p2 c)', then drop patches into a
    # zero token buffer (row 0 reserved for cls, rows >= n_valid are padding).
    x = img.reshape(B, C, hN, p, wN, p)
    x = jnp.transpose(x, (0, 2, 4, 3, 5, 1))
    patches = x.reshape(B, num_patches, p * p * C).astype(jnp.float32)
    tokens = jnp.zeros((B, n_pad, patch_dim), jnp.float32)
    tokens = jax.lax.dynamic_update_slice(tokens, patches, (0, 1, 0))

    kernel = functools.partial(_vit_kernel, heads=heads, dim_head=dim_head,
                               n_valid=n_valid, scale=scale, depth=depth)

    logits, attn_maps = pl.pallas_call(
        kernel,
        grid=(depth,),
        in_specs=[
            pl.BlockSpec((B, n_pad, patch_dim), lambda l: (0, 0, 0)),   # tokens
            pl.BlockSpec((patch_dim, dim), lambda l: (0, 0)),           # patch_w
            pl.BlockSpec((1, dim), lambda l: (0, 0)),                   # patch_b
            pl.BlockSpec((1, dim), lambda l: (0, 0)),                   # cls
            pl.BlockSpec((1, n_pad, dim), lambda l: (0, 0, 0)),         # pos
            pl.BlockSpec((None, 4, dim), lambda l: (l, 0, 0)),          # ln stack
            pl.BlockSpec((None, dim, 3 * inner), lambda l: (l, 0, 0)),  # qkv_w
            pl.BlockSpec((None, inner, dim), lambda l: (l, 0, 0)),      # out_w
            pl.BlockSpec((None, 1, dim), lambda l: (l, 0, 0)),          # out_b
            pl.BlockSpec((None, dim, mlp_dim), lambda l: (l, 0, 0)),    # ff_w1
            pl.BlockSpec((None, 1, mlp_dim), lambda l: (l, 0, 0)),      # ff_b1
            pl.BlockSpec((None, mlp_dim, dim), lambda l: (l, 0, 0)),    # ff_w2
            pl.BlockSpec((None, 1, dim), lambda l: (l, 0, 0)),          # ff_b2
            pl.BlockSpec((2, dim), lambda l: (0, 0)),                   # head ln
            pl.BlockSpec((dim, num_classes), lambda l: (0, 0)),         # head_w
            pl.BlockSpec((1, num_classes), lambda l: (0, 0)),           # head_b
        ],
        out_specs=(
            pl.BlockSpec((B, num_classes), lambda l: (0, 0)),
            pl.BlockSpec((heads, B, n_pad, n_pad), lambda l: (l, 0, 0, 0)),
        ),
        out_shape=(
            jax.ShapeDtypeStruct((B, num_classes), jnp.float32),
            jax.ShapeDtypeStruct((depth * heads, B, n_pad, n_pad), jnp.float32),
        ),
        scratch_shapes=[pltpu.VMEM((B, n_pad, dim), jnp.float32)],
        compiler_params=pltpu.CompilerParams(
            dimension_semantics=("arbitrary",)),
    )(tokens, params["patch_w"], params["patch_b"], params["cls"],
      params["pos"], params["ln"], params["qkv_w"], params["out_w"],
      params["out_b"], params["ff_w1"], params["ff_b1"], params["ff_w2"],
      params["ff_b2"], params["head_ln"], params["head_w"], params["head_b"])

    attn_maps = attn_maps.reshape(depth, heads, B, n_pad, n_pad)
    attn_weights = [
        jnp.transpose(attn_maps[l], (1, 0, 2, 3))[:, :, :n_valid, :n_valid]
        for l in range(depth)
    ]
    return logits, attn_weights


# ------------------------------- parameters ----------------------------------

def init_params(key, *, patch_dim, dim, depth, heads, dim_head, mlp_dim,
                num_patches, num_classes, n_pad):
    inner = heads * dim_head
    n = num_patches + 1

    def nkey():
        nonlocal key
        key, sub = jax.random.split(key)
        return sub

    def randn(shape, scale=0.02):
        return scale * jax.random.normal(nkey(), shape, dtype=jnp.float32)

    pos = jax.random.normal(nkey(), (1, n, dim), dtype=jnp.float32)
    pos = jnp.pad(pos, ((0, 0), (0, n_pad - n), (0, 0)))

    params = {
        "patch_w": randn((patch_dim, dim)),
        "patch_b": randn((1, dim)),
        "cls": jax.random.normal(nkey(), (1, dim), dtype=jnp.float32),
        "pos": pos,
        "head_ln": jnp.stack([jnp.ones((dim,), jnp.float32),
                              jnp.zeros((dim,), jnp.float32)]),
        "head_w": randn((dim, num_classes)),
        "head_b": randn((1, num_classes)),
    }

    ln, qkv_w, out_w, out_b = [], [], [], []
    ff_w1, ff_b1, ff_w2, ff_b2 = [], [], [], []
    for _ in range(depth):
        ln.append(jnp.stack([jnp.ones((dim,), jnp.float32),
                             jnp.zeros((dim,), jnp.float32),
                             jnp.ones((dim,), jnp.float32),
                             jnp.zeros((dim,), jnp.float32)]))
        qkv_w.append(randn((dim, 3 * inner)))       # to_qkv has no bias
        out_w.append(randn((inner, dim)))
        out_b.append(randn((1, dim)))
        ff_w1.append(randn((dim, mlp_dim)))
        ff_b1.append(randn((1, mlp_dim)))
        ff_w2.append(randn((mlp_dim, dim)))
        ff_b2.append(randn((1, dim)))

    params.update({
        "ln": jnp.stack(ln), "qkv_w": jnp.stack(qkv_w),
        "out_w": jnp.stack(out_w), "out_b": jnp.stack(out_b),
        "ff_w1": jnp.stack(ff_w1), "ff_b1": jnp.stack(ff_b1),
        "ff_w2": jnp.stack(ff_w2), "ff_b2": jnp.stack(ff_b2),
    })
    return params


# ----------------------------------- main -------------------------------------

if __name__ == "__main__":
    image_size, patch_size, channels = 16, 4, 3
    dim, depth, heads, dim_head = 32, 2, 4, 8
    mlp_dim, num_classes = 64, 10
    B = 2

    num_patches = (image_size // patch_size) ** 2
    patch_dim = channels * patch_size * patch_size
    n_valid = num_patches + 1
    n_pad = ((n_valid + 7) // 8) * 8            # pad tokens to a sublane multiple

    key = jax.random.PRNGKey(0)
    k_img, k_params = jax.random.split(key)
    img = jax.random.normal(k_img, (B, channels, image_size, image_size),
                            dtype=jnp.float32)
    params = init_params(k_params, patch_dim=patch_dim, dim=dim, depth=depth,
                         heads=heads, dim_head=dim_head, mlp_dim=mlp_dim,
                         num_patches=num_patches, num_classes=num_classes,
                         n_pad=n_pad)

    fwd = jax.jit(functools.partial(vit_haar_forward, patch_size=patch_size,
                                    heads=heads, dim_head=dim_head))
    logits, attn_weights = fwd(img, params)
    jax.block_until_ready(logits)
    for a in attn_weights:
        jax.block_until_ready(a)

    assert logits.shape == (B, num_classes)
    assert len(attn_weights) == depth
    assert attn_weights[0].shape == (B, heads, n_valid, n_valid)
    assert bool(jnp.all(jnp.isfinite(logits)))
    print("KERNEL_OK")
</pallas_src>

<mosaic_0001>
module attributes {stable_mosaic.version = 11 : i64} {
  func.func @_vit_kernel(%arg0: i32, %arg1: memref<2x24x48xf32, #tpu.memory_space<vmem>>, %arg2: memref<48x32xf32, #tpu.memory_space<vmem>>, %arg3: memref<1x32xf32, #tpu.memory_space<vmem>>, %arg4: memref<1x32xf32, #tpu.memory_space<vmem>>, %arg5: memref<1x24x32xf32, #tpu.memory_space<vmem>>, %arg6: memref<1x4x32xf32, #tpu.memory_space<vmem>>, %arg7: memref<1x32x96xf32, #tpu.memory_space<vmem>>, %arg8: memref<1x32x32xf32, #tpu.memory_space<vmem>>, %arg9: memref<1x1x32xf32, #tpu.memory_space<vmem>>, %arg10: memref<1x32x64xf32, #tpu.memory_space<vmem>>, %arg11: memref<1x1x64xf32, #tpu.memory_space<vmem>>, %arg12: memref<1x64x32xf32, #tpu.memory_space<vmem>>, %arg13: memref<1x1x32xf32, #tpu.memory_space<vmem>>, %arg14: memref<2x32xf32, #tpu.memory_space<vmem>>, %arg15: memref<32x10xf32, #tpu.memory_space<vmem>>, %arg16: memref<1x10xf32, #tpu.memory_space<vmem>>, %arg17: memref<2x10xf32, #tpu.memory_space<vmem>>, %arg18: memref<4x2x24x24xf32, #tpu.memory_space<vmem>>, %arg19: memref<2x24x32xf32, #tpu.memory_space<vmem>>) attributes {dimension_semantics = [#tpu.dimension_semantics<arbitrary>], iteration_bounds = array<i64: 2>, scalar_prefetch = 0 : i64, scratch_operands = 1 : i64, tpu.core_type = #tpu.core_type<tc>, window_params = [{pipeline_mode = #tpu.pipeline_mode<synchronous>, transform_indices = @transform_0, window_bounds = array<i64: 2, 24, 48>}, {pipeline_mode = #tpu.pipeline_mode<synchronous>, transform_indices = @transform_1, window_bounds = array<i64: 48, 32>}, {pipeline_mode = #tpu.pipeline_mode<synchronous>, transform_indices = @transform_2, window_bounds = array<i64: 1, 32>}, {pipeline_mode = #tpu.pipeline_mode<synchronous>, transform_indices = @transform_3, window_bounds = array<i64: 1, 32>}, {pipeline_mode = #tpu.pipeline_mode<synchronous>, transform_indices = @transform_4, window_bounds = array<i64: 1, 24, 32>}, {transform_indices = @transform_5, window_bounds = array<i64: 1, 4, 32>}, {transform_indices = @transform_6, window_bounds = array<i64: 1, 32, 96>}, {transform_indices = @transform_7, window_bounds = array<i64: 1, 32, 32>}, {transform_indices = @transform_8, window_bounds = array<i64: 1, 1, 32>}, {transform_indices = @transform_9, window_bounds = array<i64: 1, 32, 64>}, {transform_indices = @transform_10, window_bounds = array<i64: 1, 1, 64>}, {transform_indices = @transform_11, window_bounds = array<i64: 1, 64, 32>}, {transform_indices = @transform_12, window_bounds = array<i64: 1, 1, 32>}, {pipeline_mode = #tpu.pipeline_mode<synchronous>, transform_indices = @transform_13, window_bounds = array<i64: 2, 32>}, {pipeline_mode = #tpu.pipeline_mode<synchronous>, transform_indices = @transform_14, window_bounds = array<i64: 32, 10>}, {pipeline_mode = #tpu.pipeline_mode<synchronous>, transform_indices = @transform_15, window_bounds = array<i64: 1, 10>}, {pipeline_mode = #tpu.pipeline_mode<synchronous>, transform_indices = @transform_16, window_bounds = array<i64: 2, 10>}, {transform_indices = @transform_17, window_bounds = array<i64: 4, 2, 24, 24>}]} {
    %c0_i32 = arith.constant 0 : i32
    %0 = arith.cmpi eq, %arg0, %c0_i32 : i32
    %1 = arith.extui %0 : i1 to i32
    %c0_i32_0 = arith.constant 0 : i32
    %2 = arith.cmpi ne, %1, %c0_i32_0 : i32
    scf.if %2 {
      %c0_113 = arith.constant 0 : index
      %c0_114 = arith.constant 0 : index
      %c0_115 = arith.constant 0 : index
      %242 = vector.load %arg1[%c0_113, %c0_114, %c0_115] : memref<2x24x48xf32, #tpu.memory_space<vmem>>, vector<2x24x48xf32>
      %243 = vector.shape_cast %242 : vector<2x24x48xf32> to vector<48x48xf32>
      %c0_116 = arith.constant 0 : index
      %c0_117 = arith.constant 0 : index
      %244 = vector.load %arg2[%c0_116, %c0_117] : memref<48x32xf32, #tpu.memory_space<vmem>>, vector<48x32xf32>
      %cst_118 = arith.constant dense<0.000000e+00> : vector<48x32xf32>
      %245 = tpu.matmul %243, %244, %cst_118 {dimension_numbers = #tpu.dot_dimension_numbers<[1], [0], [0], [1], [0, 0, 1, 1], [], []>} : vector<48x48xf32>, vector<48x32xf32>, vector<48x32xf32> -> vector<48x32xf32>
      %c0_119 = arith.constant 0 : index
      %c0_120 = arith.constant 0 : index
      %246 = vector.load %arg3[%c0_119, %c0_120] : memref<1x32xf32, #tpu.memory_space<vmem>>, vector<1x32xf32>
      %247 = vector.broadcast %246 : vector<1x32xf32> to vector<48x32xf32>
      %248 = arith.addf %245, %247 : vector<48x32xf32>
      %249 = vector.shape_cast %248 : vector<48x32xf32> to vector<2x24x32xf32>
      %250 = tpu.iota {dimensions = array<i32: 1>} : vector<2x24x32xi32>
      %c0_121 = arith.constant 0 : index
      %c0_122 = arith.constant 0 : index
      %251 = vector.load %arg4[%c0_121, %c0_122] : memref<1x32xf32, #tpu.memory_space<vmem>>, vector<1x32xf32>
      %252 = vector.shape_cast %251 : vector<1x32xf32> to vector<1x1x32xf32>
      %253 = vector.shape_cast %252 : vector<1x1x32xf32> to vector<1x1x32xf32>
      %254 = vector.broadcast %253 : vector<1x1x32xf32> to vector<2x24x32xf32>
      %c0_i32_123 = arith.constant 0 : i32
      %255 = vector.broadcast %c0_i32_123 : i32 to vector<2x24x32xi32>
      %256 = arith.cmpi eq, %250, %255 : vector<2x24x32xi32>
      %257 = arith.select %256, %254, %249 : vector<2x24x32xi1>, vector<2x24x32xf32>
      %c0_124 = arith.constant 0 : index
      %c0_125 = arith.constant 0 : index
      %c0_126 = arith.constant 0 : index
      %258 = vector.load %arg5[%c0_124, %c0_125, %c0_126] : memref<1x24x32xf32, #tpu.memory_space<vmem>>, vector<1x24x32xf32>
      %259 = vector.broadcast %258 : vector<1x24x32xf32> to vector<2x24x32xf32>
      %260 = arith.addf %257, %259 : vector<2x24x32xf32>
      %c0_127 = arith.constant 0 : index
      %c0_128 = arith.constant 0 : index
      %c0_129 = arith.constant 0 : index
      %261 = vector.load %arg19[%c0_127, %c0_128, %c0_129] : memref<2x24x32xf32, #tpu.memory_space<vmem>>, vector<2x24x32xf32>
      tpu.vector_store %arg19[%c0_127, %c0_128, %c0_129], %260 {strides = array<i32>} : memref<2x24x32xf32, #tpu.memory_space<vmem>>, vector<2x24x32xf32>,
    } else {
    }
    %c0 = arith.constant 0 : index
    %c0_1 = arith.constant 0 : index
    %c0_2 = arith.constant 0 : index
    %3 = vector.load %arg19[%c0, %c0_1, %c0_2] : memref<2x24x32xf32, #tpu.memory_space<vmem>>, vector<2x24x32xf32>
    %4 = vector.shape_cast %3 : vector<2x24x32xf32> to vector<48x32xf32>
    %c0_3 = arith.constant 0 : index
    %c0_4 = arith.constant 0 : index
    %c0_5 = arith.constant 0 : index
    %5 = vector.load %arg6[%c0_3, %c0_4, %c0_5] : memref<1x4x32xf32, #tpu.memory_space<vmem>>, vector<1x1x32xf32>
    %6 = vector.shape_cast %5 : vector<1x1x32xf32> to vector<1x32xf32>
    %c0_6 = arith.constant 0 : index
    %c1 = arith.constant 1 : index
    %c0_7 = arith.constant 0 : index
    %7 = vector.load %arg6[%c0_6, %c1, %c0_7] : memref<1x4x32xf32, #tpu.memory_space<vmem>>, vector<1x1x32xf32>
    %8 = vector.shape_cast %7 : vector<1x1x32xf32> to vector<1x32xf32>
    %cst = arith.constant dense<0.000000e+00> : vector<48xf32>
    %9 = vector.multi_reduction <add>, %4, %cst [1] : vector<48x32xf32> to vector<48xf32>
    %10 = vector.shape_cast %9 : vector<48xf32> to vector<48x1xf32>
    %11 = arith.mulf %4, %4 : vector<48x32xf32>
    %cst_8 = arith.constant dense<0.000000e+00> : vector<48xf32>
    %12 = vector.multi_reduction <add>, %11, %cst_8 [1] : vector<48x32xf32> to vector<48xf32>
    %13 = vector.shape_cast %12 : vector<48xf32> to vector<48x1xf32>
    %cst_9 = arith.constant 3.125000e-02 : f32
    %14 = vector.broadcast %cst_9 : f32 to vector<48x1xf32>
    %15 = arith.mulf %10, %14 : vector<48x1xf32>
    %cst_10 = arith.constant 3.125000e-02 : f32
    %16 = vector.broadcast %cst_10 : f32 to vector<48x1xf32>
    %17 = arith.mulf %13, %16 : vector<48x1xf32>
    %18 = arith.mulf %15, %15 : vector<48x1xf32>
    %19 = arith.subf %17, %18 : vector<48x1xf32>
    %cst_11 = arith.constant 9.99999974E-6 : f32
    %20 = vector.broadcast %cst_11 : f32 to vector<48x1xf32>
    %21 = arith.addf %19, %20 : vector<48x1xf32>
    %22 = math.rsqrt %21 : vector<48x1xf32>
    %23 = vector.broadcast %15 : vector<48x1xf32> to vector<48x32xf32>
    %24 = arith.subf %4, %23 : vector<48x32xf32>
    %25 = vector.broadcast %22 : vector<48x1xf32> to vector<48x32xf32>
    %26 = arith.mulf %24, %25 : vector<48x32xf32>
    %27 = vector.broadcast %6 : vector<1x32xf32> to vector<48x32xf32>
    %28 = arith.mulf %26, %27 : vector<48x32xf32>
    %29 = vector.broadcast %8 : vector<1x32xf32> to vector<48x32xf32>
    %30 = arith.addf %28, %29 : vector<48x32xf32>
    %c0_12 = arith.constant 0 : index
    %c0_13 = arith.constant 0 : index
    %c0_14 = arith.constant 0 : index
    %31 = vector.load %arg7[%c0_12, %c0_13, %c0_14] : memref<1x32x96xf32, #tpu.memory_space<vmem>>, vector<1x32x96xf32>
    %32 = vector.shape_cast %31 : vector<1x32x96xf32> to vector<32x96xf32>
    %cst_15 = arith.constant dense<0.000000e+00> : vector<48x96xf32>
    %33 = tpu.matmul %30, %32, %cst_15 {dimension_numbers = #tpu.dot_dimension_numbers<[1], [0], [0], [1], [0, 0, 1, 1], [], []>} : vector<48x32xf32>, vector<32x96xf32>, vector<48x96xf32> -> vector<48x96xf32>
    %34 = vector.shape_cast %33 : vector<48x96xf32> to vector<2x24x96xf32>
    %35 = tpu.iota {dimensions = array<i32: 1>} : vector<24x24xi32>
    %c17_i32 = arith.constant 17 : i32
    %36 = vector.broadcast %c17_i32 : i32 to vector<24x24xi32>
    %37 = arith.cmpi slt, %35, %36 : vector<24x24xi32>
    %cst_16 = arith.constant 0.000000e+00 : f32
    %cst_17 = arith.constant -1.000000e+30 : f32
    %38 = vector.broadcast %cst_16 : f32 to vector<24x24xf32>
    %39 = vector.broadcast %cst_17 : f32 to vector<24x24xf32>
    %40 = arith.select %37, %38, %39 : vector<24x24xi1>, vector<24x24xf32>
    %41 = vector.shape_cast %40 : vector<24x24xf32> to vector<1x24x24xf32>
    %cst_18 = arith.constant 0.000000e+00 : f32
    %42 = vector.broadcast %cst_18 : f32 to vector<48x32xf32>
    %43 = vector.extract_strided_slice %34 {offsets = [0, 0, 0], sizes = [2, 24, 8], strides = [1, 1, 1]} : vector<2x24x96xf32> to vector<2x24x8xf32>
    %44 = vector.extract_strided_slice %34 {offsets = [0, 0, 32], sizes = [2, 24, 8], strides = [1, 1, 1]} : vector<2x24x96xf32> to vector<2x24x8xf32>
    %45 = vector.extract_strided_slice %34 {offsets = [0, 0, 64], sizes = [2, 24, 8], strides = [1, 1, 1]} : vector<2x24x96xf32> to vector<2x24x8xf32>
    "tpu.trace_start"() <{level = 10 : i32, message = "bqd,bkd->bqk"}> : () -> ()
    %cst_19 = arith.constant dense<0.000000e+00> : vector<2x24x24xf32>
    %46 = tpu.matmul %43, %44, %cst_19 {dimension_numbers = #tpu.dot_dimension_numbers<[2], [2], [1], [1], [0, 0, 0, 1, 1, 1], [0], [0]>} : vector<2x24x8xf32>, vector<2x24x8xf32>, vector<2x24x24xf32> -> vector<2x24x24xf32>
    "tpu.trace_stop"() : () -> ()
    %cst_20 = arith.constant 0.353553385 : f32
    %47 = vector.broadcast %cst_20 : f32 to vector<2x24x24xf32>
    %48 = arith.mulf %46, %47 : vector<2x24x24xf32>
    %49 = vector.broadcast %41 : vector<1x24x24xf32> to vector<2x24x24xf32>
    %50 = arith.addf %48, %49 : vector<2x24x24xf32>
    %cst_21 = arith.constant dense<0xFF800000> : vector<2x24xf32>
    %51 = vector.multi_reduction <maximumf>, %50, %cst_21 [2] : vector<2x24x24xf32> to vector<2x24xf32>
    %52 = vector.shape_cast %51 : vector<2x24xf32> to vector<2x24x1xf32>
    %53 = vector.broadcast %52 : vector<2x24x1xf32> to vector<2x24x24xf32>
    %54 = arith.subf %50, %53 : vector<2x24x24xf32>
    %55 = math.exp %54 : vector<2x24x24xf32>
    %cst_22 = arith.constant dense<0.000000e+00> : vector<2x24xf32>
    %56 = vector.multi_reduction <add>, %55, %cst_22 [2] : vector<2x24x24xf32> to vector<2x24xf32>
    %57 = vector.shape_cast %56 : vector<2x24xf32> to vector<2x24x1xf32>
    %58 = tpu.reciprocal %57 {approx = true} : vector<2x24x1xf32> -> vector<2x24x1xf32>
    %59 = vector.broadcast %58 : vector<2x24x1xf32> to vector<2x24x24xf32>
    %60 = arith.mulf %55, %59 : vector<2x24x24xf32>
    %c0_23 = arith.constant 0 : index
    %c0_24 = arith.constant 0 : index
    %c0_25 = arith.constant 0 : index
    %c0_26 = arith.constant 0 : index
    %61 = vector.load %arg18[%c0_23, %c0_24, %c0_25, %c0_26] : memref<4x2x24x24xf32, #tpu.memory_space<vmem>>, vector<1x2x24x24xf32>
    %62 = vector.shape_cast %61 : vector<1x2x24x24xf32> to vector<2x24x24xf32>
    %63 = vector.shape_cast %60 : vector<2x24x24xf32> to vector<1x2x24x24xf32>
    tpu.vector_store %arg18[%c0_23, %c0_24, %c0_25, %c0_26], %63 {strides = array<i32>} : memref<4x2x24x24xf32, #tpu.memory_space<vmem>>, vector<1x2x24x24xf32>,
    "tpu.trace_start"() <{level = 10 : i32, message = "bqk,bkd->bqd"}> : () -> ()
    %cst_27 = arith.constant dense<0.000000e+00> : vector<2x24x8xf32>
    %64 = tpu.matmul %60, %45, %cst_27 {dimension_numbers = #tpu.dot_dimension_numbers<[2], [1], [1], [2], [0, 0, 0, 1, 1, 2], [0], [0]>} : vector<2x24x24xf32>, vector<2x24x8xf32>, vector<2x24x8xf32> -> vector<2x24x8xf32>
    "tpu.trace_stop"() : () -> ()
    %c0_28 = arith.constant 0 : index
    %c0_29 = arith.constant 0 : index
    %c0_30 = arith.constant 0 : index
    %65 = vector.load %arg8[%c0_28, %c0_29, %c0_30] : memref<1x32x32xf32, #tpu.memory_space<vmem>>, vector<1x8x32xf32>
    %66 = vector.shape_cast %65 : vector<1x8x32xf32> to vector<8x32xf32>
    %67 = vector.shape_cast %64 : vector<2x24x8xf32> to vector<48x8xf32>
    %cst_31 = arith.constant dense<0.000000e+00> : vector<48x32xf32>
    %68 = tpu.matmul %67, %66, %cst_31 {dimension_numbers = #tpu.dot_dimension_numbers<[1], [0], [0], [1], [0, 0, 1, 1], [], []>} : vector<48x8xf32>, vector<8x32xf32>, vector<48x32xf32> -> vector<48x32xf32>
    %69 = arith.addf %42, %68 : vector<48x32xf32>
    %70 = vector.extract_strided_slice %34 {offsets = [0, 0, 8], sizes = [2, 24, 8], strides = [1, 1, 1]} : vector<2x24x96xf32> to vector<2x24x8xf32>
    %71 = vector.extract_strided_slice %34 {offsets = [0, 0, 40], sizes = [2, 24, 8], strides = [1, 1, 1]} : vector<2x24x96xf32> to vector<2x24x8xf32>
    %72 = vector.extract_strided_slice %34 {offsets = [0, 0, 72], sizes = [2, 24, 8], strides = [1, 1, 1]} : vector<2x24x96xf32> to vector<2x24x8xf32>
    "tpu.trace_start"() <{level = 10 : i32, message = "bqd,bkd->bqk"}> : () -> ()
    %cst_32 = arith.constant dense<0.000000e+00> : vector<2x24x24xf32>
    %73 = tpu.matmul %70, %71, %cst_32 {dimension_numbers = #tpu.dot_dimension_numbers<[2], [2], [1], [1], [0, 0, 0, 1, 1, 1], [0], [0]>} : vector<2x24x8xf32>, vector<2x24x8xf32>, vector<2x24x24xf32> -> vector<2x24x24xf32>
    "tpu.trace_stop"() : () -> ()
    %cst_33 = arith.constant 0.353553385 : f32
    %74 = vector.broadcast %cst_33 : f32 to vector<2x24x24xf32>
    %75 = arith.mulf %73, %74 : vector<2x24x24xf32>
    %76 = vector.broadcast %41 : vector<1x24x24xf32> to vector<2x24x24xf32>
    %77 = arith.addf %75, %76 : vector<2x24x24xf32>
    %cst_34 = arith.constant dense<0xFF800000> : vector<2x24xf32>
    %78 = vector.multi_reduction <maximumf>, %77, %cst_34 [2] : vector<2x24x24xf32> to vector<2x24xf32>
    %79 = vector.shape_cast %78 : vector<2x24xf32> to vector<2x24x1xf32>
    %80 = vector.broadcast %79 : vector<2x24x1xf32> to vector<2x24x24xf32>
    %81 = arith.subf %77, %80 : vector<2x24x24xf32>
    %82 = math.exp %81 : vector<2x24x24xf32>
    %cst_35 = arith.constant dense<0.000000e+00> : vector<2x24xf32>
    %83 = vector.multi_reduction <add>, %82, %cst_35 [2] : vector<2x24x24xf32> to vector<2x24xf32>
    %84 = vector.shape_cast %83 : vector<2x24xf32> to vector<2x24x1xf32>
    %85 = tpu.reciprocal %84 {approx = true} : vector<2x24x1xf32> -> vector<2x24x1xf32>
    %86 = vector.broadcast %85 : vector<2x24x1xf32> to vector<2x24x24xf32>
    %87 = arith.mulf %82, %86 : vector<2x24x24xf32>
    %c1_36 = arith.constant 1 : index
    %c0_37 = arith.constant 0 : index
    %c0_38 = arith.constant 0 : index
    %c0_39 = arith.constant 0 : index
    %88 = vector.load %arg18[%c1_36, %c0_37, %c0_38, %c0_39] : memref<4x2x24x24xf32, #tpu.memory_space<vmem>>, vector<1x2x24x24xf32>
    %89 = vector.shape_cast %88 : vector<1x2x24x24xf32> to vector<2x24x24xf32>
    %90 = vector.shape_cast %87 : vector<2x24x24xf32> to vector<1x2x24x24xf32>
    tpu.vector_store %arg18[%c1_36, %c0_37, %c0_38, %c0_39], %90 {strides = array<i32>} : memref<4x2x24x24xf32, #tpu.memory_space<vmem>>, vector<1x2x24x24xf32>,
    "tpu.trace_start"() <{level = 10 : i32, message = "bqk,bkd->bqd"}> : () -> ()
    %cst_40 = arith.constant dense<0.000000e+00> : vector<2x24x8xf32>
    %91 = tpu.matmul %87, %72, %cst_40 {dimension_numbers = #tpu.dot_dimension_numbers<[2], [1], [1], [2], [0, 0, 0, 1, 1, 2], [0], [0]>} : vector<2x24x24xf32>, vector<2x24x8xf32>, vector<2x24x8xf32> -> vector<2x24x8xf32>
    "tpu.trace_stop"() : () -> ()
    %c0_41 = arith.constant 0 : index
    %c8 = arith.constant 8 : index
    %c0_42 = arith.constant 0 : index
    %92 = vector.load %arg8[%c0_41, %c8, %c0_42] : memref<1x32x32xf32, #tpu.memory_space<vmem>>, vector<1x8x32xf32>
    %93 = vector.shape_cast %92 : vector<1x8x32xf32> to vector<8x32xf32>
    %94 = vector.shape_cast %91 : vector<2x24x8xf32> to vector<48x8xf32>
    %cst_43 = arith.constant dense<0.000000e+00> : vector<48x32xf32>
    %95 = tpu.matmul %94, %93, %cst_43 {dimension_numbers = #tpu.dot_dimension_numbers<[1], [0], [0], [1], [0, 0, 1, 1], [], []>} : vector<48x8xf32>, vector<8x32xf32>, vector<48x32xf32> -> vector<48x32xf32>
    %96 = arith.addf %69, %95 : vector<48x32xf32>
    %97 = vector.extract_strided_slice %34 {offsets = [0, 0, 16], sizes = [2, 24, 8], strides = [1, 1, 1]} : vector<2x24x96xf32> to vector<2x24x8xf32>
    %98 = vector.extract_strided_slice %34 {offsets = [0, 0, 48], sizes = [2, 24, 8], strides = [1, 1, 1]} : vector<2x24x96xf32> to vector<2x24x8xf32>
    %99 = vector.extract_strided_slice %34 {offsets = [0, 0, 80], sizes = [2, 24, 8], strides = [1, 1, 1]} : vector<2x24x96xf32> to vector<2x24x8xf32>
    "tpu.trace_start"() <{level = 10 : i32, message = "bqd,bkd->bqk"}> : () -> ()
    %cst_44 = arith.constant dense<0.000000e+00> : vector<2x24x24xf32>
    %100 = tpu.matmul %97, %98, %cst_44 {dimension_numbers = #tpu.dot_dimension_numbers<[2], [2], [1], [1], [0, 0, 0, 1, 1, 1], [0], [0]>} : vector<2x24x8xf32>, vector<2x24x8xf32>, vector<2x24x24xf32> -> vector<2x24x24xf32>
    "tpu.trace_stop"() : () -> ()
    %cst_45 = arith.constant 0.353553385 : f32
    %101 = vector.broadcast %cst_45 : f32 to vector<2x24x24xf32>
    %102 = arith.mulf %100, %101 : vector<2x24x24xf32>
    %103 = vector.broadcast %41 : vector<1x24x24xf32> to vector<2x24x24xf32>
    %104 = arith.addf %102, %103 : vector<2x24x24xf32>
    %cst_46 = arith.constant dense<0xFF800000> : vector<2x24xf32>
    %105 = vector.multi_reduction <maximumf>, %104, %cst_46 [2] : vector<2x24x24xf32> to vector<2x24xf32>
    %106 = vector.shape_cast %105 : vector<2x24xf32> to vector<2x24x1xf32>
    %107 = vector.broadcast %106 : vector<2x24x1xf32> to vector<2x24x24xf32>
    %108 = arith.subf %104, %107 : vector<2x24x24xf32>
    %109 = math.exp %108 : vector<2x24x24xf32>
    %cst_47 = arith.constant dense<0.000000e+00> : vector<2x24xf32>
    %110 = vector.multi_reduction <add>, %109, %cst_47 [2] : vector<2x24x24xf32> to vector<2x24xf32>
    %111 = vector.shape_cast %110 : vector<2x24xf32> to vector<2x24x1xf32>
    %112 = tpu.reciprocal %111 {approx = true} : vector<2x24x1xf32> -> vector<2x24x1xf32>
    %113 = vector.broadcast %112 : vector<2x24x1xf32> to vector<2x24x24xf32>
    %114 = arith.mulf %109, %113 : vector<2x24x24xf32>
    %c2 = arith.constant 2 : index
    %c0_48 = arith.constant 0 : index
    %c0_49 = arith.constant 0 : index
    %c0_50 = arith.constant 0 : index
    %115 = vector.load %arg18[%c2, %c0_48, %c0_49, %c0_50] : memref<4x2x24x24xf32, #tpu.memory_space<vmem>>, vector<1x2x24x24xf32>
    %116 = vector.shape_cast %115 : vector<1x2x24x24xf32> to vector<2x24x24xf32>
    %117 = vector.shape_cast %114 : vector<2x24x24xf32> to vector<1x2x24x24xf32>
    tpu.vector_store %arg18[%c2, %c0_48, %c0_49, %c0_50], %117 {strides = array<i32>} : memref<4x2x24x24xf32, #tpu.memory_space<vmem>>, vector<1x2x24x24xf32>,
    "tpu.trace_start"() <{level = 10 : i32, message = "bqk,bkd->bqd"}> : () -> ()
    %cst_51 = arith.constant dense<0.000000e+00> : vector<2x24x8xf32>
    %118 = tpu.matmul %114, %99, %cst_51 {dimension_numbers = #tpu.dot_dimension_numbers<[2], [1], [1], [2], [0, 0, 0, 1, 1, 2], [0], [0]>} : vector<2x24x24xf32>, vector<2x24x8xf32>, vector<2x24x8xf32> -> vector<2x24x8xf32>
    "tpu.trace_stop"() : () -> ()
    %c0_52 = arith.constant 0 : index
    %c16 = arith.constant 16 : index
    %c0_53 = arith.constant 0 : index
    %119 = vector.load %arg8[%c0_52, %c16, %c0_53] : memref<1x32x32xf32, #tpu.memory_space<vmem>>, vector<1x8x32xf32>
    %120 = vector.shape_cast %119 : vector<1x8x32xf32> to vector<8x32xf32>
    %121 = vector.shape_cast %118 : vector<2x24x8xf32> to vector<48x8xf32>
    %cst_54 = arith.constant dense<0.000000e+00> : vector<48x32xf32>
    %122 = tpu.matmul %121, %120, %cst_54 {dimension_numbers = #tpu.dot_dimension_numbers<[1], [0], [0], [1], [0, 0, 1, 1], [], []>} : vector<48x8xf32>, vector<8x32xf32>, vector<48x32xf32> -> vector<48x32xf32>
    %123 = arith.addf %96, %122 : vector<48x32xf32>
    %124 = vector.extract_strided_slice %34 {offsets = [0, 0, 24], sizes = [2, 24, 8], strides = [1, 1, 1]} : vector<2x24x96xf32> to vector<2x24x8xf32>
    %125 = vector.extract_strided_slice %34 {offsets = [0, 0, 56], sizes = [2, 24, 8], strides = [1, 1, 1]} : vector<2x24x96xf32> to vector<2x24x8xf32>
    %126 = vector.extract_strided_slice %34 {offsets = [0, 0, 88], sizes = [2, 24, 8], strides = [1, 1, 1]} : vector<2x24x96xf32> to vector<2x24x8xf32>
    "tpu.trace_start"() <{level = 10 : i32, message = "bqd,bkd->bqk"}> : () -> ()
    %cst_55 = arith.constant dense<0.000000e+00> : vector<2x24x24xf32>
    %127 = tpu.matmul %124, %125, %cst_55 {dimension_numbers = #tpu.dot_dimension_numbers<[2], [2], [1], [1], [0, 0, 0, 1, 1, 1], [0], [0]>} : vector<2x24x8xf32>, vector<2x24x8xf32>, vector<2x24x24xf32> -> vector<2x24x24xf32>
    "tpu.trace_stop"() : () -> ()
    %cst_56 = arith.constant 0.353553385 : f32
    %128 = vector.broadcast %cst_56 : f32 to vector<2x24x24xf32>
    %129 = arith.mulf %127, %128 : vector<2x24x24xf32>
    %130 = vector.broadcast %41 : vector<1x24x24xf32> to vector<2x24x24xf32>
    %131 = arith.addf %129, %130 : vector<2x24x24xf32>
    %cst_57 = arith.constant dense<0xFF800000> : vector<2x24xf32>
    %132 = vector.multi_reduction <maximumf>, %131, %cst_57 [2] : vector<2x24x24xf32> to vector<2x24xf32>
    %133 = vector.shape_cast %132 : vector<2x24xf32> to vector<2x24x1xf32>
    %134 = vector.broadcast %133 : vector<2x24x1xf32> to vector<2x24x24xf32>
    %135 = arith.subf %131, %134 : vector<2x24x24xf32>
    %136 = math.exp %135 : vector<2x24x24xf32>
    %cst_58 = arith.constant dense<0.000000e+00> : vector<2x24xf32>
    %137 = vector.multi_reduction <add>, %136, %cst_58 [2] : vector<2x24x24xf32> to vector<2x24xf32>
    %138 = vector.shape_cast %137 : vector<2x24xf32> to vector<2x24x1xf32>
    %139 = tpu.reciprocal %138 {approx = true} : vector<2x24x1xf32> -> vector<2x24x1xf32>
    %140 = vector.broadcast %139 : vector<2x24x1xf32> to vector<2x24x24xf32>
    %141 = arith.mulf %136, %140 : vector<2x24x24xf32>
    %c3 = arith.constant 3 : index
    %c0_59 = arith.constant 0 : index
    %c0_60 = arith.constant 0 : index
    %c0_61 = arith.constant 0 : index
    %142 = vector.load %arg18[%c3, %c0_59, %c0_60, %c0_61] : memref<4x2x24x24xf32, #tpu.memory_space<vmem>>, vector<1x2x24x24xf32>
    %143 = vector.shape_cast %142 : vector<1x2x24x24xf32> to vector<2x24x24xf32>
    %144 = vector.shape_cast %141 : vector<2x24x24xf32> to vector<1x2x24x24xf32>
    tpu.vector_store %arg18[%c3, %c0_59, %c0_60, %c0_61], %144 {strides = array<i32>} : memref<4x2x24x24xf32, #tpu.memory_space<vmem>>, vector<1x2x24x24xf32>,
    "tpu.trace_start"() <{level = 10 : i32, message = "bqk,bkd->bqd"}> : () -> ()
    %cst_62 = arith.constant dense<0.000000e+00> : vector<2x24x8xf32>
    %145 = tpu.matmul %141, %126, %cst_62 {dimension_numbers = #tpu.dot_dimension_numbers<[2], [1], [1], [2], [0, 0, 0, 1, 1, 2], [0], [0]>} : vector<2x24x24xf32>, vector<2x24x8xf32>, vector<2x24x8xf32> -> vector<2x24x8xf32>
    "tpu.trace_stop"() : () -> ()
    %c0_63 = arith.constant 0 : index
    %c24 = arith.constant 24 : index
    %c0_64 = arith.constant 0 : index
    %146 = vector.load %arg8[%c0_63, %c24, %c0_64] : memref<1x32x32xf32, #tpu.memory_space<vmem>>, vector<1x8x32xf32>
    %147 = vector.shape_cast %146 : vector<1x8x32xf32> to vector<8x32xf32>
    %148 = vector.shape_cast %145 : vector<2x24x8xf32> to vector<48x8xf32>
    %cst_65 = arith.constant dense<0.000000e+00> : vector<48x32xf32>
    %149 = tpu.matmul %148, %147, %cst_65 {dimension_numbers = #tpu.dot_dimension_numbers<[1], [0], [0], [1], [0, 0, 1, 1], [], []>} : vector<48x8xf32>, vector<8x32xf32>, vector<48x32xf32> -> vector<48x32xf32>
    %150 = arith.addf %123, %149 : vector<48x32xf32>
    %151 = arith.addf %4, %150 : vector<48x32xf32>
    %c0_66 = arith.constant 0 : index
    %c0_67 = arith.constant 0 : index
    %c0_68 = arith.constant 0 : index
    %152 = vector.load %arg9[%c0_66, %c0_67, %c0_68] : memref<1x1x32xf32, #tpu.memory_space<vmem>>, vector<1x1x32xf32>
    %153 = vector.shape_cast %152 : vector<1x1x32xf32> to vector<1x32xf32>
    %154 = vector.broadcast %153 : vector<1x32xf32> to vector<48x32xf32>
    %155 = arith.addf %151, %154 : vector<48x32xf32>
    %c0_69 = arith.constant 0 : index
    %c2_70 = arith.constant 2 : index
    %c0_71 = arith.constant 0 : index
    %156 = vector.load %arg6[%c0_69, %c2_70, %c0_71] : memref<1x4x32xf32, #tpu.memory_space<vmem>>, vector<1x1x32xf32>
    %157 = vector.shape_cast %156 : vector<1x1x32xf32> to vector<1x32xf32>
    %c0_72 = arith.constant 0 : index
    %c3_73 = arith.constant 3 : index
    %c0_74 = arith.constant 0 : index
    %158 = vector.load %arg6[%c0_72, %c3_73, %c0_74] : memref<1x4x32xf32, #tpu.memory_space<vmem>>, vector<1x1x32xf32>
    %159 = vector.shape_cast %158 : vector<1x1x32xf32> to vector<1x32xf32>
    %cst_75 = arith.constant dense<0.000000e+00> : vector<48xf32>
    %160 = vector.multi_reduction <add>, %155, %cst_75 [1] : vector<48x32xf32> to vector<48xf32>
    %161 = vector.shape_cast %160 : vector<48xf32> to vector<48x1xf32>
    %162 = arith.mulf %155, %155 : vector<48x32xf32>
    %cst_76 = arith.constant dense<0.000000e+00> : vector<48xf32>
    %163 = vector.multi_reduction <add>, %162, %cst_76 [1] : vector<48x32xf32> to vector<48xf32>
    %164 = vector.shape_cast %163 : vector<48xf32> to vector<48x1xf32>
    %cst_77 = arith.constant 3.125000e-02 : f32
    %165 = vector.broadcast %cst_77 : f32 to vector<48x1xf32>
    %166 = arith.mulf %161, %165 : vector<48x1xf32>
    %cst_78 = arith.constant 3.125000e-02 : f32
    %167 = vector.broadcast %cst_78 : f32 to vector<48x1xf32>
    %168 = arith.mulf %164, %167 : vector<48x1xf32>
    %169 = arith.mulf %166, %166 : vector<48x1xf32>
    %170 = arith.subf %168, %169 : vector<48x1xf32>
    %cst_79 = arith.constant 9.99999974E-6 : f32
    %171 = vector.broadcast %cst_79 : f32 to vector<48x1xf32>
    %172 = arith.addf %170, %171 : vector<48x1xf32>
    %173 = math.rsqrt %172 : vector<48x1xf32>
    %174 = vector.broadcast %166 : vector<48x1xf32> to vector<48x32xf32>
    %175 = arith.subf %155, %174 : vector<48x32xf32>
    %176 = vector.broadcast %173 : vector<48x1xf32> to vector<48x32xf32>
    %177 = arith.mulf %175, %176 : vector<48x32xf32>
    %178 = vector.broadcast %157 : vector<1x32xf32> to vector<48x32xf32>
    %179 = arith.mulf %177, %178 : vector<48x32xf32>
    %180 = vector.broadcast %159 : vector<1x32xf32> to vector<48x32xf32>
    %181 = arith.addf %179, %180 : vector<48x32xf32>
    %c0_80 = arith.constant 0 : index
    %c0_81 = arith.constant 0 : index
    %c0_82 = arith.constant 0 : index
    %182 = vector.load %arg10[%c0_80, %c0_81, %c0_82] : memref<1x32x64xf32, #tpu.memory_space<vmem>>, vector<1x32x64xf32>
    %183 = vector.shape_cast %182 : vector<1x32x64xf32> to vector<32x64xf32>
    %cst_83 = arith.constant dense<0.000000e+00> : vector<48x64xf32>
    %184 = tpu.matmul %181, %183, %cst_83 {dimension_numbers = #tpu.dot_dimension_numbers<[1], [0], [0], [1], [0, 0, 1, 1], [], []>} : vector<48x32xf32>, vector<32x64xf32>, vector<48x64xf32> -> vector<48x64xf32>
    %c0_84 = arith.constant 0 : index
    %c0_85 = arith.constant 0 : index
    %c0_86 = arith.constant 0 : index
    %185 = vector.load %arg11[%c0_84, %c0_85, %c0_86] : memref<1x1x64xf32, #tpu.memory_space<vmem>>, vector<1x1x64xf32>
    %186 = vector.shape_cast %185 : vector<1x1x64xf32> to vector<1x64xf32>
    %187 = vector.broadcast %186 : vector<1x64xf32> to vector<48x64xf32>
    %188 = arith.addf %184, %187 : vector<48x64xf32>
    %cst_87 = arith.constant 5.000000e-01 : f32
    %189 = vector.broadcast %cst_87 : f32 to vector<48x64xf32>
    %190 = arith.mulf %189, %188 : vector<48x64xf32>
    %cst_88 = arith.constant 0.707106769 : f32
    %191 = vector.broadcast %cst_88 : f32 to vector<48x64xf32>
    %192 = arith.mulf %188, %191 : vector<48x64xf32>
    %193 = math.absf %192 : vector<48x64xf32>
    %cst_89 = arith.constant 0.327591091 : f32
    %194 = vector.broadcast %cst_89 : f32 to vector<48x64xf32>
    %195 = arith.mulf %194, %193 : vector<48x64xf32>
    %cst_90 = arith.constant 1.000000e+00 : f32
    %196 = vector.broadcast %cst_90 : f32 to vector<48x64xf32>
    %197 = arith.addf %196, %195 : vector<48x64xf32>
    %cst_91 = arith.constant 1.000000e+00 : f32
    %198 = vector.broadcast %cst_91 : f32 to vector<48x64xf32>
    %199 = arith.divf %198, %197 : vector<48x64xf32>
    %cst_92 = arith.constant 1.06140542 : f32
    %200 = vector.broadcast %cst_92 : f32 to vector<48x64xf32>
    %201 = arith.mulf %200, %199 : vector<48x64xf32>
    %cst_93 = arith.constant -1.45315206 : f32
    %202 = vector.broadcast %cst_93 : f32 to vector<48x64xf32>
    %203 = arith.addf %201, %202 : vector<48x64xf32>
    %204 = arith.mulf %203, %199 : vector<48x64xf32>
    %cst_94 = arith.constant 1.42141378 : f32
    %205 = vector.broadcast %cst_94 : f32 to vector<48x64xf32>
    %206 = arith.addf %204, %205 : vector<48x64xf32>
    %207 = arith.mulf %206, %199 : vector<48x64xf32>
    %cst_95 = arith.constant -0.284496725 : f32
    %208 = vector.broadcast %cst_95 : f32 to vector<48x64xf32>
    %209 = arith.addf %207, %208 : vector<48x64xf32>
    %210 = arith.mulf %209, %199 : vector<48x64xf32>
    %cst_96 = arith.constant 0.254829586 : f32
    %211 = vector.broadcast %cst_96 : f32 to vector<48x64xf32>
    %212 = arith.addf %210, %211 : vector<48x64xf32>
    %213 = arith.mulf %212, %199 : vector<48x64xf32>
    %cst_97 = arith.constant 0.000000e+00 : f32
    %214 = vector.broadcast %cst_97 : f32 to vector<48x64xf32>
    %215 = arith.subf %214, %193 : vector<48x64xf32>
    %216 = arith.mulf %215, %193 : vector<48x64xf32>
    %217 = math.exp %216 : vector<48x64xf32>
    %218 = arith.mulf %213, %217 : vector<48x64xf32>
    %cst_98 = arith.constant 1.000000e+00 : f32
    %219 = vector.broadcast %cst_98 : f32 to vector<48x64xf32>
    %220 = arith.subf %219, %218 : vector<48x64xf32>
    %cst_99 = arith.constant 0.000000e+00 : f32
    %221 = vector.broadcast %cst_99 : f32 to vector<48x64xf32>
    %222 = arith.cmpf olt, %192, %221 : vector<48x64xf32>
    %cst_100 = arith.constant 0.000000e+00 : f32
    %223 = vector.broadcast %cst_100 : f32 to vector<48x64xf32>
    %224 = arith.subf %223, %220 : vector<48x64xf32>
    %225 = arith.select %222, %224, %220 : vector<48x64xi1>, vector<48x64xf32>
    %cst_101 = arith.constant 1.000000e+00 : f32
    %226 = vector.broadcast %cst_101 : f32 to vector<48x64xf32>
    %227 = arith.addf %226, %225 : vector<48x64xf32>
    %228 = arith.mulf %190, %227 : vector<48x64xf32>
    %c0_102 = arith.constant 0 : index
    %c0_103 = arith.constant 0 : index
    %c0_104 = arith.constant 0 : index
    %229 = vector.load %arg12[%c0_102, %c0_103, %c0_104] : memref<1x64x32xf32, #tpu.memory_space<vmem>>, vector<1x64x32xf32>
    %230 = vector.shape_cast %229 : vector<1x64x32xf32> to vector<64x32xf32>
    %cst_105 = arith.constant dense<0.000000e+00> : vector<48x32xf32>
    %231 = tpu.matmul %228, %230, %cst_105 {dimension_numbers = #tpu.dot_dimension_numbers<[1], [0], [0], [1], [0, 0, 1, 1], [], []>} : vector<48x64xf32>, vector<64x32xf32>, vector<48x32xf32> -> vector<48x32xf32>
    %232 = arith.addf %155, %231 : vector<48x32xf32>
    %c0_106 = arith.constant 0 : index
    %c0_107 = arith.constant 0 : index
    %c0_108 = arith.constant 0 : index
    %233 = vector.load %arg13[%c0_106, %c0_107, %c0_108] : memref<1x1x32xf32, #tpu.memory_space<vmem>>, vector<1x1x32xf32>
    %234 = vector.shape_cast %233 : vector<1x1x32xf32> to vector<1x32xf32>
    %235 = vector.broadcast %234 : vector<1x32xf32> to vector<48x32xf32>
    %236 = arith.addf %232, %235 : vector<48x32xf32>
    %237 = vector.shape_cast %236 : vector<48x32xf32> to vector<2x24x32xf32>
    %c0_109 = arith.constant 0 : index
    %c0_110 = arith.constant 0 : index
    %c0_111 = arith.constant 0 : index
    %238 = vector.load %arg19[%c0_109, %c0_110, %c0_111] : memref<2x24x32xf32, #tpu.memory_space<vmem>>, vector<2x24x32xf32>
    tpu.vector_store %arg19[%c0_109, %c0_110, %c0_111], %237 {strides = array<i32>} : memref<2x24x32xf32, #tpu.memory_space<vmem>>, vector<2x24x32xf32>,
    %c1_i32 = arith.constant 1 : i32
    %239 = arith.cmpi eq, %arg0, %c1_i32 : i32
    %240 = arith.extui %239 : i1 to i32
    %c0_i32_112 = arith.constant 0 : i32
    %241 = arith.cmpi ne, %240, %c0_i32_112 : i32
    scf.if %241 {
      %242 = vector.shape_cast %236 : vector<48x32xf32> to vector<2x24x32xf32>
      %243 = vector.extract_strided_slice %242 {offsets = [0, 0, 0], sizes = [2, 1, 32], strides = [1, 1, 1]} : vector<2x24x32xf32> to vector<2x1x32xf32>
      %244 = vector.shape_cast %243 : vector<2x1x32xf32> to vector<2x32xf32>
      %c0_113 = arith.constant 0 : index
      %c0_114 = arith.constant 0 : index
      %245 = vector.load %arg14[%c0_113, %c0_114] : memref<2x32xf32, #tpu.memory_space<vmem>>, vector<1x32xf32>
      %c1_115 = arith.constant 1 : index
      %c0_116 = arith.constant 0 : index
      %246 = vector.load %arg14[%c1_115, %c0_116] : memref<2x32xf32, #tpu.memory_space<vmem>>, vector<1x32xf32>
      %cst_117 = arith.constant dense<0.000000e+00> : vector<2xf32>
      %247 = vector.multi_reduction <add>, %244, %cst_117 [1] : vector<2x32xf32> to vector<2xf32>
      %248 = vector.shape_cast %247 : vector<2xf32> to vector<2x1xf32>
      %249 = arith.mulf %244, %244 : vector<2x32xf32>
      %cst_118 = arith.constant dense<0.000000e+00> : vector<2xf32>
      %250 = vector.multi_reduction <add>, %249, %cst_118 [1] : vector<2x32xf32> to vector<2xf32>
      %251 = vector.shape_cast %250 : vector<2xf32> to vector<2x1xf32>
      %cst_119 = arith.constant 3.125000e-02 : f32
      %252 = vector.broadcast %cst_119 : f32 to vector<2x1xf32>
      %253 = arith.mulf %248, %252 : vector<2x1xf32>
      %cst_120 = arith.constant 3.125000e-02 : f32
      %254 = vector.broadcast %cst_120 : f32 to vector<2x1xf32>
      %255 = arith.mulf %251, %254 : vector<2x1xf32>
      %256 = arith.mulf %253, %253 : vector<2x1xf32>
      %257 = arith.subf %255, %256 : vector<2x1xf32>
      %cst_121 = arith.constant 9.99999974E-6 : f32
      %258 = vector.broadcast %cst_121 : f32 to vector<2x1xf32>
      %259 = arith.addf %257, %258 : vector<2x1xf32>
      %260 = math.rsqrt %259 : vector<2x1xf32>
      %261 = vector.broadcast %253 : vector<2x1xf32> to vector<2x32xf32>
      %262 = arith.subf %244, %261 : vector<2x32xf32>
      %263 = vector.broadcast %260 : vector<2x1xf32> to vector<2x32xf32>
      %264 = arith.mulf %262, %263 : vector<2x32xf32>
      %265 = vector.broadcast %245 : vector<1x32xf32> to vector<2x32xf32>
      %266 = arith.mulf %264, %265 : vector<2x32xf32>
      %267 = vector.broadcast %246 : vector<1x32xf32> to vector<2x32xf32>
      %268 = arith.addf %266, %267 : vector<2x32xf32>
      %c0_122 = arith.constant 0 : index
      %c0_123 = arith.constant 0 : index
      %269 = vector.load %arg15[%c0_122, %c0_123] : memref<32x10xf32, #tpu.memory_space<vmem>>, vector<32x10xf32>
      %cst_124 = arith.constant dense<0.000000e+00> : vector<2x10xf32>
      %270 = tpu.matmul %268, %269, %cst_124 {dimension_numbers = #tpu.dot_dimension_numbers<[1], [0], [0], [1], [0, 0, 1, 1], [], []>} : vector<2x32xf32>, vector<32x10xf32>, vector<2x10xf32> -> vector<2x10xf32>
      %c0_125 = arith.constant 0 : index
      %c0_126 = arith.constant 0 : index
      %271 = vector.load %arg16[%c0_125, %c0_126] : memref<1x10xf32, #tpu.memory_space<vmem>>, vector<1x10xf32>
      %272 = vector.broadcast %271 : vector<1x10xf32> to vector<2x10xf32>
      %273 = arith.addf %270, %272 : vector<2x10xf32>
      %c0_127 = arith.constant 0 : index
      %c0_128 = arith.constant 0 : index
      %274 = vector.load %arg17[%c0_127, %c0_128] : memref<2x10xf32, #tpu.memory_space<vmem>>, vector<2x10xf32>
      tpu.vector_store %arg17[%c0_127, %c0_128], %273 {strides = array<i32>} : memref<2x10xf32, #tpu.memory_space<vmem>>, vector<2x10xf32>,
    } else {
    }
    return
  }
  func.func @transform_0(%arg0: i32) -> (i32, i32, i32) {
    %c0_i32 = arith.constant 0 : i32
    %c0_i32_0 = arith.constant 0 : i32
    %c0_i32_1 = arith.constant 0 : i32
    %c0_i32_2 = arith.constant 0 : i32
    return %c0_i32, %c0_i32_0, %c0_i32_1 : i32, i32, i32
  }
  func.func @transform_1(%arg0: i32) -> (i32, i32) {
    %c0_i32 = arith.constant 0 : i32
    %c0_i32_0 = arith.constant 0 : i32
    %c0_i32_1 = arith.constant 0 : i32
    return %c0_i32, %c0_i32_0 : i32, i32
  }
  func.func @transform_2(%arg0: i32) -> (i32, i32) {
    %c0_i32 = arith.constant 0 : i32
    %c0_i32_0 = arith.constant 0 : i32
    %c0_i32_1 = arith.constant 0 : i32
    return %c0_i32, %c0_i32_0 : i32, i32
  }
  func.func @transform_3(%arg0: i32) -> (i32, i32) {
    %c0_i32 = arith.constant 0 : i32
    %c0_i32_0 = arith.constant 0 : i32
    %c0_i32_1 = arith.constant 0 : i32
    return %c0_i32, %c0_i32_0 : i32, i32
  }
  func.func @transform_4(%arg0: i32) -> (i32, i32, i32) {
    %c0_i32 = arith.constant 0 : i32
    %c0_i32_0 = arith.constant 0 : i32
    %c0_i32_1 = arith.constant 0 : i32
    %c0_i32_2 = arith.constant 0 : i32
    return %c0_i32, %c0_i32_0, %c0_i32_1 : i32, i32, i32
  }
  func.func @transform_5(%arg0: i32) -> (i32, i32, i32) {
    %c0_i32 = arith.constant 0 : i32
    %c0_i32_0 = arith.constant 0 : i32
    %c0_i32_1 = arith.constant 0 : i32
    return %arg0, %c0_i32, %c0_i32_0 : i32, i32, i32
  }
  func.func @transform_6(%arg0: i32) -> (i32, i32, i32) {
    %c0_i32 = arith.constant 0 : i32
    %c0_i32_0 = arith.constant 0 : i32
    %c0_i32_1 = arith.constant 0 : i32
    return %arg0, %c0_i32, %c0_i32_0 : i32, i32, i32
  }
  func.func @transform_7(%arg0: i32) -> (i32, i32, i32) {
    %c0_i32 = arith.constant 0 : i32
    %c0_i32_0 = arith.constant 0 : i32
    %c0_i32_1 = arith.constant 0 : i32
    return %arg0, %c0_i32, %c0_i32_0 : i32, i32, i32
  }
  func.func @transform_8(%arg0: i32) -> (i32, i32, i32) {
    %c0_i32 = arith.constant 0 : i32
    %c0_i32_0 = arith.constant 0 : i32
    %c0_i32_1 = arith.constant 0 : i32
    return %arg0, %c0_i32, %c0_i32_0 : i32, i32, i32
  }
  func.func @transform_9(%arg0: i32) -> (i32, i32, i32) {
    %c0_i32 = arith.constant 0 : i32
    %c0_i32_0 = arith.constant 0 : i32
    %c0_i32_1 = arith.constant 0 : i32
    return %arg0, %c0_i32, %c0_i32_0 : i32, i32, i32
  }
  func.func @transform_10(%arg0: i32) -> (i32, i32, i32) {
    %c0_i32 = arith.constant 0 : i32
    %c0_i32_0 = arith.constant 0 : i32
    %c0_i32_1 = arith.constant 0 : i32
    return %arg0, %c0_i32, %c0_i32_0 : i32, i32, i32
  }
  func.func @transform_11(%arg0: i32) -> (i32, i32, i32) {
    %c0_i32 = arith.constant 0 : i32
    %c0_i32_0 = arith.constant 0 : i32
    %c0_i32_1 = arith.constant 0 : i32
    return %arg0, %c0_i32, %c0_i32_0 : i32, i32, i32
  }
  func.func @transform_12(%arg0: i32) -> (i32, i32, i32) {
    %c0_i32 = arith.constant 0 : i32
    %c0_i32_0 = arith.constant 0 : i32
    %c0_i32_1 = arith.constant 0 : i32
    return %arg0, %c0_i32, %c0_i32_0 : i32, i32, i32
  }
  func.func @transform_13(%arg0: i32) -> (i32, i32) {
    %c0_i32 = arith.constant 0 : i32
    %c0_i32_0 = arith.constant 0 : i32
    %c0_i32_1 = arith.constant 0 : i32
    return %c0_i32, %c0_i32_0 : i32, i32
  }
  func.func @transform_14(%arg0: i32) -> (i32, i32) {
    %c0_i32 = arith.constant 0 : i32
    %c0_i32_0 = arith.constant 0 : i32
    %c0_i32_1 = arith.constant 0 : i32
    return %c0_i32, %c0_i32_0 : i32, i32
  }
  func.func @transform_15(%arg0: i32) -> (i32, i32) {
    %c0_i32 = arith.constant 0 : i32
    %c0_i32_0 = arith.constant 0 : i32
    %c0_i32_1 = arith.constant 0 : i32
    return %c0_i32, %c0_i32_0 : i32, i32
  }
  func.func @transform_16(%arg0: i32) -> (i32, i32) {
    %c0_i32 = arith.constant 0 : i32
    %c0_i32_0 = arith.constant 0 : i32
    %c0_i32_1 = arith.constant 0 : i32
    return %c0_i32, %c0_i32_0 : i32, i32
  }
  func.func @transform_17(%arg0: i32) -> (i32, i32, i32, i32) {
    %c0_i32 = arith.constant 0 : i32
    %c0_i32_0 = arith.constant 0 : i32
    %c0_i32_1 = arith.constant 0 : i32
    %c0_i32_2 = arith.constant 0 : i32
    return %arg0, %c0_i32, %c0_i32_0, %c0_i32_1 : i32, i32, i32, i32
  }
}

</mosaic_0001>

<bundles_post_ra>
// kernel: vit_haar_forward.1
= control target key start
LH: loop header
LB: loop body
LE: loop exit
PB: predicated region body
PF: predicated region fallthrough
CT: control target
= control target key end

     0   :  { %s6410_s0 = inlined_call_operand.vmem [shape: f32[2,24,48], index: 0, kind: input, shape index: {}]   ;;  %s6411_s1 = inlined_call_operand.vmem [shape: f32[48,32], index: 1, kind: input, shape index: {}]   ;;  %s6412_s2 = inlined_call_operand.vmem [shape: f32[1,32], index: 2, kind: input, shape index: {}]   ;;  %s6413_s3 = inlined_call_operand.vmem [shape: f32[1,32], index: 3, kind: input, shape index: {}]   ;;  %s6414_s4 = inlined_call_operand.vmem [shape: f32[1,24,32], index: 4, kind: input, shape index: {}]   ;;  %s6415_s5 = inlined_call_operand.vmem [shape: f32[2,4,32], index: 5, kind: input, shape index: {}]   ;;  %s6416_s6 = inlined_call_operand.vmem [shape: f32[2,32,96], index: 6, kind: input, shape index: {}]   ;;  %s6417_s7 = inlined_call_operand.vmem [shape: f32[2,32,32], index: 7, kind: input, shape index: {}]   ;;  %s6418_s8 = inlined_call_operand.vmem [shape: f32[2,1,32], index: 8, kind: input, shape index: {}]   ;;  %s6419_s9 = inlined_call_operand.vmem [shape: f32[2,32,64], index: 9, kind: input, shape index: {}]   ;;  %s6420_s10 = inlined_call_operand.vmem [shape: f32[2,1,64], index: 10, kind: input, shape index: {}]   ;;  %s6421_s11 = inlined_call_operand.vmem [shape: f32[2,64,32], index: 11, kind: input, shape index: {}]   ;;  %s6422_s12 = inlined_call_operand.vmem [shape: f32[2,1,32], index: 12, kind: input, shape index: {}]   ;;  %s6423_s13 = inlined_call_operand.vmem [shape: f32[2,32], index: 13, kind: input, shape index: {}]   ;;  %s6424_s14 = inlined_call_operand.vmem [shape: f32[32,10], index: 14, kind: input, shape index: {}]   ;;  %s6425_s15 = inlined_call_operand.vmem [shape: f32[1,10], index: 15, kind: input, shape index: {}]   ;;  %s6426_s16 = inlined_call_operand.hbm [shape: f32[2,10], index: 16, kind: output, shape index: {0}]   ;;  %s6427_s17 = inlined_call_operand.vmem [shape: f32[8,2,24,24], index: 17, kind: output, shape index: {1}]  }
   0x1   :  { %6434 = sst [smem:[#allocation8_spill]] %s6410_s0 }
   0x2   :  { %6435 = sst [smem:[#allocation9_spill]] %s6411_s1 }
   0x3   :  { %6436 = sst [smem:[#allocation10_spill]] %s6415_s5 }
   0x4   :  { %6437 = sst [smem:[#allocation11_spill]] %s6416_s6 }
   0x5   :  { %6438 = sst [smem:[#allocation12_spill]] %s6417_s7 }
   0x6   :  { %6439 = sst [smem:[#allocation13_spill]] %s6423_s13 }
   0x7   :  { %6440 = sst [smem:[#allocation14_spill]] %s6424_s14 }
   0x8   :  { %6441 = sst [smem:[#allocation15_spill]] %s6425_s15 }
   0x9   :  { %6442 = sst [smem:[#allocation16_spill]] %s6426_s16 }
   0xa   :  { %23 = vsyncpa [#allocation4], 0  ;;  %s5434_s24 = smov 0  }
   0xb LB: > { %6443 = sst [smem:[#allocation6_spill]] %s5325_s24  ;;  %s5440_s25 = sadd.s32 4294967295, %s5325_s24   ;;  %s5325_s24 = sphi %s5434_s24, %s29_s24  }
   0xc   : > { %p4372_p0 = scmp.ge.s32.totalorder %s5325_s24, 1  ;;  %p549_p1 = scmp.lt.s32.totalorder %s5325_s24, 3 }
   0xe   : > { %p550_p2 = pnand %p4372_p0, %p549_p1 }
  0x10   : > { %553 = sbr.rel (%p550_p2) target bundleno = 4774 (0x12a6), region = 84 }
  0x15   : > { %p630_p3 = scmp.lt.s32.totalorder %s5440_s25, 1  ;;  %s4382_s26 = sshll.u32 %s5440_s25, 2 }
  0x16   : > { %p664_p4 = scmp.lt.s32.totalorder %s4382_s26, 7  ;;  %s6444_s5 = sld [smem:[#allocation10_spill]] }
  0x17   : > { %s5447_s27 = scalar_select %p630_p3, %s5440_s25, 1 }
  0x18   : > { %s6459_s26 = smov (!%p664_p4, %s4382_s26), 7  ;;  %s6445_s6 = sld [smem:[#allocation11_spill]] }
  0x19   : > { %s4373_s28 = sshll.u32 %s5447_s27, 2  ;;  %s4541_s29 = sshll.u32 %s5447_s27, 5 }
  0x1a   : > { %s6446_s7 = sld [smem:[#allocation12_spill]]  ;;  %s5473_s0 = scalar_lea.vmem %s6419_s9, %s4541_s29 }
  0x1b   : > { %s654_s19 = scalar_lea.vmem %s6420_s10, %s5447_s27  ;;  %s4544_s1 = sshll.u32 %s5447_s27, 6 }
  0x1c   : > { %s5454_s18 = scalar_lea.vmem %s6444_s5, %s4373_s28  ;;  %s662_s21 = scalar_lea.vmem %s6422_s12, %s5447_s27 }
  0x1d   : > { %s5107_s16 = smul.u32 48, %s6459_s26  ;;  %p4384_p5 = scmp.ne.s32.totalorder %s5440_s25, 0 }
  0x1e   : > { %s5459_s20 = scalar_lea.vmem %s6445_s6, %s4541_s29  ;;  %s6448_s28 = sld [smem:[#allocation9_spill]] (!%p4384_p5) }
  0x1f   : > { %s5492_s13 = scalar_lea.vmem %s6427_s17, %s5107_s16  ;;  %673 = sbr.rel (%p4384_p5) target bundleno = 254 (0xfe), region = 88 }
  0x20   : > { %s5464_s23 = scalar_lea.vmem %s6446_s7, %s4541_s29  ;;  %s6449_s5 = sld [smem:[#allocation8_spill]] (!%p4384_p5) }
  0x21   : > { %6447 = sst [smem:[#allocation7_spill]] %s5464_s23  ;;  %s5487_s23 = scalar_lea.vmem %s6421_s11, %s4544_s1 }
  0x24   : > { %v685_v0 = vld [vmem:[%s6448_s28 + $0x28] sm:$0xff]  ;;  %v684_v1 = vld [vmem:[%s6448_s28 + $0x20] sm:$0xff]  ;;  %v683_v2 = vld [vmem:[%s6448_s28 + $0x18] sm:$0xff]  ;;  %vm693_vm0 = vcmask 392192   ;;  %v807_v12 = vlaneseq  ;;  %vm836_vm2 = vcmask 261120  }
  0x25   : > { %5095 = vmatprep.subr.mxu1 %v685_v0  ;;  %4720 = vmatprep.subr.mxu0 %v685_v0  ;;  %v682_v3 = vld [vmem:[%s6448_s28 + $0x10] sm:$0xff]  ;;  %v681_v4 = vld [vmem:[%s6448_s28 + $0x8] sm:$0xff]  ;;  %v680_v5 = vld [vmem:[%s6448_s28] sm:$0xff] }
  0x26   : > { %5101 = vmatpush3.msra.mxu1 %v685_v0  ;;  %4721 = vmatpush3.msra.mxu0 %v685_v0  ;;  %v676_v6 = vld [vmem:[%s6449_s5 + $0x10] sm:$0xff]  ;;  %v674_v7 = vld [vmem:[%s6449_s5] sm:$0xff]  ;;  %v677_v8 = vld [vmem:[%s6449_s5 + $0x18] sm:$0xff]  ;;  %v808_v13 = vshrl.u32 %v807_v12, 7 }
  0x27   : > { %5096 = vmatprep.subr.mxu1 %v684_v1  ;;  %4722 = vmatprep.subr.mxu0 %v684_v1  ;;  %v675_v9 = vld [vmem:[%s6449_s5 + $0x8] sm:$0xff]  ;;  %v678_v10 = vld [vmem:[%s6449_s5 + $0x20] sm:$0xff]  ;;  %v829_v23 = vld [vmem:[%s6414_s4 + $0x10] sm:$0xff] }
  0x28   : > { %5102 = vmatpush3.msra.mxu1 %v684_v1  ;;  %4723 = vmatpush3.msra.mxu0 %v684_v1  ;;  %v679_v11 = vld [vmem:[%s6449_s5 + $0x28] sm:$0xff]  ;;  %v4385_v14 = vld [vmem:[%s6412_s2] ss:$0 sm:$0xff]  ;;  %vm818_vm1 = vcmp.eq.s32.totalorder %v808_v13, 0 }
  0x29   : > { %5097 = vmatprep.subr.mxu1 %v683_v2  ;;  %4724 = vmatprep.subr.mxu0 %v683_v2  ;;  %v4392_v16 = vld [vmem:[%s6413_s3] ss:$0 sm:$0xff]  ;;  %v828_v18 = vld [vmem:[%s6414_s4 + $0x8] sm:$0xff] }
  0x2a   : > { %5103 = vmatpush3.msra.mxu1 %v683_v2  ;;  %4725 = vmatpush3.msra.mxu0 %v683_v2  ;;  %v827_v20 = vld [vmem:[%s6414_s4] sm:$0xff] }
  0x2b   : > { %5098 = vmatprep.subr.mxu1 %v682_v3  ;;  %4726 = vmatprep.subr.mxu0 %v682_v3 }
  0x2c   : > { %5104 = vmatpush3.msra.mxu1 %v682_v3  ;;  %4727 = vmatpush3.msra.mxu0 %v682_v3 }
  0x2d   : > { %5099 = vmatprep.subr.mxu1 %v681_v4  ;;  %4728 = vmatprep.subr.mxu0 %v681_v4 }
  0x2e   : > { %5105 = vmatpush3.msra.mxu1 %v681_v4  ;;  %4729 = vmatpush3.msra.mxu0 %v681_v4 }
  0x2f   : > { %5100 = vmatprep.subr.mxu1 %v680_v5  ;;  %4730 = vmatprep.subr.mxu0 %v680_v5 }
  0x30   : > { %5106 = vmatpush3.msra.mxu1 %v680_v5  ;;  %4735 = vmatprep.mubr.msk.f32.mxu1 %vm693_vm0, %v676_v6 }
  0x31   : > { %4731 = vmatpush3.msra.mxu0 %v680_v5  ;;  %4732 = vmatprep.mubr.msk.f32.mxu0 %vm693_vm0, %v674_v7 }
  0x32   : > { %4736 = vmatmul.mubr.msk.f32.vlgmr.msra.gmra.mxu1 %vm693_vm0, %v677_v8  ;;  %4733 = vmatmul.mubr.msk.f32.vlgmr.msra.gmra.mxu0 %vm693_vm0, %v675_v9 }
  0x33   : > { %4738 = vmatprep.mubr.msk.f32.mxu1 %vm693_vm0, %v678_v10 }
  0x36   : > { %4739 = vmatmul.mubr.msk.f32.gmra.mxu1 %vm693_vm0, %v679_v11 }
  0xf2   : > { %v4737_v15 = vpop.f32.mrf.mxu1  ;;  %v4734_v17 = vpop.f32.mrf.mxu0 }
  0xf3   : > { %v794_v19 = vadd.f32 %v4737_v15, %v4385_v14  ;;  %v784_v21 = vadd.f32 %v4734_v17, %v4385_v14 }
  0xf4   : > { %v788_v22 = vpop.f32.mrf.mxu1  ;;  %v778_v24 = vpop.f32.mrf.mxu0 }
  0xf5   : > { %v824_v25 = vsel %vm818_vm1, %v4392_v16, %v794_v19  ;;  %v831_v26 = vadd.f32 %v828_v18, %v784_v21  ;;  %v789_v27 = vadd.f32 %v4385_v14, %v788_v22  ;;  %v779_v28 = vadd.f32 %v4385_v14, %v778_v24 }
  0xf6   : > { %v833_v29 = vadd.f32 %v827_v20, %v824_v25  ;;  %v4740_v30 = vpop.f32.mrf.mxu1 }
  0xf7   : > { %838 = vst.msk [vmem:[#allocation2 + $0x8] sm:$0xff] %vm836_vm2, %v831_v26  ;;  %v832_v31 = vadd.f32 %v829_v23, %v789_v27  ;;  %v821_v32 = vsel %vm818_vm1, %v4392_v16, %v779_v28  ;;  %v804_v33 = vadd.f32 %v4740_v30, %v4385_v14 }
  0xf8   : > { %840 = vst.msk [vmem:[#allocation2 + $0x18] sm:$0xff] %vm836_vm2, %v833_v29  ;;  %v830_v34 = vadd.f32 %v827_v20, %v821_v32  ;;  %v798_v35 = vpop.f32.mrf.mxu1 }
  0xf9   : > { %839 = vst.msk [vmem:[#allocation2 + $0x10] sm:$0xff] %vm836_vm2, %v832_v31  ;;  %v835_v36 = vadd.f32 %v829_v23, %v804_v33  ;;  %v799_v37 = vadd.f32 %v4385_v14, %v798_v35 }
  0xfa   : > { %837 = vst.msk [vmem:[#allocation2] sm:$0xff] %vm836_vm2, %v830_v34 }
  0xfb   : > { %842 = vst.msk [vmem:[#allocation2 + $0x28] sm:$0xff] %vm836_vm2, %v835_v36  ;;  %v834_v38 = vadd.f32 %v828_v18, %v799_v37 }
  0xfd   : > { %841 = vst.msk [vmem:[#allocation2 + $0x20] sm:$0xff] %vm836_vm2, %v834_v38 }
  0xfe PF: > { %vm851_vm3 = vcmask 261120   ;;  %v5562_v40 = vld [vmem:[#allocation2 + $0x8] sm:$0xff]  ;;  %v965_v63 = vld [vmem:[%s5459_s20 + $0x18] sm:$0xff]  ;;  %v964_v0 = vld [vmem:[%s5459_s20 + $0x10] sm:$0xff]  ;;  %vm5329_vm4 = vmmov 0   ;;  %vm1092_vm5 = vcmask 64512  }
  0xff   : > { %v871_v43 = vmul.f32 %v5562_v40, %v5562_v40  ;;  %v855_v45 = vsel %vm851_vm3, %v5562_v40, 0.0  ;;  %v5576_v48 = vld [vmem:[#allocation2 + $0x18] sm:$0xff]  ;;  %4741 = vmatprep.subr.mxu1 %v965_v63  ;;  %v963_v1 = vld [vmem:[%s5459_s20 + $0x8] sm:$0xff]  ;;  %v962_v2 = vld [vmem:[%s5459_s20] sm:$0xff]  ;;  %s5328_s20 = smov 96   ;;  %vm1298_vm7 = vcmask 195584  }
 0x100   : > { %v5573_v46 = vld [vmem:[#allocation2 + $0x10] sm:$0xff]  ;;  %v861_v51 = vsel %vm851_vm3, %v5576_v48, 0.0  ;;  %v873_v52 = vmul.f32 %v5576_v48, %v5576_v48  ;;  %4742 = vmatpush3.msra.mxu1 %v965_v63  ;;  %s5331_s14 = smov 64   ;;  %s5332_s29 = smov 88   ;;  %vm3927_vm10 = vcmask 523264  }
 0x101   : > { %v5560_v39 = vld [vmem:[#allocation2] sm:$0xff]  ;;  %v879_v47 = vsel %vm851_vm3, %v871_v43, 0.0  ;;  %v858_v49 = vsel %vm851_vm3, %v5573_v46, 0.0  ;;  %v872_v50 = vmul.f32 %v5573_v46, %v5573_v46  ;;  %4743 = vmatprep.subr.mxu1 %v964_v0  ;;  %s5333_s6 = smov 120   ;;  %s5334_s7 = smov 56  }
 0x102   : > { %v852_v41 = vsel %vm851_vm3, %v5560_v39, 0.0  ;;  %v870_v42 = vmul.f32 %v5560_v39, %v5560_v39  ;;  %v885_v55 = vsel %vm851_vm3, %v873_v52, 0.0  ;;  %v5590_v56 = vld [vmem:[#allocation2 + $0x28] sm:$0xff]  ;;  %4744 = vmatpush3.msra.mxu1 %v964_v0  ;;  %v4393_v43 = vld [vmem:[%s5454_s18] ss:$0 sm:$0xff]  ;;  %s5335_s26 = smov 80  }
 0x103   : > { %853 = vadd.xlane.f32.xlu0 %v852_v41  ;;  %v882_v53 = vsel %vm851_vm3, %v872_v50, 0.0  ;;  %v867_v59 = vsel %vm851_vm3, %v5590_v56, 0.0  ;;  %v875_v60 = vmul.f32 %v5590_v56, %v5590_v56  ;;  %4745 = vmatprep.subr.mxu1 %v963_v1  ;;  %v4394_v50 = vld [vmem:[%s5454_s18 + $0x1] ss:$0 sm:$0xff]  ;;  %s5336_s15 = smov 112   ;;  %s6450_s30 = sld [smem:[#allocation7_spill]] }
 0x104   : > { %v876_v44 = vsel %vm851_vm3, %v870_v42, 0.0  ;;  %v5587_v54 = vld [vmem:[#allocation2 + $0x20] sm:$0xff]  ;;  %4746 = vmatpush3.msra.mxu1 %v963_v1  ;;  %s5337_s1 = smov 48   ;;  %s5338_s22 = smov 72  }
 0x105   : > { %877 = vadd.xlane.f32.xlu1 %v876_v44  ;;  %v864_v57 = vsel %vm851_vm3, %v5587_v54, 0.0  ;;  %v874_v58 = vmul.f32 %v5587_v54, %v5587_v54  ;;  %v891_v62 = vsel %vm851_vm3, %v875_v60, 0.0  ;;  %4747 = vmatprep.subr.mxu1 %v962_v2  ;;  %s5339_s16 = smov 104   ;;  %s5340_s24 = smov 40  }
 0x106   : > { %4748 = vmatpush3.msra.mxu1 %v962_v2  ;;  %p4532_p6 = scmp.ne.s32.totalorder %s5440_s25, 1 }
 0x107   : > { %856 = vadd.xlane.f32.xlu0 %v855_v45  ;;  %v888_v61 = vsel %vm851_vm3, %v874_v58, 0.0 }
 0x109   : > { %880 = vadd.xlane.f32.xlu1 %v879_v47 }
 0x10b   : > { %859 = vadd.xlane.f32.xlu0 %v858_v49 }
 0x10d   : > { %862 = vadd.xlane.f32.xlu1 %v861_v51 }
 0x10f   : > { %883 = vadd.xlane.f32.xlu0 %v882_v53 }
 0x111   : > { %886 = vadd.xlane.f32.xlu1 %v885_v55 }
 0x113   : > { %865 = vadd.xlane.f32.xlu0 %v864_v57 }
 0x115   : > { %868 = vadd.xlane.f32.xlu1 %v867_v59 }
 0x117   : > { %889 = vadd.xlane.f32.xlu0 %v888_v61 }
 0x119   : > { %892 = vadd.xlane.f32.xlu1 %v891_v62 }
 0x18c   : > { %v854_v3 = vpop.xlane.xlu0 %853 }
 0x18d   : > { %v894_v4 = vmul.f32 0.03125, %v854_v3 }
 0x18e   : > { %v878_v5 = vpop.xlane.xlu1 %877 }
 0x18f   : > { %v906_v6 = vmul.f32 %v894_v4, %v894_v4  ;;  %v900_v7 = vmul.f32 0.03125, %v878_v5  ;;  %v930_v37 = vsub.f32 %v5560_v39, %v894_v4 }
 0x190   : > { %v857_v8 = vpop.xlane.xlu0 %856 }
 0x191   : > { %v912_v9 = vsub.f32 %v900_v7, %v906_v6  ;;  %v895_v10 = vmul.f32 0.03125, %v857_v8 }
 0x192   : > { %v881_v11 = vpop.xlane.xlu1 %880 }
 0x193   : > { %v918_v12 = vadd.f32 1e-05, %v912_v9  ;;  %v907_v13 = vmul.f32 %v895_v10, %v895_v10  ;;  %v901_v14 = vmul.f32 0.03125, %v881_v11  ;;  %v931_v51 = vsub.f32 %v5562_v40, %v895_v10 }
 0x194   : > { %v860_v15 = vpop.xlane.xlu0 %859 }
 0x195   : > { %5139 = vrsqrt.f32 %v918_v12  ;;  %v913_v16 = vsub.f32 %v901_v14, %v907_v13  ;;  %v896_v17 = vmul.f32 0.03125, %v860_v15 }
 0x196   : > { %v863_v18 = vpop.xlane.xlu1 %862 }
 0x197   : > { %v919_v19 = vadd.f32 1e-05, %v913_v16  ;;  %v908_v20 = vmul.f32 %v896_v17, %v896_v17  ;;  %v897_v21 = vmul.f32 0.03125, %v863_v18  ;;  %v932_v61 = vsub.f32 %v5573_v46, %v896_v17 }
 0x198   : > { %v884_v22 = vpop.xlane.xlu0 %883 }
 0x199   : > { %5141 = vrsqrt.f32 %v919_v19  ;;  %v902_v23 = vmul.f32 0.03125, %v884_v22  ;;  %v909_v25 = vmul.f32 %v897_v21, %v897_v21  ;;  %v933_v0 = vsub.f32 %v5576_v48, %v897_v21 }
 0x19a   : > { %v887_v24 = vpop.xlane.xlu1 %886 }
 0x19b   : > { %v914_v26 = vsub.f32 %v902_v23, %v908_v20  ;;  %v903_v27 = vmul.f32 0.03125, %v887_v24 }
 0x19c   : > { %v866_v28 = vpop.xlane.xlu0 %865 }
 0x19d   : > { %v920_v29 = vadd.f32 1e-05, %v914_v26  ;;  %v915_v30 = vsub.f32 %v903_v27, %v909_v25  ;;  %v898_v31 = vmul.f32 0.03125, %v866_v28  ;;  %v1079_v26 = vlaneseq }
 0x19e   : > { %v869_v32 = vpop.xlane.xlu1 %868 }
 0x19f   : > { %5143 = vrsqrt.f32 %v920_v29  ;;  %v921_v33 = vadd.f32 1e-05, %v915_v30  ;;  %v910_v34 = vmul.f32 %v898_v31, %v898_v31  ;;  %v899_v35 = vmul.f32 0.03125, %v869_v32 }
 0x1a0   : > { %v890_v36 = vpop.xlane.xlu0 %889  ;;  %v934_v6 = vsub.f32 %v5587_v54, %v898_v31  ;;  %v5327_v54 = vmov 0.0   ;;  %v1080_v27 = vand.u32 127, %v1079_v26  ;;  %v5330_v29 = vmov -1e+30  }
 0x1a1   : > { %5145 = vrsqrt.f32 %v921_v33  ;;  %v904_v38 = vmul.f32 0.03125, %v890_v36  ;;  %v911_v44 = vmul.f32 %v899_v35, %v899_v35  ;;  %v935_v46 = vsub.f32 %v5590_v56, %v899_v35  ;;  %4758 = vmatprep.subr.mxu1 %v5327_v54  ;;  %4773 = vmatprep.subr.mxu0 %v5327_v54 }
 0x1a2   : > { %v5140_v41 = vpop.eup %5139  ;;  %v893_v42 = vpop.xlane.xlu1 %892  ;;  %4779 = vmatprep.mubr.msk.f32.mxu0 %vm5329_vm4, %v5327_v54  ;;  %vm1081_vm6 = vcmp.lt.s32.totalorder %v1080_v27, 17 }
 0x1a3   : > { %v916_v45 = vsub.f32 %v904_v38, %v910_v34  ;;  %v905_v47 = vmul.f32 0.03125, %v893_v42  ;;  %v936_v49 = vmul.f32 %v5140_v41, %v930_v37  ;;  %v5680_v30 = vsel %vm1081_vm6, 0.0, %v5330_v29 }
 0x1a5   : > { %v922_v52 = vadd.f32 1e-05, %v916_v45  ;;  %v917_v53 = vsub.f32 %v905_v47, %v911_v44  ;;  %v946_v55 = vmul.f32 %v4393_v43, %v936_v49 }
 0x1a6   : > { %v5142_v57 = vpop.eup %5141 }
 0x1a7   : > { %5147 = vrsqrt.f32 %v922_v52  ;;  %v923_v58 = vadd.f32 1e-05, %v917_v53  ;;  %v956_v59 = vadd.f32 %v4394_v50, %v946_v55  ;;  %v937_v39 = vmul.f32 %v5142_v57, %v931_v51 }
 0x1a9   : > { %5149 = vrsqrt.f32 %v923_v58  ;;  %4749 = vmatprep.mubr.msk.f32.mxu1 %vm851_vm3, %v956_v59  ;;  %v947_v60 = vmul.f32 %v4393_v43, %v937_v39 }
 0x1ab   : > { %v957_v62 = vadd.f32 %v4394_v50, %v947_v60 }
 0x1ac   : > { %v5144_v63 = vpop.eup %5143 }
 0x1ad   : > { %4750 = vmatmul.mubr.msk.f32.vlgmr.msra.gmra.mxu1 %vm851_vm3, %v957_v62  ;;  %v938_v40 = vmul.f32 %v5144_v63, %v932_v61 }
 0x1ae   : > { %v5146_v1 = vpop.eup %5145 }
 0x1af   : > { %v948_v2 = vmul.f32 %v4393_v43, %v938_v40  ;;  %v939_v3 = vmul.f32 %v5146_v1, %v933_v0 }
 0x1b1   : > { %v958_v4 = vadd.f32 %v4394_v50, %v948_v2  ;;  %v949_v5 = vmul.f32 %v4393_v43, %v939_v3 }
 0x1b3   : > { %4752 = vmatprep.mubr.msk.f32.mxu1 %vm851_vm3, %v958_v4  ;;  %v959_v7 = vadd.f32 %v4394_v50, %v949_v5 }
 0x1b4   : > { %v5148_v8 = vpop.eup %5147 }
 0x1b5   : > { %4753 = vmatmul.mubr.msk.f32.gmra.mxu1 %vm851_vm3, %v959_v7  ;;  %v940_v9 = vmul.f32 %v5148_v8, %v934_v6 }
 0x1b6   : > { %v5150_v48 = vpop.eup %5149 }
 0x1b7   : > { %v950_v10 = vmul.f32 %v4393_v43, %v940_v9  ;;  %v941_v11 = vmul.f32 %v5150_v48, %v935_v46 }
 0x1b9   : > { %v960_v12 = vadd.f32 %v4394_v50, %v950_v10  ;;  %v951_v13 = vmul.f32 %v4393_v43, %v941_v11 }
 0x1bb   : > { %4755 = vmatprep.mubr.msk.f32.mxu1 %vm851_vm3, %v960_v12  ;;  %v961_v14 = vadd.f32 %v4394_v50, %v951_v13 }
 0x1bd   : > { %4756 = vmatmul.mubr.msk.f32.gmra.mxu1 %vm851_vm3, %v961_v14 }
 0x1be   : > { %4764 = vmatprep.mubr.msk.f32.mxu1 %vm5329_vm4, %v5327_v54 }
 0x26d   : > { %v5622_v15 = vpop.f32.mrf.mxu1 }
 0x26e   : > { %1088 = vrot.lane.b32.xlu1 %v5622_v15, %s5328_s20 }
 0x26f   : > { %v5625_v56 = vpop.f32.mrf.mxu1 }
 0x275   : > { %v5627_v16 = vpop.f32.mrf.mxu1 }
 0x277   : > { %v5633_v17 = vpop.f32.mrf.mxu1 }
 0x278   : > { %1090 = vrot.lane.b32.xlu0 %v5633_v17, %s5328_s20 }
 0x27d   : > { %v5636_v18 = vpop.f32.mrf.mxu1 }
 0x27e   : > { %1192 = vrot.lane.b32.xlu1 %v5636_v18, %s5328_s20 }
 0x27f   : > { %v5639_v19 = vpop.f32.mrf.mxu1 }
 0x280   : > { %1190 = vrot.lane.b32.xlu0 %v5639_v19, %s5328_s20 }
 0x282   : > { %1086 = vrot.lane.b32.xlu1 %v5625_v56, %s5328_s20 }
 0x286   : > { %1188 = vrot.lane.b32.xlu1 %v5627_v16, %s5328_s20 }
 0x2e0   : > { %v1089_v21 = vpop.permute.xlu1 %1088 }
 0x2ea   : > { %v1091_v20 = vpop.permute.xlu0 %1090 }
 0x2eb   : > { %4759 = vmatpush3.xpose.msk.msra.mxu1 %vm1092_vm5, %v1091_v20 }
 0x2ec   : > { %4760 = vmatprep.subr.mxu1 %v5327_v54 }
 0x2ef   : > { %4761 = vmatpush3.xpose.msk.msra.mxu1 %vm1092_vm5, %v1089_v21 }
 0x2f0   : > { %v1193_v22 = vpop.permute.xlu1 %1192  ;;  %4762 = vmatprep.subr.mxu1 %v5327_v54 }
 0x2f1   : > { %4774 = vmatpush3.xpose.msk.msra.mxu0 %vm1092_vm5, %v1193_v22 }
 0x2f2   : > { %4775 = vmatprep.subr.mxu0 %v5327_v54  ;;  %v1191_v23 = vpop.permute.xlu0 %1190 }
 0x2f4   : > { %v1087_v24 = vpop.permute.xlu1 %1086 }
 0x2f5   : > { %4763 = vmatpush3.xpose.msk.msra.mxu1 %vm1092_vm5, %v1087_v24  ;;  %4776 = vmatpush3.xpose.msk.msra.mxu0 %vm1092_vm5, %v1191_v23 }
 0x2f6   : > { %4777 = vmatprep.subr.mxu0 %v5327_v54  ;;  %4788 = vmatprep.subr.mxu1 %v5327_v54 }
 0x2f8   : > { %v1189_v25 = vpop.permute.xlu1 %1188  ;;  %4765 = vmatmul.mubr.msk.f32.vlgmr.msra.gmra.mxu1 %vm1092_vm5, %v5625_v56 }
 0x2f9   : > { %4778 = vmatpush3.xpose.msk.msra.mxu0 %vm1092_vm5, %v1189_v25  ;;  %4767 = vmatprep.mubr.msk.f32.mxu1 %vm5329_vm4, %v5327_v54 }
 0x2fa   : > { %4803 = vmatprep.subr.mxu0 %v5327_v54 }
 0x2fc   : > { %4768 = vmatmul.mubr.msk.f32.gmra.mxu1 %vm1092_vm5, %v5622_v15  ;;  %4780 = vmatmul.mubr.msk.f32.vlgmr.msra.gmra.mxu0 %vm1092_vm5, %v5627_v16 }
 0x2fd   : > { %4770 = vmatprep.mubr.msk.f32.mxu1 %vm5329_vm4, %v5327_v54  ;;  %4782 = vmatprep.mubr.msk.f32.mxu0 %vm5329_vm4, %v5327_v54 }
 0x300   : > { %4771 = vmatmul.mubr.msk.f32.gmra.mxu1 %vm1092_vm5, %v5633_v17  ;;  %4783 = vmatmul.mubr.msk.f32.gmra.mxu0 %vm1092_vm5, %v5639_v19 }
 0x301   : > { %4785 = vmatprep.mubr.msk.f32.mxu0 %vm5329_vm4, %v5327_v54  ;;  %4794 = vmatprep.mubr.msk.f32.mxu1 %vm5329_vm4, %v5327_v54 }
 0x304   : > { %4786 = vmatmul.mubr.msk.f32.gmra.mxu0 %vm1092_vm5, %v5636_v18 }
 0x305   : > { %4809 = vmatprep.mubr.msk.f32.mxu0 %vm5329_vm4, %v5327_v54 }
 0x3b8   : > { %v1171_v28 = vpop.f32.mrf.mxu1 }
 0x3b9   : > { %v1286_v31 = vmul.f32 0.35355338, %v1171_v28 }
 0x3ba   : > { %v4766_v32 = vpop.f32.mrf.mxu1 }
 0x3bb   : > { %v1292_v33 = vadd.f32 %v1286_v31, %v5680_v30 }
 0x3bc   : > { %v1176_v34 = vpop.f32.mrf.mxu1  ;;  %v1272_v35 = vpop.f32.mrf.mxu0 }
 0x3bd   : > { %v1287_v36 = vmul.f32 0.35355338, %v1176_v34  ;;  %v1289_v37 = vmul.f32 0.35355338, %v1272_v35  ;;  %v1299_v38 = vsel %vm1298_vm7, %v1292_v33, -inf }
 0x3be   : > { %1300 = vmax.xlane.f32.xlu0 %v1299_v38  ;;  %v4769_v41 = vpop.f32.mrf.mxu1  ;;  %v4781_v42 = vpop.f32.mrf.mxu0 }
 0x3bf   : > { %v1293_v43 = vadd.f32 %v1287_v36, %v5680_v30  ;;  %v1295_v44 = vadd.f32 %v1289_v37, %v5680_v30 }
 0x3c0   : > { %v1181_v45 = vpop.f32.mrf.mxu1  ;;  %v1277_v47 = vpop.f32.mrf.mxu0 }
 0x3c1   : > { %v1288_v49 = vmul.f32 0.35355338, %v1181_v45  ;;  %v1290_v50 = vmul.f32 0.35355338, %v1277_v47  ;;  %v1302_v51 = vsel %vm1298_vm7, %v1293_v43, -inf  ;;  %v1308_v52 = vsel %vm1298_vm7, %v1295_v44, -inf }
 0x3c2   : > { %1303 = vmax.xlane.f32.xlu1 %v1302_v51  ;;  %v4772_v53 = vpop.f32.mrf.mxu1  ;;  %1309 = vmax.xlane.f32.xlu0 %v1308_v52  ;;  %v4784_v55 = vpop.f32.mrf.mxu0 }
 0x3c3   : > { %v5689_v57 = vadd.f32 %v1288_v49, %v5680_v30  ;;  %v1296_v39 = vadd.f32 %v1290_v50, %v5680_v30 }
 0x3c4   : > { %v1282_v58 = vpop.f32.mrf.mxu0 }
 0x3c5   : > { %v1305_v59 = vsel %vm1298_vm7, %v5689_v57, -inf  ;;  %v1311_v61 = vsel %vm1298_vm7, %v1296_v39, -inf  ;;  %v1291_v62 = vmul.f32 0.35355338, %v1282_v58 }
 0x3c6   : > { %1306 = vmax.xlane.f32.xlu0 %v1305_v59  ;;  %v4787_v60 = vpop.f32.mrf.mxu0 }
 0x3c7   : > { %v5708_v63 = vadd.f32 %v1291_v62, %v5680_v30 }
 0x3c9   : > { %v1314_v0 = vsel %vm1298_vm7, %v5708_v63, -inf }
 0x3ca   : > { %1312 = vmax.xlane.f32.xlu0 %v1311_v61 }
 0x3d3   : > { %1373 = vrot.lane.b32.xlu1 %v5622_v15, %s5331_s14 }
 0x3d7   : > { %1371 = vrot.lane.b32.xlu1 %v5625_v56, %s5331_s14 }
 0x3db   : > { %1473 = vrot.lane.b32.xlu1 %v5636_v18, %s5331_s14 }
 0x3df   : > { %1471 = vrot.lane.b32.xlu1 %v5639_v19, %s5331_s14 }
 0x3e0   : > { %1375 = vrot.lane.b32.xlu0 %v5633_v17, %s5331_s14 }
 0x3e3   : > { %1576 = vrot.lane.b32.xlu1 %v5622_v15, %s5332_s29 }
 0x3e4   : > { %1578 = vrot.lane.b32.xlu0 %v5633_v17, %s5332_s29 }
 0x3e8   : > { %1469 = vrot.lane.b32.xlu0 %v5627_v16, %s5331_s14  ;;  %s6451_s14 = scalar_lea.vmem %s6418_s8, %s5447_s27 }
 0x3ec   : > { %1682 = vrot.lane.b32.xlu0 %v5636_v18, %s5332_s29 }
 0x407   : > { %1315 = vmax.xlane.f32.xlu1 %v1314_v0 }
 0x418   : > { %1574 = vrot.lane.b32.xlu1 %v5625_v56, %s5332_s29 }
 0x447   : > { %v1301_v40 = vpop.xlane.xlu0 %1300 }
 0x448   : > { %v1317_v1 = vsub.f32 %v1292_v33, %v1301_v40 }
 0x44a   : > { %v1323_v2 = vmul.f32 1.442695, %v1317_v1 }
 0x44b   : > { %v1304_v3 = vpop.xlane.xlu1 %1303  ;;  %v1310_v4 = vpop.xlane.xlu0 %1309 }
 0x44c   : > { %5151 = vpow2.f32 %v1323_v2  ;;  %v1318_v5 = vsub.f32 %v1293_v43, %v1304_v3  ;;  %v1320_v6 = vsub.f32 %v1295_v44, %v1310_v4 }
 0x44e   : > { %v1325_v7 = vmul.f32 1.442695, %v1318_v5  ;;  %v1329_v8 = vmul.f32 1.442695, %v1320_v6 }
 0x44f   : > { %v1374_v46 = vpop.permute.xlu1 %1373  ;;  %v1307_v9 = vpop.xlane.xlu0 %1306 }
 0x450   : > { %5153 = vpow2.f32 %v1325_v7  ;;  %v1319_v32 = vsub.f32 %v5689_v57, %v1307_v9 }
 0x451   : > { %5155 = vpow2.f32 %v1329_v8 }
 0x452   : > { %v1327_v33 = vmul.f32 1.442695, %v1319_v32 }
 0x453   : > { %v1372_v48 = vpop.permute.xlu1 %1371  ;;  %v1313_v10 = vpop.xlane.xlu0 %1312 }
 0x454   : > { %v1321_v11 = vsub.f32 %v1296_v39, %v1313_v10 }
 0x456   : > { %v1331_v12 = vmul.f32 1.442695, %v1321_v11 }
 0x457   : > { %v1474_v13 = vpop.permute.xlu1 %1473  ;;  %v1376_v14 = vpop.permute.xlu0 %1375 }
 0x458   : > { %5157 = vpow2.f32 %v1331_v12  ;;  %4789 = vmatpush3.msra.mxu1 %v1376_v14  ;;  %4804 = vmatpush3.msra.mxu0 %v1474_v13 }
 0x459   : > { %v5152_v20 = vpop.eup %5151  ;;  %4790 = vmatprep.subr.mxu1 %v5327_v54  ;;  %4805 = vmatprep.subr.mxu0 %v5327_v54  ;;  %5159 = vpow2.f32 %v1327_v33 }
 0x45a   : > { %4791 = vmatpush3.msra.mxu1 %v1374_v46  ;;  %v1335_v21 = vsel %vm1298_vm7, %v5152_v20, 0.0 }
 0x45b   : > { %v1472_v22 = vpop.permute.xlu1 %1471  ;;  %1336 = vadd.xlane.f32.xlu0 %v1335_v21  ;;  %4792 = vmatprep.subr.mxu1 %v5327_v54  ;;  %v1579_v23 = vpop.permute.xlu0 %1578 }
 0x45c   : > { %4793 = vmatpush3.msra.mxu1 %v1372_v48  ;;  %4806 = vmatpush3.msra.mxu0 %v1472_v22 }
 0x45d   : > { %v5154_v24 = vpop.eup %5153  ;;  %4807 = vmatprep.subr.mxu0 %v5327_v54  ;;  %4818 = vmatprep.subr.mxu1 %v5327_v54 }
 0x45e   : > { %v5156_v25 = vpop.eup %5155  ;;  %v1338_v26 = vsel %vm1298_vm7, %v5154_v24, 0.0 }
 0x45f   : > { %1339 = vadd.xlane.f32.xlu1 %v1338_v26  ;;  %v1344_v27 = vsel %vm1298_vm7, %v5156_v25, 0.0  ;;  %v1470_v28 = vpop.permute.xlu0 %1469  ;;  %v1577_v34 = vpop.permute.xlu1 %1576 }
 0x460   : > { %1345 = vadd.xlane.f32.xlu0 %v1344_v27  ;;  %4808 = vmatpush3.msra.mxu0 %v1470_v28 }
 0x461   : > { %4833 = vmatprep.subr.mxu0 %v5327_v54 }
 0x463   : > { %v1683_v44 = vpop.permute.xlu0 %1682 }
 0x465   : > { %v5158_v29 = vpop.eup %5157 }
 0x466   : > { %v1347_v31 = vsel %vm1298_vm7, %v5158_v29, 0.0  ;;  %v5160_v38 = vpop.eup %5159 }
 0x467   : > { %1348 = vadd.xlane.f32.xlu0 %v1347_v31  ;;  %v1341_v41 = vsel %vm1298_vm7, %v5160_v38, 0.0 }
 0x470   : > { %1568 = vrot.lane.b32.xlu1 %v5625_v56, %s5333_s6 }
 0x474   : > { %1570 = vrot.lane.b32.xlu1 %v5622_v15, %s5333_s6 }
 0x47d   : > { %1680 = vrot.lane.b32.xlu0 %v5639_v19, %s5332_s29 }
 0x481   : > { %1678 = vrot.lane.b32.xlu0 %v5627_v16, %s5332_s29  ;;  %s6452_s29 = sld [smem:[#allocation14_spill]] (!%p4532_p6) }
 0x485   : > { %1672 = vrot.lane.b32.xlu0 %v5627_v16, %s5333_s6 }
 0x489   : > { %1674 = vrot.lane.b32.xlu0 %v5639_v19, %s5333_s6 }
 0x490   : > { %v1316_v35 = vpop.xlane.xlu1 %1315 }
 0x491   : > { %v1322_v36 = vsub.f32 %v5708_v63, %v1316_v35 }
 0x493   : > { %v1333_v37 = vmul.f32 1.442695, %v1322_v36 }
 0x494   : > { %v1575_v45 = vpop.permute.xlu1 %1574 }
 0x495   : > { %5161 = vpow2.f32 %v1333_v37 }
 0x498   : > { %1342 = vadd.xlane.f32.xlu1 %v1341_v41 }
 0x4a2   : > { %v5735_v42 = vpop.eup %5161 }
 0x4a3   : > { %v1350_v43 = vsel %vm1298_vm7, %v5735_v42, 0.0 }
 0x4a4   : > { %1351 = vadd.xlane.f32.xlu1 %v1350_v43 }
 0x4b5   : > { %1572 = vrot.lane.b32.xlu1 %v5633_v17, %s5333_s6 }
 0x4b9   : > { %1676 = vrot.lane.b32.xlu1 %v5636_v18, %s5333_s6 }
 0x4e4   : > { %v1337_v47 = vpop.xlane.xlu0 %1336 }
 0x4e5   : > { %5163 = vrcp.f32 %v1337_v47 }
 0x4e8   : > { %v1340_v49 = vpop.xlane.xlu1 %1339 }
 0x4e9   : > { %5165 = vrcp.f32 %v1340_v49  ;;  %v1346_v50 = vpop.xlane.xlu0 %1345 }
 0x4ea   : > { %5167 = vrcp.f32 %v1346_v50 }
 0x4ec   : > { %v1569_v63 = vpop.permute.xlu1 %1568 }
 0x4f0   : > { %v1349_v51 = vpop.xlane.xlu0 %1348  ;;  %v1571_v0 = vpop.permute.xlu1 %1570 }
 0x4f1   : > { %5169 = vrcp.f32 %v1349_v51 }
 0x4f2   : > { %v5164_v52 = vpop.eup %5163 }
 0x4f3   : > { %v1359_v53 = vmul.f32 %v5164_v52, %v5152_v20 }
 0x4f4   : > { %v1681_v39 = vpop.permute.xlu0 %1680 }
 0x4f5   : > { %1365 = vst.msk [vmem:[%s5492_s13] sm:$0xff] %vm1298_vm7, %v1359_v53  ;;  %4795 = vmatmul.mubr.msk.f32.vlgmr.msra.gmra.mxu1 %vm1298_vm7, %v1359_v53 }
 0x4f6   : > { %v5166_v55 = vpop.eup %5165  ;;  %4819 = vmatpush3.xpose.msk.msra.mxu1 %vm1092_vm5, %v1579_v23  ;;  %4797 = vmatprep.mubr.msk.f32.mxu1 %vm5329_vm4, %v5327_v54 }
 0x4f7   : > { %v5168_v57 = vpop.eup %5167  ;;  %4820 = vmatprep.subr.mxu1 %v5327_v54  ;;  %v1360_v58 = vmul.f32 %v5166_v55, %v5154_v24 }
 0x4f8   : > { %v1362_v59 = vmul.f32 %v5168_v57, %v5156_v25  ;;  %v1679_v62 = vpop.permute.xlu0 %1678 }
 0x4f9   : > { %1366 = vst.msk [vmem:[%s5492_s13 + $0x8] sm:$0xff] %vm1298_vm7, %v1360_v58  ;;  %4798 = vmatmul.mubr.msk.f32.gmra.mxu1 %vm1298_vm7, %v1360_v58 }
 0x4fa   : > { %1368 = vst.msk [vmem:[%s5492_s13 + $0x18] sm:$0xff] %vm1298_vm7, %v1362_v59  ;;  %4810 = vmatmul.mubr.msk.f32.vlgmr.msra.gmra.mxu0 %vm1298_vm7, %v1362_v59  ;;  %4821 = vmatpush3.xpose.msk.msra.mxu1 %vm1092_vm5, %v1577_v34 }
 0x4fb   : > { %4834 = vmatpush3.xpose.msk.msra.mxu0 %vm1092_vm5, %v1683_v44  ;;  %4822 = vmatprep.subr.mxu1 %v5327_v54 }
 0x4fc   : > { %4835 = vmatprep.subr.mxu0 %v5327_v54  ;;  %4812 = vmatprep.mubr.msk.f32.mxu0 %vm5329_vm4, %v5327_v54  ;;  %v1673_v7 = vpop.permute.xlu0 %1672 }
 0x4fd   : > { %4800 = vmatprep.mubr.msk.f32.mxu1 %vm5329_vm4, %v5327_v54 }
 0x4fe   : > { %v5170_v60 = vpop.eup %5169  ;;  %4823 = vmatpush3.xpose.msk.msra.mxu1 %vm1092_vm5, %v1575_v45 }
 0x4ff   : > { %4836 = vmatpush3.xpose.msk.msra.mxu0 %vm1092_vm5, %v1681_v39  ;;  %v1363_v61 = vmul.f32 %v5170_v60, %v5158_v29  ;;  %4848 = vmatprep.subr.mxu1 %v5327_v54 }
 0x500   : > { %4837 = vmatprep.subr.mxu0 %v5327_v54  ;;  %v1675_v8 = vpop.permute.xlu0 %1674 }
 0x501   : > { %1369 = vst.msk [vmem:[%s5492_s13 + $0x20] sm:$0xff] %vm1298_vm7, %v1363_v61  ;;  %4813 = vmatmul.mubr.msk.f32.gmra.mxu0 %vm1298_vm7, %v1363_v61 }
 0x502   : > { %4815 = vmatprep.mubr.msk.f32.mxu0 %vm5329_vm4, %v5327_v54 }
 0x503   : > { %4838 = vmatpush3.xpose.msk.msra.mxu0 %vm1092_vm5, %v1679_v62 }
 0x504   : > { %4863 = vmatprep.subr.mxu0 %v5327_v54 }
 0x521   : > { %v1343_v40 = vpop.xlane.xlu1 %1342 }
 0x522   : > { %5171 = vrcp.f32 %v1343_v40 }
 0x52d   : > { %v1352_v1 = vpop.xlane.xlu1 %1351 }
 0x52e   : > { %5173 = vrcp.f32 %v1352_v1 }
 0x52f   : > { %v5172_v2 = vpop.eup %5171 }
 0x530   : > { %v1361_v3 = vmul.f32 %v5172_v2, %v5160_v38 }
 0x531   : > { %v1573_v6 = vpop.permute.xlu1 %1572 }
 0x532   : > { %1367 = vst.msk [vmem:[%s5492_s13 + $0x10] sm:$0xff] %vm1298_vm7, %v1361_v3  ;;  %4801 = vmatmul.mubr.msk.f32.gmra.mxu1 %vm1298_vm7, %v1361_v3 }
 0x533   : > { %4824 = vmatprep.mubr.msk.f32.mxu1 %vm5329_vm4, %v5327_v54 }
 0x535   : > { %v1677_v46 = vpop.permute.xlu1 %1676 }
 0x536   : > { %4825 = vmatmul.mubr.msk.f32.vlgmr.msra.gmra.mxu1 %vm1092_vm5, %v1569_v63 }
 0x537   : > { %4827 = vmatprep.mubr.msk.f32.mxu1 %vm5329_vm4, %v5327_v54 }
 0x53a   : > { %4828 = vmatmul.mubr.msk.f32.gmra.mxu1 %vm1092_vm5, %v1571_v0 }
 0x53b   : > { %v5174_v4 = vpop.eup %5173  ;;  %4830 = vmatprep.mubr.msk.f32.mxu1 %vm5329_vm4, %v5327_v54 }
 0x53c   : > { %v1364_v5 = vmul.f32 %v5174_v4, %v5735_v42 }
 0x53e   : > { %1370 = vst.msk [vmem:[%s5492_s13 + $0x28] sm:$0xff] %vm1298_vm7, %v1364_v5  ;;  %4816 = vmatmul.mubr.msk.f32.gmra.mxu0 %vm1298_vm7, %v1364_v5  ;;  %4831 = vmatmul.mubr.msk.f32.gmra.mxu1 %vm1092_vm5, %v1573_v6 }
 0x53f   : > { %4839 = vmatprep.mubr.msk.f32.mxu0 %vm5329_vm4, %v5327_v54  ;;  %4854 = vmatprep.mubr.msk.f32.mxu1 %vm5329_vm4, %v5327_v54 }
 0x542   : > { %4840 = vmatmul.mubr.msk.f32.vlgmr.msra.gmra.mxu0 %vm1092_vm5, %v1673_v7 }
 0x543   : > { %4842 = vmatprep.mubr.msk.f32.mxu0 %vm5329_vm4, %v5327_v54 }
 0x546   : > { %4843 = vmatmul.mubr.msk.f32.gmra.mxu0 %vm1092_vm5, %v1675_v8 }
 0x547   : > { %4845 = vmatprep.mubr.msk.f32.mxu0 %vm5329_vm4, %v5327_v54 }
 0x54a   : > { %4846 = vmatmul.mubr.msk.f32.gmra.mxu0 %vm1092_vm5, %v1677_v46 }
 0x54b   : > { %4869 = vmatprep.mubr.msk.f32.mxu0 %vm5329_vm4, %v5327_v54 }
 0x5b5   : > { %v5802_v9 = vpop.f32.mrf.mxu1 }
 0x5b7   : > { %v4796_v48 = vpop.f32.mrf.mxu1 }
 0x5b9   : > { %v5804_v10 = vpop.f32.mrf.mxu1 }
 0x5ba   : > { %v5806_v11 = vpop.f32.mrf.mxu0 }
 0x5bb   : > { %v4799_v12 = vpop.f32.mrf.mxu1 }
 0x5bc   : > { %v4811_v13 = vpop.f32.mrf.mxu0 }
 0x5c1   : > { %v5808_v14 = vpop.f32.mrf.mxu0 }
 0x5c3   : > { %v4814_v20 = vpop.f32.mrf.mxu0 }
 0x5f2   : > { %v5810_v21 = vpop.f32.mrf.mxu1 }
 0x5f4   : > { %v4802_v22 = vpop.f32.mrf.mxu1 }
 0x5f6   : > { %v1658_v23 = vpop.f32.mrf.mxu1 }
 0x5f7   : > { %v1776_v24 = vmul.f32 0.35355338, %v1658_v23 }
 0x5f8   : > { %v4826_v25 = vpop.f32.mrf.mxu1 }
 0x5f9   : > { %v1782_v26 = vadd.f32 %v1776_v24, %v5680_v30 }
 0x5fa   : > { %v1663_v27 = vpop.f32.mrf.mxu1 }
 0x5fb   : > { %v1777_v28 = vmul.f32 0.35355338, %v1663_v27  ;;  %v1788_v29 = vsel %vm1298_vm7, %v1782_v26, -inf }
 0x5fc   : > { %1789 = vmax.xlane.f32.xlu0 %v1788_v29  ;;  %v4829_v31 = vpop.f32.mrf.mxu1 }
 0x5fd   : > { %v1783_v32 = vadd.f32 %v1777_v28, %v5680_v30 }
 0x5fe   : > { %v5815_v33 = vpop.f32.mrf.mxu0  ;;  %v1668_v34 = vpop.f32.mrf.mxu1 }
 0x5ff   : > { %v1791_v35 = vsel %vm1298_vm7, %v1783_v32, -inf  ;;  %v1778_v41 = vmul.f32 0.35355338, %v1668_v34 }
 0x600   : > { %1792 = vmax.xlane.f32.xlu1 %v1791_v35  ;;  %v4817_v36 = vpop.f32.mrf.mxu0  ;;  %v4832_v37 = vpop.f32.mrf.mxu1 }
 0x601   : > { %v1784_v50 = vadd.f32 %v1778_v41, %v5680_v30 }
 0x602   : > { %v1762_v38 = vpop.f32.mrf.mxu0 }
 0x603   : > { %v1779_v42 = vmul.f32 0.35355338, %v1762_v38  ;;  %v1794_v55 = vsel %vm1298_vm7, %v1784_v50, -inf }
 0x604   : > { %v4841_v43 = vpop.f32.mrf.mxu0 }
 0x605   : > { %v1785_v44 = vadd.f32 %v1779_v42, %v5680_v30 }
 0x606   : > { %v1767_v45 = vpop.f32.mrf.mxu0 }
 0x607   : > { %v1780_v47 = vmul.f32 0.35355338, %v1767_v45  ;;  %v1797_v49 = vsel %vm1298_vm7, %v1785_v44, -inf }
 0x608   : > { %1798 = vmax.xlane.f32.xlu0 %v1797_v49  ;;  %v4844_v51 = vpop.f32.mrf.mxu0 }
 0x609   : > { %v1786_v57 = vadd.f32 %v1780_v47, %v5680_v30 }
 0x60a   : > { %v1772_v52 = vpop.f32.mrf.mxu0 }
 0x60b   : > { %v1781_v53 = vmul.f32 0.35355338, %v1772_v52  ;;  %v1800_v39 = vsel %vm1298_vm7, %v1786_v57, -inf }
 0x60c   : > { %1795 = vmax.xlane.f32.xlu0 %v1794_v55  ;;  %v4847_v58 = vpop.f32.mrf.mxu0 }
 0x60d   : > { %v1787_v59 = vadd.f32 %v1781_v53, %v5680_v30  ;;  %v1567_v58 = vld [vmem:[%s6450_s30] sm:$0xff] }
 0x60f   : > { %v1803_v60 = vsel %vm1298_vm7, %v1787_v59, -inf }
 0x610   : > { %1801 = vmax.xlane.f32.xlu0 %v1800_v39  ;;  %1804 = vmax.xlane.f32.xlu1 %v1803_v60 }
 0x621   : > { %1863 = vrot.lane.b32.xlu1 %v5622_v15, %s5334_s7 }
 0x625   : > { %1861 = vrot.lane.b32.xlu1 %v5625_v56, %s5334_s7 }
 0x626   : > { %1865 = vrot.lane.b32.xlu0 %v5633_v17, %s5334_s7 }
 0x629   : > { %1963 = vrot.lane.b32.xlu1 %v5636_v18, %s5334_s7 }
 0x685   : > { %v1790_v61 = vpop.xlane.xlu0 %1789 }
 0x686   : > { %v1806_v62 = vsub.f32 %v1782_v26, %v1790_v61 }
 0x688   : > { %v1812_v63 = vmul.f32 1.442695, %v1806_v62 }
 0x689   : > { %v1793_v0 = vpop.xlane.xlu1 %1792 }
 0x68a   : > { %5175 = vpow2.f32 %v1812_v63  ;;  %v1807_v40 = vsub.f32 %v1783_v32, %v1793_v0 }
 0x68c   : > { %v1814_v1 = vmul.f32 1.442695, %v1807_v40 }
 0x68e   : > { %5177 = vpow2.f32 %v1814_v1 }
 0x691   : > { %v1799_v2 = vpop.xlane.xlu0 %1798 }
 0x692   : > { %v1809_v3 = vsub.f32 %v1785_v44, %v1799_v2 }
 0x694   : > { %v1818_v4 = vmul.f32 1.442695, %v1809_v3 }
 0x695   : > { %v1796_v5 = vpop.xlane.xlu0 %1795 }
 0x696   : > { %5179 = vpow2.f32 %v1818_v4  ;;  %v1808_v6 = vsub.f32 %v1784_v50, %v1796_v5 }
 0x697   : > { %v5176_v7 = vpop.eup %5175 }
 0x698   : > { %v1816_v8 = vmul.f32 1.442695, %v1808_v6  ;;  %v1824_v46 = vsel %vm1298_vm7, %v5176_v7, 0.0 }
 0x699   : > { %v1805_v48 = vpop.xlane.xlu1 %1804  ;;  %1825 = vadd.xlane.f32.xlu0 %v1824_v46  ;;  %v1802_v12 = vpop.xlane.xlu0 %1801 }
 0x69a   : > { %5181 = vpow2.f32 %v1816_v8  ;;  %v1811_v13 = vsub.f32 %v1787_v59, %v1805_v48  ;;  %v1810_v20 = vsub.f32 %v1786_v57, %v1802_v12 }
 0x69b   : > { %v5178_v22 = vpop.eup %5177 }
 0x69c   : > { %v1822_v23 = vmul.f32 1.442695, %v1811_v13  ;;  %v1820_v24 = vmul.f32 1.442695, %v1810_v20  ;;  %v1827_v25 = vsel %vm1298_vm7, %v5178_v22, 0.0 }
 0x69d   : > { %1828 = vadd.xlane.f32.xlu1 %v1827_v25  ;;  %v1864_v26 = vpop.permute.xlu1 %1863  ;;  %v1866_v27 = vpop.permute.xlu0 %1865 }
 0x69e   : > { %5183 = vpow2.f32 %v1822_v23  ;;  %4849 = vmatpush3.msra.mxu1 %v1866_v27 }
 0x69f   : > { %5185 = vpow2.f32 %v1820_v24  ;;  %4850 = vmatprep.subr.mxu1 %v5327_v54 }
 0x6a0   : > { %4851 = vmatpush3.msra.mxu1 %v1864_v26 }
 0x6a1   : > { %v1862_v28 = vpop.permute.xlu1 %1861  ;;  %4852 = vmatprep.subr.mxu1 %v5327_v54 }
 0x6a2   : > { %4853 = vmatpush3.msra.mxu1 %v1862_v28 }
 0x6a3   : > { %v5180_v29 = vpop.eup %5179 }
 0x6a4   : > { %v1833_v31 = vsel %vm1298_vm7, %v5180_v29, 0.0 }
 0x6a5   : > { %v1964_v32 = vpop.permute.xlu1 %1963  ;;  %1834 = vadd.xlane.f32.xlu0 %v1833_v31 }
 0x6a6   : > { %4864 = vmatpush3.msra.mxu0 %v1964_v32 }
 0x6a7   : > { %v5839_v34 = vpop.eup %5181  ;;  %4865 = vmatprep.subr.mxu0 %v5327_v54 }
 0x6a8   : > { %v1830_v35 = vsel %vm1298_vm7, %v5839_v34, 0.0 }
 0x6a9   : > { %1831 = vadd.xlane.f32.xlu1 %v1830_v35 }
 0x6ab   : > { %v5844_v36 = vpop.eup %5183 }
 0x6ac   : > { %v5846_v37 = vpop.eup %5185  ;;  %v1839_v38 = vsel %vm1298_vm7, %v5844_v36, 0.0 }
 0x6ad   : > { %1840 = vadd.xlane.f32.xlu1 %v1839_v38  ;;  %v1836_v41 = vsel %vm1298_vm7, %v5846_v37, 0.0 }
 0x6ae   : > { %1837 = vadd.xlane.f32.xlu0 %v1836_v41 }
 0x6be   : > { %1959 = vrot.lane.b32.xlu1 %v5627_v16, %s5334_s7 }
 0x6c2   : > { %2292 = vrot.lane.b32.xlu1 %v5622_v15, %s5335_s26 }
 0x6c4   : > { %1961 = vrot.lane.b32.xlu0 %v5639_v19, %s5334_s7 }
 0x6c6   : > { %2290 = vrot.lane.b32.xlu1 %v5625_v56, %s5335_s26 }
 0x6c8   : > { %2294 = vrot.lane.b32.xlu0 %v5633_v17, %s5335_s26 }
 0x6ca   : > { %2284 = vrot.lane.b32.xlu1 %v5625_v56, %s5336_s15 }
 0x6cc   : > { %2398 = vrot.lane.b32.xlu0 %v5636_v18, %s5335_s26 }
 0x6ce   : > { %2286 = vrot.lane.b32.xlu1 %v5622_v15, %s5336_s15 }
 0x6d0   : > { %2396 = vrot.lane.b32.xlu0 %v5639_v19, %s5335_s26 }
 0x6d2   : > { %2288 = vrot.lane.b32.xlu1 %v5633_v17, %s5336_s15 }
 0x6d4   : > { %2394 = vrot.lane.b32.xlu0 %v5627_v16, %s5335_s26 }
 0x6d6   : > { %2392 = vrot.lane.b32.xlu1 %v5636_v18, %s5336_s15 }
 0x6d8   : > { %2388 = vrot.lane.b32.xlu0 %v5627_v16, %s5336_s15 }
 0x6dc   : > { %2390 = vrot.lane.b32.xlu0 %v5639_v19, %s5336_s15 }
 0x722   : > { %v1826_v42 = vpop.xlane.xlu0 %1825 }
 0x723   : > { %5187 = vrcp.f32 %v1826_v42 }
 0x726   : > { %v1829_v43 = vpop.xlane.xlu1 %1828 }
 0x727   : > { %5189 = vrcp.f32 %v1829_v43 }
 0x72e   : > { %v1835_v44 = vpop.xlane.xlu0 %1834 }
 0x72f   : > { %5191 = vrcp.f32 %v1835_v44 }
 0x730   : > { %v5188_v45 = vpop.eup %5187 }
 0x731   : > { %v1848_v47 = vmul.f32 %v5188_v45, %v5176_v7 }
 0x732   : > { %v1832_v49 = vpop.xlane.xlu1 %1831 }
 0x733   : > { %4431 = vst.msk [vmem:[%s5492_s13 + $0x30] sm:$0xff] %vm1298_vm7, %v1848_v47  ;;  %5193 = vrcp.f32 %v1832_v49  ;;  %4855 = vmatmul.mubr.msk.f32.vlgmr.msra.gmra.mxu1 %vm1298_vm7, %v1848_v47 }
 0x734   : > { %v5190_v50 = vpop.eup %5189  ;;  %4857 = vmatprep.mubr.msk.f32.mxu1 %vm5329_vm4, %v5327_v54 }
 0x735   : > { %v1849_v51 = vmul.f32 %v5190_v50, %v5178_v22 }
 0x736   : > { %v1841_v52 = vpop.xlane.xlu1 %1840 }
 0x737   : > { %5195 = vrcp.f32 %v1841_v52  ;;  %v1838_v53 = vpop.xlane.xlu0 %1837  ;;  %4432 = vst.msk [vmem:[%s5492_s13 + $0x38] sm:$0xff] %vm1298_vm7, %v1849_v51  ;;  %4858 = vmatmul.mubr.msk.f32.gmra.mxu1 %vm1298_vm7, %v1849_v51 }
 0x738   : > { %5197 = vrcp.f32 %v1838_v53  ;;  %4860 = vmatprep.mubr.msk.f32.mxu1 %vm5329_vm4, %v5327_v54 }
 0x73a   : > { %v1960_v39 = vpop.permute.xlu1 %1959 }
 0x73b   : > { %v1962_v55 = vpop.permute.xlu0 %1961 }
 0x73c   : > { %v5192_v57 = vpop.eup %5191  ;;  %4866 = vmatpush3.msra.mxu0 %v1962_v55 }
 0x73d   : > { %v1851_v59 = vmul.f32 %v5192_v57, %v5180_v29  ;;  %4867 = vmatprep.subr.mxu0 %v5327_v54 }
 0x73e   : > { %4868 = vmatpush3.msra.mxu0 %v1960_v39  ;;  %v2293_v40 = vpop.permute.xlu1 %2292 }
 0x73f   : > { %4434 = vst.msk [vmem:[%s5492_s13 + $0x48] sm:$0xff] %vm1298_vm7, %v1851_v59  ;;  %4870 = vmatmul.mubr.msk.f32.vlgmr.msra.gmra.mxu0 %vm1298_vm7, %v1851_v59  ;;  %4889 = vmatprep.subr.mxu0 %v1567_v58  ;;  %v2295_v61 = vpop.permute.xlu0 %2294 }
 0x740   : > { %v5194_v60 = vpop.eup %5193  ;;  %4872 = vmatprep.mubr.msk.f32.mxu0 %vm5329_vm4, %v5327_v54  ;;  %4890 = vmatpush3.msra.mxu0 %v1567_v58 }
 0x741   : > { %v1850_v62 = vmul.f32 %v5194_v60, %v5839_v34  ;;  %4915 = vmatprep.subr.mxu0 %v5327_v54 }
 0x742   : > { %v2291_v4 = vpop.permute.xlu1 %2290 }
 0x743   : > { %4433 = vst.msk [vmem:[%s5492_s13 + $0x40] sm:$0xff] %vm1298_vm7, %v1850_v62  ;;  %4861 = vmatmul.mubr.msk.f32.gmra.mxu1 %vm1298_vm7, %v1850_v62  ;;  %v2399_v3 = vpop.permute.xlu0 %2398 }
 0x744   : > { %v5196_v63 = vpop.eup %5195 }
 0x745   : > { %v5198_v0 = vpop.eup %5197  ;;  %v1853_v1 = vmul.f32 %v5196_v63, %v5844_v36 }
 0x746   : > { %v1852_v2 = vmul.f32 %v5198_v0, %v5846_v37  ;;  %v2285_v6 = vpop.permute.xlu1 %2284 }
 0x747   : > { %4436 = vst.msk [vmem:[%s5492_s13 + $0x58] sm:$0xff] %vm1298_vm7, %v1853_v1  ;;  %v2397_v5 = vpop.permute.xlu0 %2396 }
 0x748   : > { %4435 = vst.msk [vmem:[%s5492_s13 + $0x50] sm:$0xff] %vm1298_vm7, %v1852_v2  ;;  %4873 = vmatmul.mubr.msk.f32.gmra.mxu0 %vm1298_vm7, %v1852_v2 }
 0x749   : > { %4875 = vmatprep.mubr.msk.f32.mxu0 %vm5329_vm4, %v5327_v54 }
 0x74b   : > { %v2395_v7 = vpop.permute.xlu0 %2394 }
 0x74c   : > { %4876 = vmatmul.mubr.msk.f32.gmra.mxu0 %vm1298_vm7, %v1853_v1 }
 0x74d   : > { %4891 = vmatprep.mubr.msk.f32.mxu0 %vm1092_vm5, %v5802_v9  ;;  %v2287_v9 = vpop.permute.xlu1 %2286 }
 0x750   : > { %4892 = vmatmul.mubr.msk.f32.vlgmr.msra.gmra.mxu0 %vm1092_vm5, %v5804_v10  ;;  %v2389_v10 = vpop.permute.xlu0 %2388 }
 0x751   : > { %4916 = vmatpush3.xpose.msk.msra.mxu0 %vm1092_vm5, %v2399_v3  ;;  %4894 = vmatprep.mubr.msk.f32.mxu0 %vm1092_vm5, %v5810_v21 }
 0x752   : > { %4917 = vmatprep.subr.mxu0 %v5327_v54 }
 0x754   : > { %4895 = vmatmul.mubr.msk.f32.gmra.mxu0 %vm1092_vm5, %v5806_v11  ;;  %v2289_v11 = vpop.permute.xlu1 %2288 }
 0x755   : > { %4918 = vmatpush3.xpose.msk.msra.mxu0 %vm1092_vm5, %v2397_v5  ;;  %4897 = vmatprep.mubr.msk.f32.mxu0 %vm1092_vm5, %v5808_v14  ;;  %v2391_v14 = vpop.permute.xlu0 %2390 }
 0x756   : > { %4919 = vmatprep.subr.mxu0 %v5327_v54 }
 0x758   : > { %4898 = vmatmul.mubr.msk.f32.gmra.mxu0 %vm1092_vm5, %v5815_v33  ;;  %v2393_v21 = vpop.permute.xlu1 %2392  ;;  %v2057_v33 = vld [vmem:[%s6450_s30 + $0x8] sm:$0xff] }
 0x759   : > { %4920 = vmatpush3.xpose.msk.msra.mxu0 %vm1092_vm5, %v2395_v7  ;;  %4921 = vmatprep.mubr.msk.f32.mxu0 %vm5329_vm4, %v5327_v54 }
 0x75a   : > { %4945 = vmatprep.subr.mxu0 %v5327_v54  ;;  %4878 = vmatprep.subr.mxu1 %v2057_v33 }
 0x75b   : > { %4879 = vmatpush3.msra.mxu1 %v2057_v33 }
 0x75c   : > { %4922 = vmatmul.mubr.msk.f32.vlgmr.msra.gmra.mxu0 %vm1092_vm5, %v2389_v10  ;;  %4900 = vmatprep.subr.mxu1 %v5327_v54 }
 0x75d   : > { %4924 = vmatprep.mubr.msk.f32.mxu0 %vm5329_vm4, %v5327_v54 }
 0x760   : > { %4925 = vmatmul.mubr.msk.f32.gmra.mxu0 %vm1092_vm5, %v2391_v14 }
 0x761   : > { %4927 = vmatprep.mubr.msk.f32.mxu0 %vm5329_vm4, %v5327_v54 }
 0x764   : > { %4928 = vmatmul.mubr.msk.f32.gmra.mxu0 %vm1092_vm5, %v2393_v21 }
 0x765   : > { %4951 = vmatprep.mubr.msk.f32.mxu0 %vm5329_vm4, %v5327_v54 }
 0x7f3   : > { %v1945_v8 = vpop.f32.mrf.mxu1 }
 0x7f4   : > { %4880 = vmatprep.mubr.msk.f32.mxu1 %vm1092_vm5, %v1945_v8 }
 0x7f5   : > { %v4856_v46 = vpop.f32.mrf.mxu1 }
 0x7f7   : > { %v1950_v48 = vpop.f32.mrf.mxu1 }
 0x7f8   : > { %4881 = vmatmul.mubr.msk.f32.vlgmr.msra.gmra.mxu1 %vm1092_vm5, %v1950_v48 }
 0x7f9   : > { %4901 = vmatpush3.xpose.msk.msra.mxu1 %vm1092_vm5, %v2295_v61  ;;  %v4859_v12 = vpop.f32.mrf.mxu1 }
 0x7fa   : > { %4902 = vmatprep.subr.mxu1 %v5327_v54 }
 0x7fd   : > { %4903 = vmatpush3.xpose.msk.msra.mxu1 %vm1092_vm5, %v2293_v40 }
 0x7fe   : > { %4904 = vmatprep.subr.mxu1 %v5327_v54 }
 0x7ff   : > { %v2043_v13 = vpop.f32.mrf.mxu0 }
 0x801   : > { %4905 = vmatpush3.xpose.msk.msra.mxu1 %vm1092_vm5, %v2291_v4  ;;  %v4871_v20 = vpop.f32.mrf.mxu0 }
 0x802   : > { %4930 = vmatprep.subr.mxu1 %v5327_v54 }
 0x803   : > { %v1955_v22 = vpop.f32.mrf.mxu1 }
 0x804   : > { %4883 = vmatprep.mubr.msk.f32.mxu1 %vm1092_vm5, %v1955_v22 }
 0x805   : > { %v4862_v23 = vpop.f32.mrf.mxu1  ;;  %4884 = vmatmul.mubr.msk.f32.gmra.mxu1 %vm1092_vm5, %v2043_v13 }
 0x808   : > { %v2048_v24 = vpop.f32.mrf.mxu0 }
 0x809   : > { %4886 = vmatprep.mubr.msk.f32.mxu1 %vm1092_vm5, %v2048_v24 }
 0x80a   : > { %v4874_v25 = vpop.f32.mrf.mxu0 }
 0x80c   : > { %v2053_v26 = vpop.f32.mrf.mxu0 }
 0x80d   : > { %4887 = vmatmul.mubr.msk.f32.gmra.mxu1 %vm1092_vm5, %v2053_v26 }
 0x80e   : > { %v4877_v27 = vpop.f32.mrf.mxu0  ;;  %4906 = vmatprep.mubr.msk.f32.mxu1 %vm5329_vm4, %v5327_v54 }
 0x810   : > { %v5945_v28 = vpop.f32.mrf.mxu0 }
 0x811   : > { %4907 = vmatmul.mubr.msk.f32.vlgmr.msra.gmra.mxu1 %vm1092_vm5, %v2285_v6 }
 0x812   : > { %v5948_v29 = vpop.f32.mrf.mxu0  ;;  %4909 = vmatprep.mubr.msk.f32.mxu1 %vm5329_vm4, %v5327_v54 }
 0x814   : > { %v5952_v31 = vpop.f32.mrf.mxu0 }
 0x815   : > { %4910 = vmatmul.mubr.msk.f32.gmra.mxu1 %vm1092_vm5, %v2287_v9 }
 0x816   : > { %v5955_v32 = vpop.f32.mrf.mxu0  ;;  %4912 = vmatprep.mubr.msk.f32.mxu1 %vm5329_vm4, %v5327_v54 }
 0x818   : > { %v5959_v34 = vpop.f32.mrf.mxu0 }
 0x819   : > { %4913 = vmatmul.mubr.msk.f32.gmra.mxu1 %vm1092_vm5, %v2289_v11 }
 0x81a   : > { %v5962_v35 = vpop.f32.mrf.mxu0  ;;  %4936 = vmatprep.mubr.msk.f32.mxu1 %vm5329_vm4, %v5327_v54 }
 0x81c   : > { %v2478_v36 = vpop.f32.mrf.mxu0 }
 0x81d   : > { %v2495_v53 = vmul.f32 0.35355338, %v2478_v36 }
 0x81e   : > { %v4923_v37 = vpop.f32.mrf.mxu0 }
 0x81f   : > { %v2501_v62 = vadd.f32 %v2495_v53, %v5680_v30 }
 0x820   : > { %v2483_v38 = vpop.f32.mrf.mxu0 }
 0x821   : > { %v2496_v40 = vmul.f32 0.35355338, %v2483_v38  ;;  %v2513_v4 = vsel %vm1298_vm7, %v2501_v62, -inf }
 0x822   : > { %v4926_v41 = vpop.f32.mrf.mxu0 }
 0x823   : > { %v2502_v11 = vadd.f32 %v2496_v40, %v5680_v30 }
 0x824   : > { %v2488_v42 = vpop.f32.mrf.mxu0 }
 0x825   : > { %v2497_v39 = vmul.f32 0.35355338, %v2488_v42  ;;  %v2516_v14 = vsel %vm1298_vm7, %v2502_v11, -inf }
 0x826   : > { %v4929_v43 = vpop.f32.mrf.mxu0 }
 0x827   : > { %v2503_v5 = vadd.f32 %v2497_v39, %v5680_v30 }
 0x829   : > { %v2519_v10 = vsel %vm1298_vm7, %v2503_v5, -inf }
 0x8b8   : > { %v5966_v44 = vpop.f32.mrf.mxu1 }
 0x8ba   : > { %v5968_v45 = vpop.f32.mrf.mxu1 }
 0x8c5   : > { %v5970_v47 = vpop.f32.mrf.mxu1 }
 0x8c7   : > { %v5972_v49 = vpop.f32.mrf.mxu1 }
 0x8cd   : > { %v5974_v50 = vpop.f32.mrf.mxu1 }
 0x8cf   : > { %v5976_v51 = vpop.f32.mrf.mxu1 }
 0x8d1   : > { %v2374_v52 = vpop.f32.mrf.mxu1 }
 0x8d2   : > { %v2492_v55 = vmul.f32 0.35355338, %v2374_v52 }
 0x8d3   : > { %v4908_v57 = vpop.f32.mrf.mxu1 }
 0x8d4   : > { %v2498_v58 = vadd.f32 %v2492_v55, %v5680_v30 }
 0x8d5   : > { %v2379_v59 = vpop.f32.mrf.mxu1 }
 0x8d6   : > { %v2493_v60 = vmul.f32 0.35355338, %v2379_v59  ;;  %v2504_v61 = vsel %vm1298_vm7, %v2498_v58, -inf }
 0x8d7   : > { %2505 = vmax.xlane.f32.xlu0 %v2504_v61  ;;  %v4911_v63 = vpop.f32.mrf.mxu1 }
 0x8d8   : > { %v2499_v0 = vadd.f32 %v2493_v60, %v5680_v30 }
 0x8d9   : > { %v2384_v1 = vpop.f32.mrf.mxu1 }
 0x8da   : > { %v2494_v2 = vmul.f32 0.35355338, %v2384_v1  ;;  %v2507_v3 = vsel %vm1298_vm7, %v2499_v0, -inf }
 0x8db   : > { %2508 = vmax.xlane.f32.xlu1 %v2507_v3  ;;  %v4914_v6 = vpop.f32.mrf.mxu1  ;;  %2514 = vmax.xlane.f32.xlu0 %v2513_v4 }
 0x8dc   : > { %v2500_v7 = vadd.f32 %v2494_v2, %v5680_v30 }
 0x8de   : > { %v2510_v9 = vsel %vm1298_vm7, %v2500_v7, -inf }
 0x8df   : > { %2511 = vmax.xlane.f32.xlu0 %v2510_v9  ;;  %2520 = vmax.xlane.f32.xlu1 %v2519_v10 }
 0x8e3   : > { %2517 = vmax.xlane.f32.xlu0 %v2516_v14 }
 0x960   : > { %v2506_v21 = vpop.xlane.xlu0 %2505 }
 0x961   : > { %v2522_v42 = vsub.f32 %v2498_v58, %v2506_v21 }
 0x963   : > { %v2528_v43 = vmul.f32 1.442695, %v2522_v42 }
 0x964   : > { %v2509_v33 = vpop.xlane.xlu1 %2508  ;;  %v2515_v8 = vpop.xlane.xlu0 %2514 }
 0x965   : > { %v2525_v46 = vsub.f32 %v2501_v62, %v2515_v8  ;;  %v2523_v52 = vsub.f32 %v2499_v0, %v2509_v33 }
 0x967   : > { %v2534_v48 = vmul.f32 1.442695, %v2525_v46  ;;  %v2530_v53 = vmul.f32 1.442695, %v2523_v52 }
 0x968   : > { %v2521_v12 = vpop.xlane.xlu1 %2520  ;;  %v2512_v13 = vpop.xlane.xlu0 %2511 }
 0x969   : > { %v2527_v20 = vsub.f32 %v2503_v5, %v2521_v12  ;;  %5199 = vpow2.f32 %v2534_v48  ;;  %v2524_v55 = vsub.f32 %v2500_v7, %v2512_v13  ;;  %v2773_v5 = vld [vmem:[%s6450_s30 + $0x10] sm:$0xff] }
 0x96b   : > { %v2538_v22 = vmul.f32 1.442695, %v2527_v20  ;;  %v2532_v57 = vmul.f32 1.442695, %v2524_v55 }
 0x96c   : > { %v2518_v23 = vpop.xlane.xlu0 %2517 }
 0x96d   : > { %5201 = vpow2.f32 %v2538_v22  ;;  %v2526_v24 = vsub.f32 %v2502_v11, %v2518_v23 }
 0x96f   : > { %v2536_v25 = vmul.f32 1.442695, %v2526_v24 }
 0x971   : > { %5203 = vpow2.f32 %v2536_v25 }
 0x972   : > { %5205 = vpow2.f32 %v2528_v43 }
 0x973   : > { %5207 = vpow2.f32 %v2530_v53 }
 0x974   : > { %5209 = vpow2.f32 %v2532_v57 }
 0x976   : > { %v5200_v26 = vpop.eup %5199 }
 0x977   : > { %v2549_v27 = vsel %vm1298_vm7, %v5200_v26, 0.0 }
 0x978   : > { %2550 = vadd.xlane.f32.xlu0 %v2549_v27 }
 0x97a   : > { %v5991_v36 = vpop.eup %5201 }
 0x97b   : > { %v2555_v37 = vsel %vm1298_vm7, %v5991_v36, 0.0 }
 0x97c   : > { %2556 = vadd.xlane.f32.xlu1 %v2555_v37 }
 0x97e   : > { %v5995_v38 = vpop.eup %5203 }
 0x97f   : > { %v2552_v41 = vsel %vm1298_vm7, %v5995_v38, 0.0  ;;  %v6003_v59 = vpop.eup %5205 }
 0x980   : > { %2553 = vadd.xlane.f32.xlu0 %v2552_v41  ;;  %v2540_v39 = vsel %vm1298_vm7, %v6003_v59, 0.0  ;;  %v6007_v60 = vpop.eup %5207 }
 0x981   : > { %v2543_v61 = vsel %vm1298_vm7, %v6007_v60, 0.0  ;;  %v6011_v58 = vpop.eup %5209 }
 0x982   : > { %v2546_v62 = vsel %vm1298_vm7, %v6011_v58, 0.0 }
 0x98d   : > { %2579 = vrot.lane.b32.xlu1 %v5622_v15, %s5337_s1 }
 0x991   : > { %2577 = vrot.lane.b32.xlu1 %v5625_v56, %s5337_s1 }
 0x995   : > { %2679 = vrot.lane.b32.xlu1 %v5636_v18, %s5337_s1 }
 0x996   : > { %2581 = vrot.lane.b32.xlu0 %v5633_v17, %s5337_s1 }
 0x9b5   : > { %2541 = vadd.xlane.f32.xlu0 %v2540_v39 }
 0x9b9   : > { %2544 = vadd.xlane.f32.xlu1 %v2543_v61 }
 0x9bd   : > { %2547 = vadd.xlane.f32.xlu1 %v2546_v62 }
 0x9cb   : > { %2677 = vrot.lane.b32.xlu0 %v5639_v19, %s5337_s1 }
 0x9ce   : > { %2675 = vrot.lane.b32.xlu1 %v5627_v16, %s5337_s1 }
 0x9cf   : > { %2903 = vrot.lane.b32.xlu0 %v5633_v17, %s5338_s22 }
 0x9d2   : > { %2901 = vrot.lane.b32.xlu1 %v5622_v15, %s5338_s22 }
 0x9d3   : > { %3007 = vrot.lane.b32.xlu0 %v5636_v18, %s5338_s22 }
 0x9d6   : > { %2899 = vrot.lane.b32.xlu1 %v5625_v56, %s5338_s22 }
 0x9d7   : > { %3005 = vrot.lane.b32.xlu0 %v5639_v19, %s5338_s22 }
 0x9da   : > { %2893 = vrot.lane.b32.xlu1 %v5625_v56, %s5339_s16 }
 0x9db   : > { %3003 = vrot.lane.b32.xlu0 %v5627_v16, %s5338_s22 }
 0x9de   : > { %2895 = vrot.lane.b32.xlu1 %v5622_v15, %s5339_s16 }
 0x9df   : > { %2997 = vrot.lane.b32.xlu0 %v5627_v16, %s5339_s16 }
 0x9e2   : > { %2897 = vrot.lane.b32.xlu1 %v5633_v17, %s5339_s16 }
 0x9e3   : > { %2999 = vrot.lane.b32.xlu0 %v5639_v19, %s5339_s16 }
 0x9e6   : > { %3001 = vrot.lane.b32.xlu1 %v5636_v18, %s5339_s16 }
 0xa01   : > { %v2551_v63 = vpop.xlane.xlu0 %2550 }
 0xa02   : > { %5211 = vrcp.f32 %v2551_v63 }
 0xa05   : > { %v2557_v0 = vpop.xlane.xlu1 %2556 }
 0xa06   : > { %5213 = vrcp.f32 %v2557_v0 }
 0xa09   : > { %v2580_v40 = vpop.permute.xlu1 %2579  ;;  %v2554_v1 = vpop.xlane.xlu0 %2553 }
 0xa0a   : > { %5215 = vrcp.f32 %v2554_v1 }
 0xa0d   : > { %v2578_v2 = vpop.permute.xlu1 %2577  ;;  %v2582_v3 = vpop.permute.xlu0 %2581 }
 0xa0e   : > { %4931 = vmatpush3.msra.mxu1 %v2582_v3 }
 0xa0f   : > { %4932 = vmatprep.subr.mxu1 %v5327_v54  ;;  %v5212_v4 = vpop.eup %5211 }
 0xa10   : > { %4933 = vmatpush3.msra.mxu1 %v2580_v40  ;;  %v2567_v6 = vmul.f32 %v5212_v4, %v5200_v26 }
 0xa11   : > { %v2680_v7 = vpop.permute.xlu1 %2679  ;;  %4934 = vmatprep.subr.mxu1 %v5327_v54 }
 0xa12   : > { %4935 = vmatpush3.msra.mxu1 %v2578_v2  ;;  %4946 = vmatpush3.msra.mxu0 %v2680_v7  ;;  %4470 = vst.msk [vmem:[%s5492_s13 + $0x78] sm:$0xff] %vm1298_vm7, %v2567_v6 }
 0xa13   : > { %v5214_v9 = vpop.eup %5213  ;;  %4947 = vmatprep.subr.mxu0 %v5327_v54  ;;  %4960 = vmatprep.subr.mxu1 %v2773_v5 }
 0xa14   : > { %v2569_v10 = vmul.f32 %v5214_v9, %v5991_v36 }
 0xa16   : > { %4472 = vst.msk [vmem:[%s5492_s13 + $0x88] sm:$0xff] %vm1298_vm7, %v2569_v10 }
 0xa17   : > { %v5216_v11 = vpop.eup %5215 }
 0xa18   : > { %v2568_v14 = vmul.f32 %v5216_v11, %v5995_v38 }
 0xa1a   : > { %4471 = vst.msk [vmem:[%s5492_s13 + $0x80] sm:$0xff] %vm1298_vm7, %v2568_v14 }
 0xa3e   : > { %v2542_v21 = vpop.xlane.xlu0 %2541 }
 0xa3f   : > { %5217 = vrcp.f32 %v2542_v21 }
 0xa42   : > { %v2545_v33 = vpop.xlane.xlu1 %2544  ;;  %v2678_v8 = vpop.permute.xlu0 %2677 }
 0xa43   : > { %5219 = vrcp.f32 %v2545_v33  ;;  %4948 = vmatpush3.msra.mxu0 %v2678_v8 }
 0xa44   : > { %4949 = vmatprep.subr.mxu0 %v5327_v54 }
 0xa46   : > { %v2548_v46 = vpop.xlane.xlu1 %2547  ;;  %v2904_v13 = vpop.permute.xlu0 %2903 }
 0xa47   : > { %5221 = vrcp.f32 %v2548_v46 }
 0xa4a   : > { %v2676_v48 = vpop.permute.xlu1 %2675  ;;  %v3008_v42 = vpop.permute.xlu0 %3007 }
 0xa4b   : > { %4950 = vmatpush3.msra.mxu0 %v2676_v48 }
 0xa4c   : > { %v5218_v12 = vpop.eup %5217  ;;  %4952 = vmatmul.mubr.msk.f32.vlgmr.msra.gmra.mxu0 %vm1298_vm7, %v2567_v6  ;;  %4971 = vmatprep.subr.mxu0 %v5327_v54 }
 0xa4d   : > { %v2564_v20 = vmul.f32 %v5218_v12, %v6003_v59  ;;  %4972 = vmatpush3.xpose.msk.msra.mxu0 %vm1092_vm5, %v2904_v13  ;;  %4954 = vmatprep.mubr.msk.f32.mxu0 %vm5329_vm4, %v5327_v54  ;;  %v2261_v13 = vadd.f32 %v5945_v28, %v5966_v44 }
 0xa4e   : > { %v2902_v22 = vpop.permute.xlu1 %2901  ;;  %4973 = vmatprep.subr.mxu0 %v5327_v54  ;;  %v3006_v59 = vpop.permute.xlu0 %3005 }
 0xa4f   : > { %4467 = vst.msk [vmem:[%s5492_s13 + $0x60] sm:$0xff] %vm1298_vm7, %v2564_v20  ;;  %4937 = vmatmul.mubr.msk.f32.vlgmr.msra.gmra.mxu1 %vm1298_vm7, %v2564_v20 }
 0xa50   : > { %v5220_v23 = vpop.eup %5219  ;;  %4955 = vmatmul.mubr.msk.f32.gmra.mxu0 %vm1298_vm7, %v2568_v14  ;;  %4939 = vmatprep.mubr.msk.f32.mxu1 %vm5329_vm4, %v5327_v54 }
 0xa51   : > { %4974 = vmatpush3.xpose.msk.msra.mxu0 %vm1092_vm5, %v2902_v22  ;;  %v2565_v24 = vmul.f32 %v5220_v23, %v6007_v60  ;;  %4957 = vmatprep.mubr.msk.f32.mxu0 %vm5329_vm4, %v5327_v54  ;;  %v2256_v23 = vadd.f32 %v5948_v29, %v5968_v45  ;;  %v2281_v45 = vadd.f32 %v5959_v34, %v5974_v50 }
 0xa52   : > { %v2900_v25 = vpop.permute.xlu1 %2899  ;;  %4975 = vmatprep.subr.mxu0 %v5327_v54  ;;  %4961 = vmatpush3.msra.mxu1 %v2773_v5  ;;  %v3004_v0 = vpop.permute.xlu0 %3003 }
 0xa53   : > { %4468 = vst.msk [vmem:[%s5492_s13 + $0x68] sm:$0xff] %vm1298_vm7, %v2565_v24  ;;  %4940 = vmatmul.mubr.msk.f32.gmra.mxu1 %vm1298_vm7, %v2565_v24  ;;  %4986 = vmatprep.subr.mxu1 %v5327_v54 }
 0xa54   : > { %v5222_v26 = vpop.eup %5221  ;;  %4958 = vmatmul.mubr.msk.f32.gmra.mxu0 %vm1298_vm7, %v2569_v10  ;;  %4942 = vmatprep.mubr.msk.f32.mxu1 %vm5329_vm4, %v5327_v54 }
 0xa55   : > { %4976 = vmatpush3.xpose.msk.msra.mxu0 %vm1092_vm5, %v2900_v25  ;;  %v2566_v27 = vmul.f32 %v5222_v26, %v6011_v58  ;;  %4977 = vmatprep.mubr.msk.f32.mxu0 %vm5329_vm4, %v5327_v54 }
 0xa56   : > { %v2894_v36 = vpop.permute.xlu1 %2893  ;;  %5001 = vmatprep.subr.mxu0 %v5327_v54  ;;  %v2998_v9 = vpop.permute.xlu0 %2997 }
 0xa57   : > { %4469 = vst.msk [vmem:[%s5492_s13 + $0x70] sm:$0xff] %vm1298_vm7, %v2566_v27  ;;  %4943 = vmatmul.mubr.msk.f32.gmra.mxu1 %vm1298_vm7, %v2566_v27 }
 0xa58   : > { %4978 = vmatmul.mubr.msk.f32.vlgmr.msra.gmra.mxu0 %vm1092_vm5, %v2894_v36 }
 0xa59   : > { %4980 = vmatprep.mubr.msk.f32.mxu0 %vm5329_vm4, %v5327_v54 }
 0xa5a   : > { %v2896_v37 = vpop.permute.xlu1 %2895  ;;  %v3000_v46 = vpop.permute.xlu0 %2999 }
 0xa5c   : > { %4981 = vmatmul.mubr.msk.f32.gmra.mxu0 %vm1092_vm5, %v2896_v37  ;;  %v2271_v37 = vadd.f32 %v5952_v31, %v5970_v47 }
 0xa5d   : > { %4983 = vmatprep.mubr.msk.f32.mxu0 %vm5329_vm4, %v5327_v54 }
 0xa5e   : > { %v2898_v38 = vpop.permute.xlu1 %2897 }
 0xa60   : > { %4984 = vmatmul.mubr.msk.f32.gmra.mxu0 %vm1092_vm5, %v2898_v38 }
 0xa61   : > { %5007 = vmatprep.mubr.msk.f32.mxu0 %vm5329_vm4, %v5327_v54 }
 0xa62   : > { %v3002_v12 = vpop.permute.xlu1 %3001 }
 0xb0c   : > { %v2759_v41 = vpop.f32.mrf.mxu0 }
 0xb0e   : > { %v4953_v43 = vpop.f32.mrf.mxu0 }
 0xb0f   : > { %v2661_v52 = vpop.f32.mrf.mxu1 }
 0xb10   : > { %v2764_v53 = vpop.f32.mrf.mxu0  ;;  %4962 = vmatprep.mubr.msk.f32.mxu1 %vm1092_vm5, %v2661_v52 }
 0xb11   : > { %v4938_v55 = vpop.f32.mrf.mxu1 }
 0xb12   : > { %v4956_v57 = vpop.f32.mrf.mxu0 }
 0xb13   : > { %v2666_v39 = vpop.f32.mrf.mxu1 }
 0xb14   : > { %v2769_v60 = vpop.f32.mrf.mxu0  ;;  %4963 = vmatmul.mubr.msk.f32.vlgmr.msra.gmra.mxu1 %vm1092_vm5, %v2666_v39 }
 0xb15   : > { %4987 = vmatpush3.xpose.msk.msra.mxu1 %vm1092_vm5, %v3008_v42  ;;  %v4941_v61 = vpop.f32.mrf.mxu1 }
 0xb16   : > { %v4959_v58 = vpop.f32.mrf.mxu0  ;;  %4988 = vmatprep.subr.mxu1 %v5327_v54 }
 0xb17   : > { %v2671_v62 = vpop.f32.mrf.mxu1 }
 0xb18   : > { %4965 = vmatprep.mubr.msk.f32.mxu1 %vm1092_vm5, %v2671_v62  ;;  %v2983_v63 = vpop.f32.mrf.mxu0 }
 0xb19   : > { %v3101_v40 = vmul.f32 0.35355338, %v2983_v63  ;;  %4989 = vmatpush3.xpose.msk.msra.mxu1 %vm1092_vm5, %v3006_v59  ;;  %v4944_v1 = vpop.f32.mrf.mxu1 }
 0xb1a   : > { %4966 = vmatmul.mubr.msk.f32.gmra.mxu1 %vm1092_vm5, %v2759_v41  ;;  %v4979_v2 = vpop.f32.mrf.mxu0  ;;  %4990 = vmatprep.subr.mxu1 %v5327_v54  ;;  %v2266_v41 = vadd.f32 %v5955_v32, %v5972_v49 }
 0xb1b   : > { %v3107_v3 = vadd.f32 %v3101_v40, %v5680_v30  ;;  %4968 = vmatprep.mubr.msk.f32.mxu1 %vm1092_vm5, %v2764_v53  ;;  %v2276_v53 = vadd.f32 %v5962_v35, %v5976_v51 }
 0xb1c   : > { %v2988_v4 = vpop.f32.mrf.mxu0 }
 0xb1d   : > { %v3102_v5 = vmul.f32 0.35355338, %v2988_v4  ;;  %4991 = vmatpush3.xpose.msk.msra.mxu1 %vm1092_vm5, %v3004_v0  ;;  %v3113_v6 = vsel %vm1298_vm7, %v3107_v3, -inf }
 0xb1e   : > { %4969 = vmatmul.mubr.msk.f32.gmra.mxu1 %vm1092_vm5, %v2769_v60  ;;  %3114 = vmax.xlane.f32.xlu0 %v3113_v6  ;;  %v4982_v7 = vpop.f32.mrf.mxu0 }
 0xb1f   : > { %v3108_v10 = vadd.f32 %v3102_v5, %v5680_v30  ;;  %4992 = vmatprep.mubr.msk.f32.mxu1 %vm5329_vm4, %v5327_v54  ;;  %5016 = vmatprep.subr.mxu1 %v5327_v54 }
 0xb20   : > { %v2993_v11 = vpop.f32.mrf.mxu0 }
 0xb21   : > { %v3103_v14 = vmul.f32 0.35355338, %v2993_v11  ;;  %v3116_v21 = vsel %vm1298_vm7, %v3108_v10, -inf }
 0xb22   : > { %4993 = vmatmul.mubr.msk.f32.vlgmr.msra.gmra.mxu1 %vm1092_vm5, %v2998_v9  ;;  %3117 = vmax.xlane.f32.xlu1 %v3116_v21  ;;  %v4985_v33 = vpop.f32.mrf.mxu0 }
 0xb23   : > { %v3109_v8 = vadd.f32 %v3103_v14, %v5680_v30  ;;  %4995 = vmatprep.mubr.msk.f32.mxu1 %vm5329_vm4, %v5327_v54 }
 0xb25   : > { %v3119_v48 = vsel %vm1298_vm7, %v3109_v8, -inf }
 0xb26   : > { %4996 = vmatmul.mubr.msk.f32.gmra.mxu1 %vm1092_vm5, %v3000_v46  ;;  %3120 = vmax.xlane.f32.xlu0 %v3119_v48 }
 0xb27   : > { %4998 = vmatprep.mubr.msk.f32.mxu1 %vm5329_vm4, %v5327_v54 }
 0xb2a   : > { %4999 = vmatmul.mubr.msk.f32.gmra.mxu1 %vm1092_vm5, %v3002_v12 }
 0xb2b   : > { %5022 = vmatprep.mubr.msk.f32.mxu1 %vm5329_vm4, %v5327_v54 }
 0xba7   : > { %v3115_v20 = vpop.xlane.xlu0 %3114 }
 0xba8   : > { %v3131_v26 = vsub.f32 %v3107_v3, %v3115_v20 }
 0xbaa   : > { %v3137_v28 = vmul.f32 1.442695, %v3131_v26 }
 0xbab   : > { %v3118_v36 = vpop.xlane.xlu1 %3117 }
 0xbac   : > { %v3132_v44 = vsub.f32 %v3108_v10, %v3118_v36  ;;  %5223 = vpow2.f32 %v3137_v28 }
 0xbae   : > { %v3139_v31 = vmul.f32 1.442695, %v3132_v44 }
 0xbaf   : > { %v3121_v43 = vpop.xlane.xlu0 %3120 }
 0xbb0   : > { %v3133_v47 = vsub.f32 %v3109_v8, %v3121_v43  ;;  %5225 = vpow2.f32 %v3139_v31 }
 0xbb2   : > { %v3141_v39 = vmul.f32 1.442695, %v3133_v47 }
 0xbb4   : > { %5227 = vpow2.f32 %v3141_v39 }
 0xbb9   : > { %v5224_v1 = vpop.eup %5223 }
 0xbba   : > { %v3149_v5 = vsel %vm1298_vm7, %v5224_v1, 0.0 }
 0xbbd   : > { %v5226_v6 = vpop.eup %5225 }
 0xbbe   : > { %v3152_v7 = vsel %vm1298_vm7, %v5226_v6, 0.0 }
 0xbc1   : > { %v5228_v9 = vpop.eup %5227 }
 0xbc2   : > { %v3155_v10 = vsel %vm1298_vm7, %v5228_v9, 0.0 }
 0xbd4   : > { %v4964_v22 = vpop.f32.mrf.mxu1 }
 0xbd5   : > { %v6117_v24 = vadd.f32 %v4964_v22, %v2261_v13 }
 0xbd6   : > { %v2858_v25 = vpop.f32.mrf.mxu1 }
 0xbd7   : > { %v6119_v27 = vadd.f32 %v2858_v25, %v2256_v23 }
 0xbda   : > { %v4967_v38 = vpop.f32.mrf.mxu1 }
 0xbdb   : > { %v6125_v42 = vadd.f32 %v4967_v38, %v2271_v37 }
 0xbdc   : > { %v2868_v29 = vpop.f32.mrf.mxu1 }
 0xbdd   : > { %v6129_v52 = vadd.f32 %v2868_v29, %v2266_v41 }
 0xbde   : > { %v4970_v55 = vpop.f32.mrf.mxu1 }
 0xbdf   : > { %v6133_v57 = vadd.f32 %v4970_v55, %v2281_v45 }
 0xbe0   : > { %v2878_v32 = vpop.f32.mrf.mxu1 }
 0xbe1   : > { %v6135_v49 = vadd.f32 %v2878_v32, %v2276_v53  ;;  %v3382_v53 = vld [vmem:[%s6450_s30 + $0x18] sm:$0xff] }
 0xbe2   : > { %v3087_v59 = vpop.f32.mrf.mxu1 }
 0xbe3   : > { %v3104_v60 = vmul.f32 0.35355338, %v3087_v59 }
 0xbe4   : > { %v4994_v61 = vpop.f32.mrf.mxu1 }
 0xbe5   : > { %v3110_v34 = vadd.f32 %v3104_v60, %v5680_v30 }
 0xbe6   : > { %v3092_v50 = vpop.f32.mrf.mxu1 }
 0xbe7   : > { %v3105_v58 = vmul.f32 0.35355338, %v3092_v50  ;;  %v3122_v35 = vsel %vm1298_vm7, %v3110_v34, -inf }
 0xbe8   : > { %3123 = vmax.xlane.f32.xlu0 %v3122_v35  ;;  %v4997_v51 = vpop.f32.mrf.mxu1 }
 0xbe9   : > { %v3111_v62 = vadd.f32 %v3105_v58, %v5680_v30 }
 0xbea   : > { %v3097_v63 = vpop.f32.mrf.mxu1 }
 0xbeb   : > { %v3106_v0 = vmul.f32 0.35355338, %v3097_v63  ;;  %v3125_v40 = vsel %vm1298_vm7, %v3111_v62, -inf }
 0xbec   : > { %3126 = vmax.xlane.f32.xlu0 %v3125_v40  ;;  %v5000_v2 = vpop.f32.mrf.mxu1 }
 0xbed   : > { %v3112_v3 = vadd.f32 %v3106_v0, %v5680_v30 }
 0xbef   : > { %v3128_v4 = vsel %vm1298_vm7, %v3112_v3, -inf }
 0xbf0   : > { %3129 = vmax.xlane.f32.xlu1 %v3128_v4  ;;  %3150 = vadd.xlane.f32.xlu0 %v3149_v5 }
 0xbf4   : > { %3153 = vadd.xlane.f32.xlu1 %v3152_v7 }
 0xbf8   : > { %3156 = vadd.xlane.f32.xlu1 %v3155_v10 }
 0xc06   : > { %3190 = vrot.lane.b32.xlu0 %v5633_v17, %s5340_s24 }
 0xc09   : > { %3188 = vrot.lane.b32.xlu1 %v5622_v15, %s5340_s24 }
 0xc0d   : > { %3186 = vrot.lane.b32.xlu1 %v5625_v56, %s5340_s24 }
 0xc11   : > { %3288 = vrot.lane.b32.xlu1 %v5636_v18, %s5340_s24 }
 0xc71   : > { %v3124_v30 = vpop.xlane.xlu0 %3123 }
 0xc72   : > { %v3134_v11 = vsub.f32 %v3110_v34, %v3124_v30 }
 0xc74   : > { %v3143_v14 = vmul.f32 1.442695, %v3134_v11 }
 0xc75   : > { %v3127_v21 = vpop.xlane.xlu0 %3126 }
 0xc76   : > { %5229 = vpow2.f32 %v3143_v14  ;;  %v3135_v33 = vsub.f32 %v3111_v62, %v3127_v21  ;;  %v5284_v14 = vld [vmem:[#allocation2] sm:$0xff] }
 0xc78   : > { %v3145_v8 = vmul.f32 1.442695, %v3135_v33 }
 0xc79   : > { %v3130_v46 = vpop.xlane.xlu1 %3129  ;;  %v3151_v48 = vpop.xlane.xlu0 %3150 }
 0xc7a   : > { %5231 = vpow2.f32 %v3145_v8  ;;  %v3136_v17 = vsub.f32 %v3112_v3, %v3130_v46 }
 0xc7b   : > { %5233 = vrcp.f32 %v3151_v48 }
 0xc7c   : > { %v3147_v12 = vmul.f32 1.442695, %v3136_v17 }
 0xc7d   : > { %v3154_v15 = vpop.xlane.xlu1 %3153  ;;  %v3191_v13 = vpop.permute.xlu0 %3190 }
 0xc7e   : > { %5235 = vpow2.f32 %v3147_v12  ;;  %5002 = vmatpush3.msra.mxu0 %v3191_v13  ;;  %v3636_v12 = vld [vmem:[%s5473_s0 + $0x18] sm:$0xff]  ;;  %v3634_v13 = vld [vmem:[%s5473_s0 + $0x8] sm:$0xff] }
 0xc7f   : > { %5237 = vrcp.f32 %v3154_v15  ;;  %5003 = vmatprep.subr.mxu0 %v5327_v54  ;;  %v3635_v15 = vld [vmem:[%s5473_s0 + $0x10] sm:$0xff] }
 0xc81   : > { %v3157_v56 = vpop.xlane.xlu1 %3156 }
 0xc82   : > { %5239 = vrcp.f32 %v3157_v56  ;;  %v3633_v56 = vld [vmem:[%s5473_s0] sm:$0xff]  ;;  %s6455_s0 = sld [smem:[#allocation15_spill]] (!%p4532_p6) }
 0xc83   : > { %v5230_v18 = vpop.eup %5229 }
 0xc84   : > { %v3158_v20 = vsel %vm1298_vm7, %v5230_v18, 0.0 }
 0xc85   : > { %v3189_v22 = vpop.permute.xlu1 %3188  ;;  %3159 = vadd.xlane.f32.xlu0 %v3158_v20 }
 0xc86   : > { %5004 = vmatpush3.msra.mxu0 %v3189_v22 }
 0xc87   : > { %v5232_v23 = vpop.eup %5231  ;;  %5005 = vmatprep.subr.mxu0 %v5327_v54 }
 0xc88   : > { %v5234_v25 = vpop.eup %5233  ;;  %v3161_v26 = vsel %vm1298_vm7, %v5232_v23, 0.0 }
 0xc89   : > { %v3173_v36 = vmul.f32 %v5234_v25, %v5224_v1  ;;  %v3187_v37 = vpop.permute.xlu1 %3186  ;;  %3162 = vadd.xlane.f32.xlu0 %v3161_v26  ;;  %v5285_v25 = vld [vmem:[#allocation2 + $0x18] sm:$0xff] }
 0xc8a   : > { %5006 = vmatpush3.msra.mxu0 %v3187_v37 }
 0xc8b   : > { %v5236_v38 = vpop.eup %5235  ;;  %4497 = vst.msk [vmem:[%s5492_s13 + $0x90] sm:$0xff] %vm1298_vm7, %v3173_v36  ;;  %5008 = vmatmul.mubr.msk.f32.vlgmr.msra.gmra.mxu0 %vm1298_vm7, %v3173_v36  ;;  %5031 = vmatprep.subr.mxu0 %v3382_v53 }
 0xc8c   : > { %v5238_v41 = vpop.eup %5237  ;;  %v3164_v28 = vsel %vm1298_vm7, %v5236_v38, 0.0  ;;  %5010 = vmatprep.mubr.msk.f32.mxu0 %vm5329_vm4, %v5327_v54  ;;  %5032 = vmatpush3.msra.mxu0 %v3382_v53 }
 0xc8d   : > { %3165 = vadd.xlane.f32.xlu1 %v3164_v28  ;;  %v3289_v44 = vpop.permute.xlu1 %3288  ;;  %v3174_v43 = vmul.f32 %v5238_v41, %v5226_v6  ;;  %v6204_v6 = vld [vmem:[%s6451_s14] ss:$0 sm:$0xff]  ;;  %v5286_v28 = vld [vmem:[#allocation2 + $0x10] sm:$0xff] }
 0xc8e   : > { %5017 = vmatpush3.msra.mxu1 %v3289_v44 }
 0xc8f   : > { %v5240_v29 = vpop.eup %5239  ;;  %4498 = vst.msk [vmem:[%s5492_s13 + $0x98] sm:$0xff] %vm1298_vm7, %v3174_v43  ;;  %5011 = vmatmul.mubr.msk.f32.gmra.mxu0 %vm1298_vm7, %v3174_v43  ;;  %5018 = vmatprep.subr.mxu1 %v5327_v54 }
 0xc90   : > { %5013 = vmatprep.mubr.msk.f32.mxu0 %vm5329_vm4, %v5327_v54  ;;  %v3175_v45 = vmul.f32 %v5240_v29, %v5228_v9  ;;  %v5283_v9 = vld [vmem:[#allocation2 + $0x8] sm:$0xff] }
 0xc92   : > { %4499 = vst.msk [vmem:[%s5492_s13 + $0xa0] sm:$0xff] %vm1298_vm7, %v3175_v45 }
 0xc93   : > { %5014 = vmatmul.mubr.msk.f32.gmra.mxu0 %vm1298_vm7, %v3175_v45 }
 0xc9e   : > { %3284 = vrot.lane.b32.xlu1 %v5627_v16, %s5340_s24 }
 0xc9f   : > { %3286 = vrot.lane.b32.xlu0 %v5639_v19, %s5340_s24  ;;  %s6453_s24 = sld [smem:[#allocation13_spill]] (!%p4532_p6) }
 0xd0e   : > { %v3160_v55 = vpop.xlane.xlu0 %3159 }
 0xd0f   : > { %5241 = vrcp.f32 %v3160_v55 }
 0xd12   : > { %v3163_v31 = vpop.xlane.xlu0 %3162 }
 0xd13   : > { %5243 = vrcp.f32 %v3163_v31 }
 0xd16   : > { %v3166_v47 = vpop.xlane.xlu1 %3165  ;;  %v3287_v32 = vpop.permute.xlu0 %3286 }
 0xd17   : > { %5245 = vrcp.f32 %v3166_v47  ;;  %5019 = vmatpush3.msra.mxu1 %v3287_v32 }
 0xd18   : > { %5020 = vmatprep.subr.mxu1 %v5327_v54 }
 0xd1a   : > { %v3285_v16 = vpop.permute.xlu1 %3284 }
 0xd1b   : > { %5021 = vmatpush3.msra.mxu1 %v3285_v16 }
 0xd1c   : > { %v5242_v59 = vpop.eup %5241  ;;  %5042 = vmatprep.subr.mxu1 %v3636_v12 }
 0xd1d   : > { %v3176_v19 = vmul.f32 %v5242_v59, %v5230_v18 }
 0xd1f   : > { %4500 = vst.msk [vmem:[%s5492_s13 + $0xa8] sm:$0xff] %vm1298_vm7, %v3176_v19  ;;  %5023 = vmatmul.mubr.msk.f32.vlgmr.msra.gmra.mxu1 %vm1298_vm7, %v3176_v19 }
 0xd20   : > { %v5244_v39 = vpop.eup %5243  ;;  %5025 = vmatprep.mubr.msk.f32.mxu1 %vm5329_vm4, %v5327_v54  ;;  %5043 = vmatpush3.msra.mxu1 %v3636_v12  ;;  %v3926_v12 = vld [vmem:[%s5487_s23 + $0x38] sm:$0xff] }
 0xd21   : > { %v3177_v60 = vmul.f32 %v5244_v39, %v5232_v23  ;;  %5044 = vmatprep.subr.mxu1 %v3635_v15  ;;  %v5287_v39 = vld [vmem:[#allocation2 + $0x28] sm:$0xff]  ;;  %5059 = vmatprep.subr.mxu0 %v3926_v12 }
 0xd22   : > { %5045 = vmatpush3.msra.mxu1 %v3635_v15 }
 0xd23   : > { %4501 = vst.msk [vmem:[%s5492_s13 + $0xb0] sm:$0xff] %vm1298_vm7, %v3177_v60  ;;  %5026 = vmatmul.mubr.msk.f32.gmra.mxu1 %vm1298_vm7, %v3177_v60  ;;  %5046 = vmatprep.subr.mxu1 %v3634_v13 }
 0xd24   : > { %v5246_v61 = vpop.eup %5245  ;;  %5028 = vmatprep.mubr.msk.f32.mxu1 %vm5329_vm4, %v5327_v54  ;;  %5047 = vmatpush3.msra.mxu1 %v3634_v13 }
 0xd25   : > { %v3178_v34 = vmul.f32 %v5246_v61, %v5236_v38  ;;  %5048 = vmatprep.subr.mxu1 %v3633_v56 }
 0xd26   : > { %5049 = vmatpush3.msra.mxu1 %v3633_v56  ;;  %v3925_v56 = vld [vmem:[%s5487_s23 + $0x30] sm:$0xff] }
 0xd27   : > { %4502 = vst.msk [vmem:[%s5492_s13 + $0xb8] sm:$0xff] %vm1298_vm7, %v3178_v34  ;;  %5029 = vmatmul.mubr.msk.f32.gmra.mxu1 %vm1298_vm7, %v3178_v34  ;;  %s6454_s13 = smov (!%p4532_p6), %s6453_s24 }
 0xd4b   : > { %v3270_v50 = vpop.f32.mrf.mxu0 }
 0xd4c   : > { %5033 = vmatprep.mubr.msk.f32.mxu0 %vm1092_vm5, %v3270_v50 }
 0xd4d   : > { %v5009_v58 = vpop.f32.mrf.mxu0 }
 0xd4f   : > { %v3275_v35 = vpop.f32.mrf.mxu0 }
 0xd50   : > { %5034 = vmatmul.mubr.msk.f32.vlgmr.msra.gmra.mxu0 %vm1092_vm5, %v3275_v35 }
 0xd51   : > { %v5012_v51 = vpop.f32.mrf.mxu0  ;;  %5060 = vmatpush3.msra.mxu0 %v3926_v12  ;;  %v6306_v12 = vld [vmem:[%s654_s19] ss:$0 sm:$0xff] }
 0xd52   : > { %5061 = vmatprep.subr.mxu0 %v3925_v56 }
 0xd53   : > { %v3280_v62 = vpop.f32.mrf.mxu0  ;;  %5062 = vmatpush3.msra.mxu0 %v3925_v56 }
 0xd54   : > { %5036 = vmatprep.mubr.msk.f32.mxu0 %vm1092_vm5, %v3280_v62  ;;  %v5288_v62 = vld [vmem:[#allocation2 + $0x20] sm:$0xff] }
 0xd55   : > { %v5015_v63 = vpop.f32.mrf.mxu0 }
 0xddf   : > { %v3368_v0 = vpop.f32.mrf.mxu1 }
 0xde0   : > { %5037 = vmatmul.mubr.msk.f32.gmra.mxu0 %vm1092_vm5, %v3368_v0 }
 0xde1   : > { %v5024_v54 = vpop.f32.mrf.mxu1 }
 0xde3   : > { %v3373_v40 = vpop.f32.mrf.mxu1 }
 0xde4   : > { %5039 = vmatprep.mubr.msk.f32.mxu0 %vm1092_vm5, %v3373_v40 }
 0xde5   : > { %v5027_v1 = vpop.f32.mrf.mxu1 }
 0xde7   : > { %v3378_v2 = vpop.f32.mrf.mxu1 }
 0xde8   : > { %5040 = vmatmul.mubr.msk.f32.gmra.mxu0 %vm1092_vm5, %v3378_v2 }
 0xde9   : > { %v5030_v3 = vpop.f32.mrf.mxu1 }
 0xe10   : > { %v5035_v4 = vpop.f32.mrf.mxu0 }
 0xe11   : > { %v3497_v5 = vadd.f32 %v5035_v4, %v6117_v24 }
 0xe12   : > { %v3467_v7 = vpop.f32.mrf.mxu0 }
 0xe13   : > { %v3503_v10 = vadd.f32 %v5283_v9, %v3497_v5  ;;  %v3496_v30 = vadd.f32 %v3467_v7, %v6119_v27 }
 0xe15   : > { %v6208_v11 = vadd.f32 %v6204_v6, %v3503_v10  ;;  %v3502_v21 = vadd.f32 %v5284_v14, %v3496_v30  ;;  %v6266_v14 = vld [vmem:[%s5454_s18 + $0x2] ss:$0 sm:$0xff] }
 0xe17   : > { %v6211_v24 = vadd.f32 %v6204_v6, %v3502_v21  ;;  %v3526_v33 = vsel %vm851_vm3, %v6208_v11, 0.0  ;;  %v3542_v27 = vmul.f32 %v6208_v11, %v6208_v11 }
 0xe18   : > { %3527 = vadd.xlane.f32.xlu1 %v3526_v33 }
 0xe19   : > { %v3523_v8 = vsel %vm851_vm3, %v6211_v24, 0.0  ;;  %v3550_v46 = vsel %vm851_vm3, %v3542_v27, 0.0  ;;  %v3541_v48 = vmul.f32 %v6211_v24, %v6211_v24  ;;  %v6270_v27 = vld [vmem:[%s5454_s18 + $0x3] ss:$0 sm:$0xff] }
 0xe1a   : > { %3524 = vadd.xlane.f32.xlu0 %v3523_v8 }
 0xe1b   : > { %v3547_v17 = vsel %vm851_vm3, %v3541_v48, 0.0 }
 0xe1e   : > { %3551 = vadd.xlane.f32.xlu0 %v3550_v46 }
 0xe22   : > { %3548 = vadd.xlane.f32.xlu0 %v3547_v17 }
 0xea0   : > { %v5038_v18 = vpop.f32.mrf.mxu0 }
 0xea1   : > { %v3499_v20 = vadd.f32 %v5038_v18, %v6125_v42  ;;  %v3528_v22 = vpop.xlane.xlu1 %3527 }
 0xea2   : > { %v3477_v23 = vpop.f32.mrf.mxu0  ;;  %v3566_v38 = vmul.f32 0.03125, %v3528_v22  ;;  %v3924_v22 = vld [vmem:[%s5487_s23 + $0x28] sm:$0xff] }
 0xea3   : > { %v3505_v26 = vadd.f32 %v5285_v25, %v3499_v20  ;;  %v3498_v36 = vadd.f32 %v3477_v23, %v6129_v52  ;;  %v3525_v37 = vpop.xlane.xlu0 %3524  ;;  %5063 = vmatprep.subr.mxu0 %v3924_v22 }
 0xea4   : > { %v3578_v53 = vmul.f32 %v3566_v38, %v3566_v38  ;;  %v3565_v55 = vmul.f32 0.03125, %v3525_v37  ;;  %v3602_v9 = vsub.f32 %v6208_v11, %v3566_v38  ;;  %5064 = vmatpush3.msra.mxu0 %v3924_v22 }
 0xea5   : > { %v6230_v41 = vadd.f32 %v6204_v6, %v3505_v26  ;;  %v3504_v44 = vadd.f32 %v5286_v28, %v3498_v36  ;;  %v3923_v36 = vld [vmem:[%s5487_s23 + $0x20] sm:$0xff] }
 0xea6   : > { %v3577_v58 = vmul.f32 %v3565_v55, %v3565_v55  ;;  %v3601_v30 = vsub.f32 %v6211_v24, %v3565_v55  ;;  %5065 = vmatprep.subr.mxu0 %v3923_v36 }
 0xea7   : > { %v6233_v43 = vadd.f32 %v6204_v6, %v3504_v44  ;;  %v3552_v29 = vpop.xlane.xlu0 %3551  ;;  %v3532_v42 = vsel %vm851_vm3, %v6230_v41, 0.0  ;;  %v3544_v45 = vmul.f32 %v6230_v41, %v6230_v41  ;;  %5066 = vmatpush3.msra.mxu0 %v3923_v36 }
 0xea8   : > { %v3572_v52 = vmul.f32 0.03125, %v3552_v29  ;;  %3533 = vadd.xlane.f32.xlu1 %v3532_v42  ;;  %v5041_v31 = vpop.f32.mrf.mxu0  ;;  %v3922_v29 = vld [vmem:[%s5487_s23 + $0x18] sm:$0xff] }
 0xea9   : > { %v3501_v47 = vadd.f32 %v5041_v31, %v6133_v57  ;;  %v3529_v32 = vsel %vm851_vm3, %v6233_v43, 0.0  ;;  %v3543_v16 = vmul.f32 %v6233_v43, %v6233_v43  ;;  %v3556_v50 = vsel %vm851_vm3, %v3544_v45, 0.0  ;;  %5067 = vmatprep.subr.mxu0 %v3922_v29 }
 0xeaa   : > { %v3584_v59 = vsub.f32 %v3572_v52, %v3578_v53  ;;  %3530 = vadd.xlane.f32.xlu0 %v3529_v32  ;;  %v3487_v19 = vpop.f32.mrf.mxu0  ;;  %5068 = vmatpush3.msra.mxu0 %v3922_v29  ;;  %v3921_v52 = vld [vmem:[%s5487_s23 + $0x10] sm:$0xff]  ;;  %v3920_v32 = vld [vmem:[%s5487_s23 + $0x8] sm:$0xff] }
 0xeab   : > { %v3507_v60 = vadd.f32 %v5287_v39, %v3501_v47  ;;  %v3500_v61 = vadd.f32 %v3487_v19, %v6135_v49  ;;  %v3549_v34 = vpop.xlane.xlu0 %3548  ;;  %v3553_v0 = vsel %vm851_vm3, %v3543_v16, 0.0  ;;  %5069 = vmatprep.subr.mxu0 %v3921_v52 }
 0xeac   : > { %v3590_v35 = vadd.f32 1e-05, %v3584_v59  ;;  %v3571_v51 = vmul.f32 0.03125, %v3549_v34  ;;  %3557 = vadd.xlane.f32.xlu1 %v3556_v50  ;;  %5070 = vmatpush3.msra.mxu0 %v3921_v52 }
 0xead   : > { %v6247_v57 = vadd.f32 %v6204_v6, %v3507_v60  ;;  %v3506_v63 = vadd.f32 %v5288_v62, %v3500_v61  ;;  %5071 = vmatprep.subr.mxu0 %v3920_v32  ;;  %v3919_v60 = vld [vmem:[%s5487_s23] sm:$0xff] }
 0xeae   : > { %5247 = vrsqrt.f32 %v3590_v35  ;;  %v3583_v54 = vsub.f32 %v3571_v51, %v3577_v58  ;;  %3554 = vadd.xlane.f32.xlu0 %v3553_v0  ;;  %5072 = vmatpush3.msra.mxu0 %v3920_v32 }
 0xeaf   : > { %v6251_v40 = vadd.f32 %v6204_v6, %v3506_v63  ;;  %v3538_v49 = vsel %vm851_vm3, %v6247_v57, 0.0  ;;  %v3546_v1 = vmul.f32 %v6247_v57, %v6247_v57  ;;  %5073 = vmatprep.subr.mxu0 %v3919_v60 }
 0xeb0   : > { %v3589_v2 = vadd.f32 1e-05, %v3583_v54  ;;  %3539 = vadd.xlane.f32.xlu1 %v3538_v49  ;;  %5074 = vmatpush3.msra.mxu0 %v3919_v60 }
 0xeb1   : > { %v3535_v3 = vsel %vm851_vm3, %v6251_v40, 0.0  ;;  %v3545_v4 = vmul.f32 %v6251_v40, %v6251_v40  ;;  %v3562_v5 = vsel %vm851_vm3, %v3546_v1, 0.0 }
 0xeb2   : > { %5249 = vrsqrt.f32 %v3589_v2  ;;  %3536 = vadd.xlane.f32.xlu0 %v3535_v3 }
 0xeb3   : > { %v3559_v6 = vsel %vm851_vm3, %v3545_v4, 0.0 }
 0xeb4   : > { %3563 = vadd.xlane.f32.xlu1 %v3562_v5 }
 0xeb6   : > { %3560 = vadd.xlane.f32.xlu0 %v3559_v6 }
 0xebb   : > { %v5248_v7 = vpop.eup %5247 }
 0xebc   : > { %v3608_v10 = vmul.f32 %v5248_v7, %v3602_v9 }
 0xebe   : > { %v3618_v8 = vmul.f32 %v6266_v14, %v3608_v10 }
 0xebf   : > { %v5250_v21 = vpop.eup %5249 }
 0xec0   : > { %v3607_v33 = vmul.f32 %v5250_v21, %v3601_v30  ;;  %v3628_v17 = vadd.f32 %v6270_v27, %v3618_v8 }
 0xec2   : > { %v3617_v46 = vmul.f32 %v6266_v14, %v3607_v33 }
 0xec4   : > { %v3627_v48 = vadd.f32 %v6270_v27, %v3617_v46 }
 0xec6   : > { %5050 = vmatprep.mubr.msk.f32.mxu1 %vm851_vm3, %v3627_v48 }
 0xec7   : > { %5051 = vmatmul.mubr.msk.f32.vlgmr.msra.gmra.mxu1 %vm851_vm3, %v3628_v17 }
 0xf31   : > { %v3534_v15 = vpop.xlane.xlu1 %3533 }
 0xf32   : > { %v3568_v13 = vmul.f32 0.03125, %v3534_v15 }
 0xf33   : > { %v3531_v18 = vpop.xlane.xlu0 %3530 }
 0xf34   : > { %v3567_v20 = vmul.f32 0.03125, %v3531_v18  ;;  %v3580_v25 = vmul.f32 %v3568_v13, %v3568_v13  ;;  %v3604_v63 = vsub.f32 %v6230_v41, %v3568_v13 }
 0xf35   : > { %v3558_v23 = vpop.xlane.xlu1 %3557 }
 0xf36   : > { %v3574_v26 = vmul.f32 0.03125, %v3558_v23  ;;  %v3579_v38 = vmul.f32 %v3567_v20, %v3567_v20  ;;  %v3603_v54 = vsub.f32 %v6233_v43, %v3567_v20 }
 0xf37   : > { %v3555_v37 = vpop.xlane.xlu0 %3554 }
 0xf38   : > { %v3586_v28 = vsub.f32 %v3574_v26, %v3580_v25  ;;  %v3573_v44 = vmul.f32 0.03125, %v3555_v37 }
 0xf39   : > { %v3540_v42 = vpop.xlane.xlu1 %3539 }
 0xf3a   : > { %v3592_v45 = vadd.f32 1e-05, %v3586_v28  ;;  %v3585_v53 = vsub.f32 %v3573_v44, %v3579_v38  ;;  %v3570_v55 = vmul.f32 0.03125, %v3540_v42 }
 0xf3b   : > { %v3537_v31 = vpop.xlane.xlu0 %3536 }
 0xf3c   : > { %5251 = vrsqrt.f32 %v3592_v45  ;;  %v3591_v47 = vadd.f32 1e-05, %v3585_v53  ;;  %v3569_v16 = vmul.f32 0.03125, %v3537_v31  ;;  %v3582_v19 = vmul.f32 %v3570_v55, %v3570_v55 }
 0xf3d   : > { %v3564_v59 = vpop.xlane.xlu1 %3563  ;;  %v3606_v5 = vsub.f32 %v6247_v57, %v3570_v55 }
 0xf3e   : > { %5253 = vrsqrt.f32 %v3591_v47  ;;  %v3576_v39 = vmul.f32 0.03125, %v3564_v59  ;;  %v3581_v34 = vmul.f32 %v3569_v16, %v3569_v16  ;;  %v3605_v10 = vsub.f32 %v6251_v40, %v3569_v16 }
 0xf3f   : > { %v3561_v61 = vpop.xlane.xlu0 %3560 }
 0xf40   : > { %v3588_v50 = vsub.f32 %v3576_v39, %v3582_v19  ;;  %v3575_v58 = vmul.f32 0.03125, %v3561_v61 }
 0xf42   : > { %v3594_v35 = vadd.f32 1e-05, %v3588_v50  ;;  %v3587_v51 = vsub.f32 %v3575_v58, %v3581_v34 }
 0xf44   : > { %5255 = vrsqrt.f32 %v3594_v35  ;;  %v3593_v62 = vadd.f32 1e-05, %v3587_v51 }
 0xf46   : > { %5257 = vrsqrt.f32 %v3593_v62 }
 0xf49   : > { %v5252_v0 = vpop.eup %5251 }
 0xf4a   : > { %v3610_v49 = vmul.f32 %v5252_v0, %v3604_v63 }
 0xf4b   : > { %v5254_v1 = vpop.eup %5253 }
 0xf4c   : > { %v3609_v2 = vmul.f32 %v5254_v1, %v3603_v54  ;;  %v3620_v3 = vmul.f32 %v6266_v14, %v3610_v49 }
 0xf4e   : > { %v3619_v4 = vmul.f32 %v6266_v14, %v3609_v2  ;;  %v3630_v9 = vadd.f32 %v6270_v27, %v3620_v3 }
 0xf50   : > { %v3629_v6 = vadd.f32 %v6270_v27, %v3619_v4 }
 0xf51   : > { %v5256_v7 = vpop.eup %5255 }
 0xf52   : > { %5053 = vmatprep.mubr.msk.f32.mxu1 %vm851_vm3, %v3629_v6  ;;  %v3612_v30 = vmul.f32 %v5256_v7, %v3606_v5 }
 0xf53   : > { %v5258_v21 = vpop.eup %5257  ;;  %5054 = vmatmul.mubr.msk.f32.gmra.mxu1 %vm851_vm3, %v3630_v9 }
 0xf54   : > { %v3611_v33 = vmul.f32 %v5258_v21, %v3605_v10  ;;  %v3622_v8 = vmul.f32 %v6266_v14, %v3612_v30 }
 0xf56   : > { %v3621_v46 = vmul.f32 %v6266_v14, %v3611_v33  ;;  %v3632_v17 = vadd.f32 %v6270_v27, %v3622_v8 }
 0xf58   : > { %v3631_v48 = vadd.f32 %v6270_v27, %v3621_v46 }
 0xf5a   : > { %5056 = vmatprep.mubr.msk.f32.mxu1 %vm851_vm3, %v3631_v48 }
 0xf5b   : > { %5057 = vmatmul.mubr.msk.f32.gmra.mxu1 %vm851_vm3, %v3632_v17 }
 0xf87   : > { %v5052_v15 = vpop.f32.mrf.mxu1 }
 0xf88   : > { %v3734_v13 = vadd.f32 %v5052_v15, %v6306_v12 }
 0xf89   : > { %v3728_v56 = vpop.f32.mrf.mxu1 }
 0xf8a   : > { %v3764_v18 = vmul.f32 0.70710677, %v3734_v13  ;;  %v3729_v14 = vadd.f32 %v6306_v12, %v3728_v56  ;;  %v3758_v21 = vmul.f32 0.5, %v3734_v13 }
 0xf8c   : > { %v3770_v20 = vand.u32 2147483647, %v3764_v18  ;;  %v3763_v22 = vmul.f32 0.70710677, %v3729_v14  ;;  %vm3890_vm8 = vcmp.lt.f32.partialorder %v3764_v18, 0.0  ;;  %v3757_v10 = vmul.f32 0.5, %v3729_v14 }
 0xf8e   : > { %v3776_v27 = vmul.f32 0.3275911, %v3770_v20  ;;  %v3769_v23 = vand.u32 2147483647, %v3763_v22  ;;  %v3854_v37 = vsub.f32 0.0, %v3770_v20  ;;  %vm3889_vm9 = vcmp.lt.f32.partialorder %v3763_v22, 0.0 }
 0xf90   : > { %v3782_v25 = vadd.f32 1.0, %v3776_v27  ;;  %v3775_v26 = vmul.f32 0.3275911, %v3769_v23  ;;  %v3853_v38 = vsub.f32 0.0, %v3769_v23  ;;  %v3860_v28 = vmul.f32 %v3854_v37, %v3770_v20 }
 0xf92   : > { %5259 = vrcp.f32 %v3782_v25  ;;  %v3781_v36 = vadd.f32 1.0, %v3775_v26  ;;  %v3859_v29 = vmul.f32 %v3853_v38, %v3769_v23  ;;  %v3867_v45 = vmul.f32 1.442695, %v3860_v28 }
 0xf94   : > { %5261 = vrcp.f32 %v3781_v36  ;;  %v3865_v31 = vmul.f32 1.442695, %v3859_v29 }
 0xf95   : > { %5263 = vpow2.f32 %v3867_v45 }
 0xf96   : > { %5265 = vpow2.f32 %v3865_v31 }
 0xf9f   : > { %v5260_v44 = vpop.eup %5259 }
 0xfa0   : > { %v3800_v42 = vmul.f32 1.0614054, %v5260_v44 }
 0xfa1   : > { %v5262_v53 = vpop.eup %5261 }
 0xfa2   : > { %v3806_v55 = vadd.f32 -1.4531521, %v3800_v42  ;;  %v3799_v52 = vmul.f32 1.0614054, %v5262_v53  ;;  %v5264_v62 = vpop.eup %5263 }
 0xfa3   : > { %v5266_v49 = vpop.eup %5265 }
 0xfa4   : > { %v3812_v47 = vmul.f32 %v5260_v44, %v3806_v55  ;;  %v3805_v32 = vadd.f32 -1.4531521, %v3799_v52 }
 0xfa6   : > { %v3818_v16 = vadd.f32 1.4214138, %v3812_v47  ;;  %v3811_v59 = vmul.f32 %v5262_v53, %v3805_v32 }
 0xfa8   : > { %v3824_v19 = vmul.f32 %v5260_v44, %v3818_v16  ;;  %v3817_v39 = vadd.f32 1.4214138, %v3811_v59 }
 0xfaa   : > { %v3830_v60 = vadd.f32 -0.28449672, %v3824_v19  ;;  %v3823_v61 = vmul.f32 %v5262_v53, %v3817_v39 }
 0xfac   : > { %v3836_v34 = vmul.f32 %v5260_v44, %v3830_v60  ;;  %v3829_v50 = vadd.f32 -0.28449672, %v3823_v61 }
 0xfae   : > { %v3842_v58 = vadd.f32 0.2548296, %v3836_v34  ;;  %v3835_v35 = vmul.f32 %v5262_v53, %v3829_v50 }
 0xfb0   : > { %v3848_v51 = vmul.f32 %v5260_v44, %v3842_v58  ;;  %v3841_v63 = vadd.f32 0.2548296, %v3835_v35 }
 0xfb2   : > { %v3878_v0 = vmul.f32 %v5264_v62, %v3848_v51  ;;  %v3847_v54 = vmul.f32 %v5262_v53, %v3841_v63 }
 0xfb4   : > { %v3884_v1 = vsub.f32 1.0, %v3878_v0  ;;  %v3877_v2 = vmul.f32 %v5266_v49, %v3847_v54 }
 0xfb6   : > { %v3896_v3 = vsub.f32 0.0, %v3884_v1  ;;  %v3883_v4 = vsub.f32 1.0, %v3877_v2 }
 0xfb8   : > { %v3902_v5 = vsel %vm3890_vm8, %v3896_v3, %v3884_v1  ;;  %v3895_v6 = vsub.f32 0.0, %v3883_v4 }
 0xfb9   : > { %v3908_v7 = vadd.f32 1.0, %v3902_v5 }
 0xfba   : > { %v3901_v9 = vsel %vm3889_vm9, %v3895_v6, %v3883_v4 }
 0xfbb   : > { %v3907_v30 = vadd.f32 1.0, %v3901_v9  ;;  %v3914_v8 = vmul.f32 %v3908_v7, %v3758_v21 }
 0xfbd   : > { %v3913_v33 = vmul.f32 %v3907_v30, %v3757_v10 }
 0xfbf   : > { %5075 = vmatprep.mubr.msk.f32.mxu0 %vm3927_vm10, %v3913_v33 }
 0xfc0   : > { %5076 = vmatmul.mubr.msk.f32.vlgmr.msra.gmra.mxu0 %vm3927_vm10, %v3914_v8 }
0x1013   : > { %v5055_v46 = vpop.f32.mrf.mxu1 }
0x1014   : > { %v6313_v48 = vadd.f32 %v5055_v46, %v6306_v12 }
0x1015   : > { %v3738_v17 = vpop.f32.mrf.mxu1 }
0x1016   : > { %v6316_v15 = vmul.f32 0.70710677, %v6313_v48  ;;  %v6319_v56 = vadd.f32 %v6306_v12, %v3738_v17 }
0x1018   : > { %v3772_v13 = vand.u32 2147483647, %v6316_v15  ;;  %v6323_v18 = vmul.f32 0.70710677, %v6319_v56  ;;  %vm3892_vm11 = vcmp.lt.f32.partialorder %v6316_v15, 0.0  ;;  %v3760_v15 = vmul.f32 0.5, %v6313_v48 }
0x101a   : > { %v3778_v14 = vmul.f32 0.3275911, %v3772_v13  ;;  %v3771_v20 = vand.u32 2147483647, %v6323_v18  ;;  %v3856_v42 = vsub.f32 0.0, %v3772_v13  ;;  %vm3891_vm12 = vcmp.lt.f32.partialorder %v6323_v18, 0.0 }
0x101b   : > { %v5058_v22 = vpop.f32.mrf.mxu1 }
0x101c   : > { %v3784_v27 = vadd.f32 1.0, %v3778_v14  ;;  %v3777_v23 = vmul.f32 0.3275911, %v3771_v20  ;;  %v6327_v25 = vadd.f32 %v5058_v22, %v6306_v12  ;;  %v3855_v52 = vsub.f32 0.0, %v3771_v20 }
0x101d   : > { %v3748_v26 = vpop.f32.mrf.mxu1  ;;  %v3862_v31 = vmul.f32 %v3856_v42, %v3772_v13 }
0x101e   : > { %5267 = vrcp.f32 %v3784_v27  ;;  %v3783_v36 = vadd.f32 1.0, %v3777_v23  ;;  %v6330_v37 = vmul.f32 0.70710677, %v6327_v25  ;;  %v6333_v38 = vadd.f32 %v6306_v12, %v3748_v26 }
0x101f   : > { %v3861_v12 = vmul.f32 %v3855_v52, %v3771_v20  ;;  %v3871_v59 = vmul.f32 1.442695, %v3862_v31 }
0x1020   : > { %5269 = vrcp.f32 %v3783_v36  ;;  %v3774_v28 = vand.u32 2147483647, %v6330_v37  ;;  %v6337_v44 = vmul.f32 0.70710677, %v6333_v38  ;;  %vm3894_vm13 = vcmp.lt.f32.partialorder %v6330_v37, 0.0 }
0x1021   : > { %v3869_v34 = vmul.f32 1.442695, %v3861_v12  ;;  %v3761_v48 = vmul.f32 0.5, %v6333_v38 }
0x1022   : > { %v3780_v29 = vmul.f32 0.3275911, %v3774_v28  ;;  %v3773_v45 = vand.u32 2147483647, %v6337_v44  ;;  %v3858_v19 = vsub.f32 0.0, %v3774_v28  ;;  %vm3893_vm14 = vcmp.lt.f32.partialorder %v6337_v44, 0.0 }
0x1024   : > { %v3786_v53 = vadd.f32 1.0, %v3780_v29  ;;  %v3779_v55 = vmul.f32 0.3275911, %v3773_v45  ;;  %v3857_v58 = vsub.f32 0.0, %v3773_v45  ;;  %v3864_v51 = vmul.f32 %v3858_v19, %v3774_v28 }
0x1026   : > { %5271 = vrcp.f32 %v3786_v53  ;;  %v3785_v47 = vadd.f32 1.0, %v3779_v55  ;;  %v3863_v49 = vmul.f32 %v3857_v58, %v3773_v45  ;;  %v3875_v3 = vmul.f32 1.442695, %v3864_v51 }
0x1028   : > { %5273 = vrcp.f32 %v3785_v47  ;;  %v3873_v30 = vmul.f32 1.442695, %v3863_v49 }
0x1029   : > { %5275 = vpow2.f32 %v3871_v59 }
0x102a   : > { %5277 = vpow2.f32 %v3869_v34 }
0x102b   : > { %v5268_v32 = vpop.eup %5267  ;;  %5279 = vpow2.f32 %v3875_v3 }
0x102c   : > { %v3802_v16 = vmul.f32 1.0614054, %v5268_v32  ;;  %5281 = vpow2.f32 %v3873_v30  ;;  %v4531_v30 = vld [vmem:[%s662_s21] ss:$0 sm:$0xff] }
0x102d   : > { %v5270_v39 = vpop.eup %5269 }
0x102e   : > { %v3808_v60 = vadd.f32 -1.4531521, %v3802_v16  ;;  %v3801_v61 = vmul.f32 1.0614054, %v5270_v39 }
0x1030   : > { %v3814_v50 = vmul.f32 %v5268_v32, %v3808_v60  ;;  %v3807_v35 = vadd.f32 -1.4531521, %v3801_v61 }
0x1032   : > { %v3820_v62 = vadd.f32 1.4214138, %v3814_v50  ;;  %v3813_v63 = vmul.f32 %v5270_v39, %v3807_v35  ;;  %v3759_v35 = vmul.f32 0.5, %v6319_v56 }
0x1033   : > { %v5272_v0 = vpop.eup %5271 }
0x1034   : > { %v3826_v54 = vmul.f32 %v5268_v32, %v3820_v62  ;;  %v3819_v1 = vadd.f32 1.4214138, %v3813_v63  ;;  %v3804_v2 = vmul.f32 1.0614054, %v5272_v0 }
0x1035   : > { %v5274_v5 = vpop.eup %5273 }
0x1036   : > { %v3832_v4 = vadd.f32 -0.28449672, %v3826_v54  ;;  %v3825_v6 = vmul.f32 %v5270_v39, %v3819_v1  ;;  %v3810_v7 = vadd.f32 -1.4531521, %v3804_v2  ;;  %v3803_v10 = vmul.f32 1.0614054, %v5274_v5  ;;  %v5276_v22 = vpop.eup %5275 }
0x1037   : > { %v5278_v42 = vpop.eup %5277 }
0x1038   : > { %v3838_v9 = vmul.f32 %v5268_v32, %v3832_v4  ;;  %v3831_v21 = vadd.f32 -0.28449672, %v3825_v6  ;;  %v3816_v33 = vmul.f32 %v5272_v0, %v3810_v7  ;;  %v3809_v46 = vadd.f32 -1.4531521, %v3803_v10  ;;  %v5280_v61 = vpop.eup %5279 }
0x1039   : > { %v5282_v63 = vpop.eup %5281  ;;  %v3762_v7 = vmul.f32 0.5, %v6327_v25 }
0x103a   : > { %v3844_v8 = vadd.f32 0.2548296, %v3838_v9  ;;  %v3837_v17 = vmul.f32 %v5270_v39, %v3831_v21  ;;  %v3822_v13 = vadd.f32 1.4214138, %v3816_v33  ;;  %v3815_v20 = vmul.f32 %v5274_v5, %v3809_v46 }
0x103c   : > { %v3850_v14 = vmul.f32 %v5268_v32, %v3844_v8  ;;  %v3843_v27 = vadd.f32 0.2548296, %v3837_v17  ;;  %v3828_v23 = vmul.f32 %v5272_v0, %v3822_v13  ;;  %v3821_v36 = vadd.f32 1.4214138, %v3815_v20 }
0x103e   : > { %v3880_v26 = vmul.f32 %v5276_v22, %v3850_v14  ;;  %v3849_v28 = vmul.f32 %v5270_v39, %v3843_v27  ;;  %v3834_v29 = vadd.f32 -0.28449672, %v3828_v23  ;;  %v3827_v53 = vmul.f32 %v5274_v5, %v3821_v36 }
0x1040   : > { %v3886_v45 = vsub.f32 1.0, %v3880_v26  ;;  %v3879_v55 = vmul.f32 %v5278_v42, %v3849_v28  ;;  %v3840_v52 = vmul.f32 %v5272_v0, %v3834_v29  ;;  %v3833_v47 = vadd.f32 -0.28449672, %v3827_v53 }
0x1042   : > { %v3898_v31 = vsub.f32 0.0, %v3886_v45  ;;  %v3885_v12 = vsub.f32 1.0, %v3879_v55  ;;  %v3846_v32 = vadd.f32 0.2548296, %v3840_v52  ;;  %v3839_v59 = vmul.f32 %v5274_v5, %v3833_v47 }
0x1044   : > { %v3904_v16 = vsel %vm3892_vm11, %v3898_v31, %v3886_v45  ;;  %v3897_v19 = vsub.f32 0.0, %v3885_v12  ;;  %v3852_v60 = vmul.f32 %v5272_v0, %v3846_v32  ;;  %v3845_v39 = vadd.f32 0.2548296, %v3839_v59 }
0x1045   : > { %v3910_v34 = vadd.f32 1.0, %v3904_v16 }
0x1046   : > { %v3903_v50 = vsel %vm3891_vm12, %v3897_v19, %v3885_v12  ;;  %v3882_v58 = vmul.f32 %v5280_v61, %v3852_v60  ;;  %v3851_v62 = vmul.f32 %v5274_v5, %v3845_v39 }
0x1047   : > { %v3909_v51 = vadd.f32 1.0, %v3903_v50  ;;  %v3916_v2 = vmul.f32 %v3910_v34, %v3760_v15 }
0x1048   : > { %v3888_v54 = vsub.f32 1.0, %v3882_v58  ;;  %v3881_v1 = vmul.f32 %v5282_v63, %v3851_v62 }
0x1049   : > { %v3915_v49 = vmul.f32 %v3909_v51, %v3759_v35 }
0x104a   : > { %v3900_v3 = vsub.f32 0.0, %v3888_v54  ;;  %v3887_v0 = vsub.f32 1.0, %v3881_v1 }
0x104b   : > { %5078 = vmatprep.mubr.msk.f32.mxu0 %vm3927_vm10, %v3915_v49 }
0x104c   : > { %v3906_v18 = vsel %vm3894_vm13, %v3900_v3, %v3888_v54  ;;  %5079 = vmatmul.mubr.msk.f32.gmra.mxu0 %vm3927_vm10, %v3916_v2  ;;  %v3899_v56 = vsub.f32 0.0, %v3887_v0 }
0x104d   : > { %v3912_v4 = vadd.f32 1.0, %v3906_v18 }
0x104e   : > { %v3905_v5 = vsel %vm3893_vm14, %v3899_v56, %v3887_v0 }
0x104f   : > { %v3911_v6 = vadd.f32 1.0, %v3905_v5  ;;  %v3918_v10 = vmul.f32 %v3912_v4, %v3762_v7 }
0x1051   : > { %v3917_v9 = vmul.f32 %v3911_v6, %v3761_v48 }
0x1053   : > { %5081 = vmatprep.mubr.msk.f32.mxu0 %vm3927_vm10, %v3917_v9 }
0x1054   : > { %5082 = vmatmul.mubr.msk.f32.gmra.mxu0 %vm3927_vm10, %v3918_v10 }
0x1080   : > { %v5077_v37 = vpop.f32.mrf.mxu0 }
0x1081   : > { %v4042_v44 = vadd.f32 %v5077_v37, %v6208_v11 }
0x1082   : > { %v4012_v21 = vpop.f32.mrf.mxu0 }
0x1083   : > { %v4055_v33 = vadd.f32 %v4531_v30, %v4042_v44  ;;  %v4041_v38 = vadd.f32 %v4012_v21, %v6211_v24 }
0x1085   : > { %4061 = vst.msk [vmem:[#allocation2 + $0x8] sm:$0xff] %vm851_vm3, %v4055_v33  ;;  %v4054_v25 = vadd.f32 %v4531_v30, %v4041_v38 }
0x1087   : > { %4060 = vst.msk [vmem:[#allocation2] sm:$0xff] %vm851_vm3, %v4054_v25 }
0x110c   : > { %v5080_v8 = vpop.f32.mrf.mxu0 }
0x110d   : > { %v4044_v46 = vadd.f32 %v5080_v8, %v6230_v41 }
0x110e   : > { %v4022_v17 = vpop.f32.mrf.mxu0 }
0x110f   : > { %v4057_v13 = vadd.f32 %v4531_v30, %v4044_v46  ;;  %v4043_v14 = vadd.f32 %v4022_v17, %v6233_v43 }
0x1111   : > { %4063 = vst.msk [vmem:[#allocation2 + $0x18] sm:$0xff] %vm851_vm3, %v4057_v13  ;;  %v4056_v20 = vadd.f32 %v4531_v30, %v4043_v14 }
0x1113   : > { %4062 = vst.msk [vmem:[#allocation2 + $0x10] sm:$0xff] %vm851_vm3, %v4056_v20 }
0x1114   : > { %v5083_v11 = vpop.f32.mrf.mxu0 }
0x1115   : > { %v4046_v24 = vadd.f32 %v5083_v11, %v6247_v57 }
0x1116   : > { %v4032_v22 = vpop.f32.mrf.mxu0 }
0x1117   : > { %v4059_v27 = vadd.f32 %v4531_v30, %v4046_v24  ;;  %v4045_v23 = vadd.f32 %v4032_v22, %v6251_v40  ;;  %4069 = sbr.rel (%p4532_p6) target bundleno = 4753 (0x1291), region = 92 }
0x1119   : > { %4065 = vst.msk [vmem:[#allocation2 + $0x28] sm:$0xff] %vm851_vm3, %v4059_v27  ;;  %v4058_v26 = vadd.f32 %v4531_v30, %v4045_v23 }
0x111b   : > { %4064 = vst.msk [vmem:[#allocation2 + $0x20] sm:$0xff] %vm851_vm3, %v4058_v26 }
0x111c   : > { %v4074_v41 = vrot.slane %v4057_v13, 7  ;;  %vm4075_vm15 = vcmask 1041409   ;;  %vm4078_vm0 = vcmask 254976   ;;  %v4082_v43 = vmul.f32 %v4054_v25, %v4054_v25  ;;  %v4125_v45 = vld [vmem:[%s6452_s29 + $0x18] sm:$0xff]  ;;  %v4124_v55 = vld [vmem:[%s6452_s29 + $0x10] sm:$0xff]  ;;  %v4123_v52 = vld [vmem:[%s6452_s29 + $0x8] sm:$0xff] }
0x111d   : > { %v4083_v36 = vmul.f32 %v4057_v13, %v4057_v13  ;;  %v5341_v53 = vmov 0.0   ;;  %vm5342_vm1 = vmmov 0   ;;  %v4122_v31 = vld [vmem:[%s6452_s29] sm:$0xff]  ;;  %vm4209_vm2 = vcmask 74752  }
0x111e   : > { %v4076_v28 = vsel %vm4075_vm15, %v4074_v41, %v4054_v25  ;;  %5084 = vmatprep.subr.mxu0 %v5341_v53  ;;  %5092 = vmatprep.mubr.msk.f32.mxu0 %vm5342_vm1, %v5341_v53  ;;  %v4533_v51 = vld [vmem:[%s6453_s24] ss:$0 sm:$0xff]  ;;  %v4534_v54 = vld [vmem:[%s6454_s13 + $0x1] ss:$0 sm:$0xff] }
0x111f   : > { %v4079_v57 = vsel %vm4078_vm0, %v4076_v28, 0.0  ;;  %v4086_v29 = vrot.slane %v4083_v36, 7  ;;  %5085 = vmatpush3.msra.mxu0 %v4125_v45  ;;  %v4535_v0 = vld [vmem:[%s6455_s0] ss:$0 sm:$0xff] }
0x1120   : > { %4080 = vadd.xlane.f32.xlu0 %v4079_v57  ;;  %5086 = vmatprep.subr.mxu0 %v5341_v53 }
0x1121   : > { %v4087_v40 = vsel %vm4075_vm15, %v4086_v29, %v4082_v43  ;;  %5087 = vmatpush3.msra.mxu0 %v4124_v55 }
0x1122   : > { %v4089_v42 = vsel %vm4078_vm0, %v4087_v40, 0.0  ;;  %5088 = vmatprep.subr.mxu0 %v5341_v53 }
0x1123   : > { %5089 = vmatpush3.msra.mxu0 %v4123_v52 }
0x1124   : > { %4090 = vadd.xlane.f32.xlu0 %v4089_v42  ;;  %5090 = vmatprep.subr.mxu0 %v5341_v53 }
0x1125   : > { %5091 = vmatpush3.msra.mxu0 %v4122_v31 }
0x11a9   : > { %v4081_v47 = vpop.xlane.xlu0 %4080 }
0x11aa   : > { %v4092_v12 = vmul.f32 0.03125, %v4081_v47 }
0x11ac   : > { %v4094_v16 = vmul.f32 %v4092_v12, %v4092_v12  ;;  %v4099_v61 = vrot.slane %v4092_v12, 1  ;;  %v4102_v39 = vsub.f32 %v4054_v25, %v4092_v12 }
0x11ad   : > { %v4091_v32 = vpop.xlane.xlu0 %4090 }
0x11ae   : > { %v4093_v59 = vmul.f32 0.03125, %v4091_v32  ;;  %v4103_v50 = vsub.f32 %v4057_v13, %v4099_v61 }
0x11b0   : > { %v4095_v19 = vsub.f32 %v4093_v59, %v4094_v16 }
0x11b2   : > { %v4096_v60 = vadd.f32 1e-05, %v4095_v19 }
0x11b4   : > { %5289 = vrsqrt.f32 %v4096_v60 }
0x11c1   : > { %v5290_v34 = vpop.eup %5289 }
0x11c2   : > { %v4105_v58 = vrot.slane %v5290_v34, 1  ;;  %v4108_v35 = vmul.f32 %v5290_v34, %v4102_v39 }
0x11c4   : > { %v4109_v62 = vmul.f32 %v4105_v58, %v4103_v50  ;;  %v4114_v63 = vmul.f32 %v4533_v51, %v4108_v35 }
0x11c6   : > { %v4115_v15 = vmul.f32 %v4533_v51, %v4109_v62  ;;  %v4120_v1 = vadd.f32 %v4534_v54, %v4114_v63 }
0x11c8   : > { %v4121_v49 = vadd.f32 %v4534_v54, %v4115_v15 }
0x11ca   : > { %v4135_v2 = vrot.slane %v4121_v49, 7 }
0x11cc   : > { %v4136_v3 = vsel %vm4075_vm15, %v4135_v2, %v4120_v1 }
0x11cd   : > { %5093 = vmatmul.mubr.msk.f32.vlgmr.msra.gmra.mxu0 %vm851_vm3, %v4136_v3 }
0x128d   : > { %v4205_v18 = vpop.f32.mrf.mxu0 }
0x128e   : > { %v4206_v56 = vadd.f32 %v4535_v0, %v4205_v18 }
0x128f   : > { %v5094_v4 = vpop.f32.mrf.mxu0 }
0x1290   : > { %4210 = vst.msk [vmem:[#allocation3] sm:$0x3] %vm4209_vm2, %v4206_v56 }
0x1291 PF: > { %p5112_p7 = scmp.eq.s32.totalorder %s5440_s25, 1  ;;  %s5343_s19 = smov [#allocation3]  }
0x1292   : > { %s4224_s27 = sshll.u32 %s5343_s19, 4  ;;  %s4225_s27 = int_to_ptr.vmem [resolvable:$true] %s4224_s27 }
0x1293   : > { %s5291_s21 = scalar_lea.vmem %s4225_s27, 32  ;;  %p5298_p11 = scmp.lt.s32.totalorder %s4225_s27, %s4225_s27 }
0x1294   : > { %p5292_p8 = scmp.ne.s32.totalorder %s4225_s27, %s5291_s21  ;;  %p5299_p12 = scmp.lt.s32.totalorder %s5291_s21, %s5291_s21 }
0x1296   : > { %p5293_p9 = pnand %p5292_p8, %p5112_p7  ;;  %p5300_p13 = por %p5299_p12, %p5298_p11 }
0x1298   : > { %p5294_p10 = pneg %p5293_p9 }
0x129a   : > { %p5301_p0 = pnand %p5300_p13, %p5294_p10 }
0x129c   : > { %5304 = shalt.err (!%p5301_p0)
}
0x129d   : > { %s6456_s26 = sld [smem:[#allocation16_spill]] }
0x12a3   : > { %5109 = dma.vmem_to_hbm [thread:$0]  (%p5112_p7), %s4225_s27, 32, %s6456_s26, [#allocation4]  }
0x12a4   : > { %5320 = dma.done.wait (%p5112_p7), [#allocation4], 32  }
0x12a5   : > { %5322 = vsyncadd (%p5112_p7), [#allocation4], 4294967264 }
0x12a6 PF: > { %s6457_s15 = sld [smem:[#allocation6_spill]] }
0x12ac   : > { %s29_s24 = sadd.s32 1, %s6457_s15  }
0x12ad   : > { %p26_p1 = scmp.ge.s32.totalorder %s29_s24, 4  }
0x12af   :  { %28 = sbr.rel (!%p26_p1) target bundleno = 11 (0xb), region = 155 }
0x12b4   :  { %4250 = vsyncpa [#allocation4], 1 }
0x12b5   :  { %4252 = vsyncpa [#allocation4 + $0x1], 1 }

</bundles_post_ra>
